<compile_context>
chip_gen: v6e
topology: v6e:2x2x1
jax: 0.10.0
libtpu: 0.0.40
codegen_flags: <defaults>
</compile_context>

<pallas_src>
import functools
import math

import jax
import jax.numpy as jnp
from jax.experimental import pallas as pl
from jax.experimental.pallas import tpu as pltpu


# ----------------------------------------------------------------------------
# Helpers
# ----------------------------------------------------------------------------
def _vmem_limit_bytes():
    """Per-generation VMEM budget (v7x has half the VMEM of v5e/v6e)."""
    try:
        cap = pltpu.get_tpu_info().vmem_capacity_bytes
    except Exception:
        cap = 64 * 1024 * 1024
    return int(min(cap * 3 // 4, 100 * 1024 * 1024))


def _pick_tile(n, candidates):
    for t in candidates:
        if t <= n and n % t == 0:
            return t
    return n


# ----------------------------------------------------------------------------
# Blocked GEMM + bias: o = x @ W + b   (used for the hoisted input projections)
# ----------------------------------------------------------------------------
def _proj_kernel(x_ref, w_ref, b_ref, o_ref):
    o_ref[...] = (
        jnp.dot(x_ref[...].astype(jnp.bfloat16), w_ref[...],
                preferred_element_type=jnp.float32)
        + b_ref[...]
    )


def proj_forward(x, w, b):
    """x: (M, K) f32; w: (K, N) bf16; b: (1, N) f32 -> (M, N) f32."""
    M, K = x.shape
    N = w.shape[1]
    tm = _pick_tile(M, (512, 256, 128, 64, 32, 16, 8))
    tn = _pick_tile(N, (1024, 512, 256, 128))
    return pl.pallas_call(
        _proj_kernel,
        out_shape=jax.ShapeDtypeStruct((M, N), jnp.float32),
        grid_spec=pltpu.PrefetchScalarGridSpec(
            num_scalar_prefetch=0,
            grid=(M // tm, N // tn),
            in_specs=[
                pl.BlockSpec((tm, K), lambda i, j: (i, 0)),
                pl.BlockSpec((K, tn), lambda i, j: (0, j)),
                pl.BlockSpec((1, tn), lambda i, j: (0, j)),
            ],
            out_specs=pl.BlockSpec((tm, tn), lambda i, j: (i, j)),
        ),
        compiler_params=pltpu.CompilerParams(
            dimension_semantics=("parallel", "parallel"),
            vmem_limit_bytes=_vmem_limit_bytes()),
    )(x, w, b)


# ----------------------------------------------------------------------------
# Encoder LSTM recurrence.  gates_x = x @ W_ih + (b_ih + b_hh) is precomputed;
# per step only h_prev @ W_hh runs on the MXU.  W_hh lives in HBM (pl.ANY) and
# is copied once into a single VMEM scratch buffer at t == 0.
# ----------------------------------------------------------------------------
def _lstm_rec_kernel(gx_ref, whh_hbm, out_ref, h_sc, c_sc, whh_sc, sem,
                     *, hidden):
    t = pl.program_id(0)
    H = hidden

    @pl.when(t == 0)
    def _():
        cp = pltpu.make_async_copy(whh_hbm, whh_sc, sem)
        cp.start()
        cp.wait()
        h_sc[...] = jnp.zeros_like(h_sc)
        c_sc[...] = jnp.zeros_like(c_sc)

    gates = gx_ref[0] + jnp.dot(h_sc[...].astype(jnp.bfloat16), whh_sc[...],
                                preferred_element_type=jnp.float32)

    # PyTorch gate order: i, f, g, o  (H is a multiple of 128 -> aligned slices)
    i = jax.nn.sigmoid(gates[:, 0 * H:1 * H])
    f = jax.nn.sigmoid(gates[:, 1 * H:2 * H])
    g = jnp.tanh(gates[:, 2 * H:3 * H])
    o = jax.nn.sigmoid(gates[:, 3 * H:4 * H])

    c_new = f * c_sc[...] + i * g
    h_new = o * jnp.tanh(c_new)
    c_sc[...] = c_new
    h_sc[...] = h_new
    out_ref[0] = h_new          # ReLU is fused into the mid kernel


def lstm_recurrence(gates_x, w_hh, hidden):
    """gates_x: (T, B, 4H) f32; w_hh: (H, 4H) bf16 -> hidden states (T, B, H)."""
    T, B, G = gates_x.shape
    H = hidden
    kernel = functools.partial(_lstm_rec_kernel, hidden=H)
    return pl.pallas_call(
        kernel,
        out_shape=jax.ShapeDtypeStruct((T, B, H), jnp.float32),
        grid_spec=pltpu.PrefetchScalarGridSpec(
            num_scalar_prefetch=0,
            grid=(T,),
            in_specs=[
                pl.BlockSpec((1, B, G), lambda t: (t, 0, 0)),
                pl.BlockSpec(memory_space=pl.ANY),       # W_hh stays in HBM
            ],
            out_specs=pl.BlockSpec((1, B, H), lambda t: (t, 0, 0)),
            scratch_shapes=[
                pltpu.VMEM((B, H), jnp.float32),          # h
                pltpu.VMEM((B, H), jnp.float32),          # c
                pltpu.VMEM((H, G), jnp.bfloat16),         # resident W_hh copy
                pltpu.SemaphoreType.DMA(()),
            ],
        ),
        compiler_params=pltpu.CompilerParams(
            dimension_semantics=("arbitrary",),
            vmem_limit_bytes=_vmem_limit_bytes()),
    )(gates_x, w_hh)


# ----------------------------------------------------------------------------
# Fused decoder: both LSTMs (fc41, fc42) in one recurrent kernel.  They share
# the same input h3; their input projections were fused into one GEMM giving
# gates_x_dec = h3 @ [W_ih41 | W_ih42] + [b41 | b42]  of width 8*IN.
# ----------------------------------------------------------------------------
def _dual_lstm_kernel(gx_ref, whh1_hbm, whh2_hbm, mu_ref, lv_ref,
                      h1_sc, c1_sc, h2_sc, c2_sc, whh1_sc, whh2_sc, sem,
                      *, out_dim):
    t = pl.program_id(0)
    D = out_dim

    @pl.when(t == 0)
    def _():
        cp1 = pltpu.make_async_copy(whh1_hbm, whh1_sc, sem.at[0])
        cp2 = pltpu.make_async_copy(whh2_hbm, whh2_sc, sem.at[1])
        cp1.start()
        cp2.start()
        cp1.wait()
        cp2.wait()
        h1_sc[...] = jnp.zeros_like(h1_sc)
        c1_sc[...] = jnp.zeros_like(c1_sc)
        h2_sc[...] = jnp.zeros_like(h2_sc)
        c2_sc[...] = jnp.zeros_like(c2_sc)

    gx = gx_ref[0]                                   # (B, 8D), lane-aligned
    g1 = gx[:, :4 * D] + jnp.dot(h1_sc[...].astype(jnp.bfloat16), whh1_sc[...],
                                 preferred_element_type=jnp.float32)
    g2 = gx[:, 4 * D:] + jnp.dot(h2_sc[...].astype(jnp.bfloat16), whh2_sc[...],
                                 preferred_element_type=jnp.float32)

    def cell(gates, c_prev):
        i = jax.nn.sigmoid(gates[:, 0 * D:1 * D])
        f = jax.nn.sigmoid(gates[:, 1 * D:2 * D])
        g = jnp.tanh(gates[:, 2 * D:3 * D])
        o = jax.nn.sigmoid(gates[:, 3 * D:4 * D])
        c = f * c_prev + i * g
        h = o * jnp.tanh(c)
        return h, c

    h1, c1 = cell(g1, c1_sc[...])
    h2, c2 = cell(g2, c2_sc[...])
    h1_sc[...] = h1
    c1_sc[...] = c1
    h2_sc[...] = h2
    c2_sc[...] = c2
    mu_ref[0] = jax.nn.sigmoid(h1)    # muTheta = sigmoid(fc41 output)
    lv_ref[0] = h2                    # logvarTheta = fc42 output


def dual_lstm_recurrence(gates_x, w_hh_a, w_hh_b, out_dim):
    """gates_x: (T, B, 8*D) f32; w_hh_*: (D, 4*D) bf16."""
    T, B, G8 = gates_x.shape
    D = out_dim
    kernel = functools.partial(_dual_lstm_kernel, out_dim=D)
    return pl.pallas_call(
        kernel,
        out_shape=(jax.ShapeDtypeStruct((T, B, D), jnp.float32),
                   jax.ShapeDtypeStruct((T, B, D), jnp.float32)),
        grid_spec=pltpu.PrefetchScalarGridSpec(
            num_scalar_prefetch=0,
            grid=(T,),
            in_specs=[
                pl.BlockSpec((1, B, G8), lambda t: (t, 0, 0)),
                pl.BlockSpec(memory_space=pl.ANY),
                pl.BlockSpec(memory_space=pl.ANY),
            ],
            out_specs=[pl.BlockSpec((1, B, D), lambda t: (t, 0, 0)),
                       pl.BlockSpec((1, B, D), lambda t: (t, 0, 0))],
            scratch_shapes=[
                pltpu.VMEM((B, D), jnp.float32),          # h (fc41)
                pltpu.VMEM((B, D), jnp.float32),          # c (fc41)
                pltpu.VMEM((B, D), jnp.float32),          # h (fc42)
                pltpu.VMEM((B, D), jnp.float32),          # c (fc42)
                pltpu.VMEM((D, 4 * D), jnp.bfloat16),     # W_hh41 resident
                pltpu.VMEM((D, 4 * D), jnp.bfloat16),     # W_hh42 resident
                pltpu.SemaphoreType.DMA((2,)),
            ],
        ),
        compiler_params=pltpu.CompilerParams(
            dimension_semantics=("arbitrary",),
            vmem_limit_bytes=_vmem_limit_bytes()),
    )(gates_x, w_hh_a, w_hh_b)


# ----------------------------------------------------------------------------
# Fused middle kernel: relu(h1) -> [fc21|fc22] fused matmul (mu|logvar packed
# into one lane-dense 2L slab) -> reparameterize -> fc3 -> relu(h3).
# Row-tiled over N = T*B with a parallel grid axis.
# ----------------------------------------------------------------------------
def _mid_kernel(*refs, latent, training):
    if training:
        (h1_ref, eps_ref, wml_ref, bml_ref, w3_ref, b3_ref,
         ml_ref, h3_ref) = refs
    else:
        (h1_ref, wml_ref, bml_ref, w3_ref, b3_ref,
         ml_ref, h3_ref) = refs
        eps_ref = None

    h1 = jnp.maximum(h1_ref[...], 0.0)                            # relu
    ml = (jnp.dot(h1.astype(jnp.bfloat16), wml_ref[...],
                  preferred_element_type=jnp.float32) + bml_ref[...])
    ml_ref[...] = ml                                              # [mu | logvar]

    mu = ml[:, :latent]
    logvar = ml[:, latent:]
    if training:
        z = mu + jnp.exp(0.5 * logvar) * eps_ref[...]             # reparameterize
    else:
        z = mu
    h3 = (jnp.dot(z.astype(jnp.bfloat16), w3_ref[...],
                  preferred_element_type=jnp.float32) + b3_ref[...])
    h3_ref[...] = jnp.maximum(h3, 0.0)                            # relu


def mid_forward(h1_flat, eps_flat, w_ml, b_ml, w3, b3, *, training):
    M, H = h1_flat.shape
    L2 = w_ml.shape[1]
    L = L2 // 2
    tm = _pick_tile(M, (512, 256, 128, 64, 32, 16, 8))
    kernel = functools.partial(_mid_kernel, latent=L, training=training)

    in_specs = [pl.BlockSpec((tm, H), lambda i: (i, 0))]
    args = [h1_flat]
    if training:
        in_specs.append(pl.BlockSpec((tm, L), lambda i: (i, 0)))
        args.append(eps_flat)
    in_specs += [
        pl.BlockSpec((H, L2), lambda i: (0, 0)),
        pl.BlockSpec((1, L2), lambda i: (0, 0)),
        pl.BlockSpec((L, H), lambda i: (0, 0)),
        pl.BlockSpec((1, H), lambda i: (0, 0)),
    ]
    args += [w_ml, b_ml, w3, b3]

    return pl.pallas_call(
        kernel,
        out_shape=(jax.ShapeDtypeStruct((M, L2), jnp.float32),
                   jax.ShapeDtypeStruct((M, H), jnp.float32)),
        grid_spec=pltpu.PrefetchScalarGridSpec(
            num_scalar_prefetch=0,
            grid=(M // tm,),
            in_specs=in_specs,
            out_specs=[pl.BlockSpec((tm, L2), lambda i: (i, 0)),
                       pl.BlockSpec((tm, H), lambda i: (i, 0))],
        ),
        compiler_params=pltpu.CompilerParams(
            dimension_semantics=("parallel",),
            vmem_limit_bytes=_vmem_limit_bytes()),
    )(*args)


# ----------------------------------------------------------------------------
# Full VAEGauss forward.
# ----------------------------------------------------------------------------
def vae_gauss_forward(x, params, eps=None, *, training=True):
    T, B, IN = x.shape
    H = params["w_hh1"].shape[0]
    L2 = params["w_mulogvar"].shape[1]
    L = L2 // 2

    # ---- encode: hoisted input projection + LSTM recurrence (fc1) ----
    x_flat = x.reshape(T * B, IN)
    gx1 = proj_forward(x_flat, params["w_ih1"], params["b1"])        # (TB, 4H)
    h1 = lstm_recurrence(gx1.reshape(T, B, 4 * H), params["w_hh1"], H)

    # ---- mid: relu -> fused fc21|fc22 -> reparameterize -> fc3 -> relu ----
    eps_flat = eps.reshape(T * B, L) if training else None
    mulogvar, h3_flat = mid_forward(
        h1.reshape(T * B, H), eps_flat,
        params["w_mulogvar"], params["b_mulogvar"],
        params["w3"], params["b3"], training=training)
    mu = mulogvar[:, :L].reshape(T, B, L)
    logvar = mulogvar[:, L:].reshape(T, B, L)

    # ---- decode: fused fc41/fc42 input projection + fused dual recurrence ----
    gxd = proj_forward(h3_flat, params["w_ih_dec"], params["b_dec"])  # (TB, 8*IN)
    muTheta, logvarTheta = dual_lstm_recurrence(
        gxd.reshape(T, B, 8 * IN), params["w_hh41"], params["w_hh42"], IN)

    return muTheta, logvarTheta, mu, logvar


# ----------------------------------------------------------------------------
# Deterministic PyTorch-style parameter init (uniform(-1/sqrt(fan), 1/sqrt(fan))).
# Weights stored pre-transposed ([in, out]) in bfloat16; biases in float32.
# ----------------------------------------------------------------------------
def init_params(key, in_dim, hidden, latent):
    ks = jax.random.split(key, 18)

    def u(k, shape, fan):
        bound = 1.0 / math.sqrt(fan)
        return jax.random.uniform(k, shape, jnp.float32, -bound, bound)

    bf = jnp.bfloat16
    p = {}
    # fc1: LSTM(in_dim -> hidden); bias = b_ih + b_hh folded into the projection
    p["w_ih1"] = u(ks[0], (in_dim, 4 * hidden), hidden).astype(bf)
    p["w_hh1"] = u(ks[1], (hidden, 4 * hidden), hidden).astype(bf)
    p["b1"] = u(ks[2], (1, 4 * hidden), hidden) + u(ks[3], (1, 4 * hidden), hidden)
    # fc21 / fc22 fused: Linear(hidden -> latent) x2 -> (hidden, 2*latent)
    w21 = u(ks[4], (hidden, latent), hidden)
    w22 = u(ks[6], (hidden, latent), hidden)
    p["w_mulogvar"] = jnp.concatenate([w21, w22], axis=1).astype(bf)
    b21 = u(ks[5], (1, latent), hidden)
    b22 = u(ks[7], (1, latent), hidden)
    p["b_mulogvar"] = jnp.concatenate([b21, b22], axis=1)
    # fc3: Linear(latent -> hidden)
    p["w3"] = u(ks[8], (latent, hidden), latent).astype(bf)
    p["b3"] = u(ks[9], (1, hidden), latent)
    # fc41 / fc42: LSTM(hidden -> in_dim); input projections fused column-wise
    w_ih41 = u(ks[10], (hidden, 4 * in_dim), in_dim)
    w_ih42 = u(ks[14], (hidden, 4 * in_dim), in_dim)
    p["w_ih_dec"] = jnp.concatenate([w_ih41, w_ih42], axis=1).astype(bf)
    b41 = u(ks[12], (1, 4 * in_dim), in_dim) + u(ks[13], (1, 4 * in_dim), in_dim)
    b42 = u(ks[16], (1, 4 * in_dim), in_dim) + u(ks[17], (1, 4 * in_dim), in_dim)
    p["b_dec"] = jnp.concatenate([b41, b42], axis=1)
    p["w_hh41"] = u(ks[11], (in_dim, 4 * in_dim), in_dim).astype(bf)
    p["w_hh42"] = u(ks[15], (in_dim, 4 * in_dim), in_dim).astype(bf)
    return p


if __name__ == "__main__":
    # Small, lane/sublane-aligned stand-ins for (input_dim=1862, hidden=800,
    # latent=50): B >= 8 sublanes, H/IN multiples of 128, 2*L = 128 lanes.
    T, B = 8, 8
    IN, H, L = 256, 128, 64

    key = jax.random.PRNGKey(0)
    kx, keps, kp = jax.random.split(key, 3)
    x = jax.random.normal(kx, (T, B, IN), jnp.float32)
    # TODO(synk): torch's std.data.new(...).normal_() RNG stream is not
    # bit-reproducible in JAX; eps is drawn deterministically from PRNGKey(0).
    eps = jax.random.normal(keps, (T, B, L), jnp.float32)
    params = init_params(kp, IN, H, L)

    fwd = jax.jit(functools.partial(vae_gauss_forward, training=True))
    muTheta, logvarTheta, mu, logvar = fwd(x, params, eps)
    jax.block_until_ready((muTheta, logvarTheta, mu, logvar))

    assert muTheta.shape == (T, B, IN) and logvarTheta.shape == (T, B, IN)
    assert mu.shape == (T, B, L) and logvar.shape == (T, B, L)
    assert bool(jnp.all(jnp.isfinite(muTheta)))
    assert bool(jnp.all(jnp.isfinite(logvarTheta)))
    assert bool(jnp.all((muTheta >= 0.0) & (muTheta <= 1.0)))  # sigmoid range

    # Eval path (no eps input, z = mu).
    fwd_eval = jax.jit(functools.partial(vae_gauss_forward, training=False))
    outs_eval = fwd_eval(x, params)
    jax.block_until_ready(outs_eval)

    print("KERNEL_OK")
</pallas_src>

<mosaic_0001>
module attributes {stable_mosaic.version = 11 : i64} {
  func.func @_proj_kernel(%arg0: i32, %arg1: i32, %arg2: memref<64x256xf32, #tpu.memory_space<vmem>>, %arg3: memref<256x512xbf16, #tpu.memory_space<vmem>>, %arg4: memref<1x512xf32, #tpu.memory_space<vmem>>, %arg5: memref<64x512xf32, #tpu.memory_space<vmem>>) attributes {dimension_semantics = [#tpu.dimension_semantics<parallel>, #tpu.dimension_semantics<parallel>], iteration_bounds = array<i64: 1, 1>, scalar_prefetch = 0 : i64, scratch_operands = 0 : i64, tpu.core_type = #tpu.core_type<tc>, window_params = [{transform_indices = @transform_0, window_bounds = array<i64: 64, 256>}, {transform_indices = @transform_1, window_bounds = array<i64: 256, 512>}, {transform_indices = @transform_2, window_bounds = array<i64: 1, 512>}, {transform_indices = @transform_3, window_bounds = array<i64: 64, 512>}]} {
    %c0 = arith.constant 0 : index
    %c0_0 = arith.constant 0 : index
    %0 = vector.load %arg2[%c0, %c0_0] : memref<64x256xf32, #tpu.memory_space<vmem>>, vector<64x256xf32>
    %1 = arith.truncf %0 : vector<64x256xf32> to vector<64x256xbf16>
    %c0_1 = arith.constant 0 : index
    %c0_2 = arith.constant 0 : index
    %2 = vector.load %arg3[%c0_1, %c0_2] : memref<256x512xbf16, #tpu.memory_space<vmem>>, vector<256x512xbf16>
    %cst = arith.constant dense<0.000000e+00> : vector<64x512xf32>
    %3 = tpu.matmul %1, %2, %cst {dimension_numbers = #tpu.dot_dimension_numbers<[1], [0], [0], [1], [0, 0, 1, 1], [], []>} : vector<64x256xbf16>, vector<256x512xbf16>, vector<64x512xf32> -> vector<64x512xf32>
    %c0_3 = arith.constant 0 : index
    %c0_4 = arith.constant 0 : index
    %4 = vector.load %arg4[%c0_3, %c0_4] : memref<1x512xf32, #tpu.memory_space<vmem>>, vector<1x512xf32>
    %5 = vector.broadcast %4 : vector<1x512xf32> to vector<64x512xf32>
    %6 = arith.addf %3, %5 : vector<64x512xf32>
    %c0_5 = arith.constant 0 : index
    %c0_6 = arith.constant 0 : index
    %7 = vector.load %arg5[%c0_5, %c0_6] : memref<64x512xf32, #tpu.memory_space<vmem>>, vector<64x512xf32>
    tpu.vector_store %arg5[%c0_5, %c0_6], %6 {strides = array<i32>} : memref<64x512xf32, #tpu.memory_space<vmem>>, vector<64x512xf32>,
    return
  }
  func.func @transform_0(%arg0: i32, %arg1: i32) -> (i32, i32) {
    %c0_i32 = arith.constant 0 : i32
    %c0_i32_0 = arith.constant 0 : i32
    return %arg0, %c0_i32 : i32, i32
  }
  func.func @transform_1(%arg0: i32, %arg1: i32) -> (i32, i32) {
    %c0_i32 = arith.constant 0 : i32
    %c0_i32_0 = arith.constant 0 : i32
    return %c0_i32, %arg1 : i32, i32
  }
  func.func @transform_2(%arg0: i32, %arg1: i32) -> (i32, i32) {
    %c0_i32 = arith.constant 0 : i32
    %c0_i32_0 = arith.constant 0 : i32
    return %c0_i32, %arg1 : i32, i32
  }
  func.func @transform_3(%arg0: i32, %arg1: i32) -> (i32, i32) {
    %c0_i32 = arith.constant 0 : i32
    return %arg0, %arg1 : i32, i32
  }
}

module attributes {stable_mosaic.version = 11 : i64} {
  func.func @_proj_kernel(%arg0: i32, %arg1: i32, %arg2: memref<64x128xf32, #tpu.memory_space<vmem>>, %arg3: memref<128x1024xbf16, #tpu.memory_space<vmem>>, %arg4: memref<1x1024xf32, #tpu.memory_space<vmem>>, %arg5: memref<64x1024xf32, #tpu.memory_space<vmem>>) attributes {dimension_semantics = [#tpu.dimension_semantics<parallel>, #tpu.dimension_semantics<parallel>], iteration_bounds = array<i64: 1, 2>, scalar_prefetch = 0 : i64, scratch_operands = 0 : i64, tpu.core_type = #tpu.core_type<tc>, window_params = [{transform_indices = @transform_0, window_bounds = array<i64: 64, 128>}, {transform_indices = @transform_1, window_bounds = array<i64: 128, 1024>}, {transform_indices = @transform_2, window_bounds = array<i64: 1, 1024>}, {transform_indices = @transform_3, window_bounds = array<i64: 64, 1024>}]} {
    %c0 = arith.constant 0 : index
    %c0_0 = arith.constant 0 : index
    %0 = vector.load %arg2[%c0, %c0_0] : memref<64x128xf32, #tpu.memory_space<vmem>>, vector<64x128xf32>
    %1 = arith.truncf %0 : vector<64x128xf32> to vector<64x128xbf16>
    %c0_1 = arith.constant 0 : index
    %c0_2 = arith.constant 0 : index
    %2 = vector.load %arg3[%c0_1, %c0_2] : memref<128x1024xbf16, #tpu.memory_space<vmem>>, vector<128x1024xbf16>
    %cst = arith.constant dense<0.000000e+00> : vector<64x1024xf32>
    %3 = tpu.matmul %1, %2, %cst {dimension_numbers = #tpu.dot_dimension_numbers<[1], [0], [0], [1], [0, 0, 1, 1], [], []>} : vector<64x128xbf16>, vector<128x1024xbf16>, vector<64x1024xf32> -> vector<64x1024xf32>
    %c0_3 = arith.constant 0 : index
    %c0_4 = arith.constant 0 : index
    %4 = vector.load %arg4[%c0_3, %c0_4] : memref<1x1024xf32, #tpu.memory_space<vmem>>, vector<1x1024xf32>
    %5 = vector.broadcast %4 : vector<1x1024xf32> to vector<64x1024xf32>
    %6 = arith.addf %3, %5 : vector<64x1024xf32>
    %c0_5 = arith.constant 0 : index
    %c0_6 = arith.constant 0 : index
    %7 = vector.load %arg5[%c0_5, %c0_6] : memref<64x1024xf32, #tpu.memory_space<vmem>>, vector<64x1024xf32>
    tpu.vector_store %arg5[%c0_5, %c0_6], %6 {strides = array<i32>} : memref<64x1024xf32, #tpu.memory_space<vmem>>, vector<64x1024xf32>,
    return
  }
  func.func @transform_0(%arg0: i32, %arg1: i32) -> (i32, i32) {
    %c0_i32 = arith.constant 0 : i32
    %c0_i32_0 = arith.constant 0 : i32
    return %arg0, %c0_i32 : i32, i32
  }
  func.func @transform_1(%arg0: i32, %arg1: i32) -> (i32, i32) {
    %c0_i32 = arith.constant 0 : i32
    %c0_i32_0 = arith.constant 0 : i32
    return %c0_i32, %arg1 : i32, i32
  }
  func.func @transform_2(%arg0: i32, %arg1: i32) -> (i32, i32) {
    %c0_i32 = arith.constant 0 : i32
    %c0_i32_0 = arith.constant 0 : i32
    return %c0_i32, %arg1 : i32, i32
  }
  func.func @transform_3(%arg0: i32, %arg1: i32) -> (i32, i32) {
    %c0_i32 = arith.constant 0 : i32
    return %arg0, %arg1 : i32, i32
  }
}

module attributes {stable_mosaic.version = 11 : i64} {
  func.func @_lstm_rec_kernel(%arg0: i32, %arg1: memref<1x8x512xf32, #tpu.memory_space<vmem>>, %arg2: memref<128x512xbf16, #tpu.memory_space<any>>, %arg3: memref<1x8x128xf32, #tpu.memory_space<vmem>>, %arg4: memref<8x128xf32, #tpu.memory_space<vmem>>, %arg5: memref<8x128xf32, #tpu.memory_space<vmem>>, %arg6: memref<128x512xbf16, #tpu.memory_space<vmem>>, %arg7: memref<!tpu.dma_semaphore, #tpu.memory_space<semaphore_mem>>) attributes {dimension_semantics = [#tpu.dimension_semantics<arbitrary>], iteration_bounds = array<i64: 8>, scalar_prefetch = 0 : i64, scratch_operands = 4 : i64, tpu.core_type = #tpu.core_type<tc>, window_params = [{transform_indices = @transform_0, window_bounds = array<i64: 1, 8, 512>}, {}, {transform_indices = @transform_2, window_bounds = array<i64: 1, 8, 128>}]} {
    %c0_i32 = arith.constant 0 : i32
    %0 = arith.cmpi eq, %arg0, %c0_i32 : i32
    %1 = arith.extui %0 : i1 to i32
    %c0_i32_0 = arith.constant 0 : i32
    %2 = arith.cmpi ne, %1, %c0_i32_0 : i32
    scf.if %2 {
      tpu.enqueue_dma source(%arg2 : memref<128x512xbf16, #tpu.memory_space<any>>) target(%arg6 : memref<128x512xbf16, #tpu.memory_space<vmem>>) target_semaphore(%arg7 : memref<!tpu.dma_semaphore, #tpu.memory_space<semaphore_mem>>)
      tpu.wait_dma2 semaphore(%arg7 : memref<!tpu.dma_semaphore, #tpu.memory_space<semaphore_mem>>) src(%arg2 : memref<128x512xbf16, #tpu.memory_space<any>>) dst(%arg6 : memref<128x512xbf16, #tpu.memory_space<vmem>>)
      %cst_19 = arith.constant 0.000000e+00 : f32
      %41 = vector.broadcast %cst_19 : f32 to vector<8x128xf32>
      %c0_20 = arith.constant 0 : index
      %c0_21 = arith.constant 0 : index
      %42 = vector.load %arg4[%c0_20, %c0_21] : memref<8x128xf32, #tpu.memory_space<vmem>>, vector<8x128xf32>
      tpu.vector_store %arg4[%c0_20, %c0_21], %41 {strides = array<i32>} : memref<8x128xf32, #tpu.memory_space<vmem>>, vector<8x128xf32>,
      %cst_22 = arith.constant 0.000000e+00 : f32
      %43 = vector.broadcast %cst_22 : f32 to vector<8x128xf32>
      %c0_23 = arith.constant 0 : index
      %c0_24 = arith.constant 0 : index
      %44 = vector.load %arg5[%c0_23, %c0_24] : memref<8x128xf32, #tpu.memory_space<vmem>>, vector<8x128xf32>
      tpu.vector_store %arg5[%c0_23, %c0_24], %43 {strides = array<i32>} : memref<8x128xf32, #tpu.memory_space<vmem>>, vector<8x128xf32>,
    } else {
    }
    %c0 = arith.constant 0 : index
    %c0_1 = arith.constant 0 : index
    %c0_2 = arith.constant 0 : index
    %3 = vector.load %arg1[%c0, %c0_1, %c0_2] : memref<1x8x512xf32, #tpu.memory_space<vmem>>, vector<1x8x512xf32>
    %4 = vector.shape_cast %3 : vector<1x8x512xf32> to vector<8x512xf32>
    %c0_3 = arith.constant 0 : index
    %c0_4 = arith.constant 0 : index
    %5 = vector.load %arg4[%c0_3, %c0_4] : memref<8x128xf32, #tpu.memory_space<vmem>>, vector<8x128xf32>
    %6 = arith.truncf %5 : vector<8x128xf32> to vector<8x128xbf16>
    %c0_5 = arith.constant 0 : index
    %c0_6 = arith.constant 0 : index
    %7 = vector.load %arg6[%c0_5, %c0_6] : memref<128x512xbf16, #tpu.memory_space<vmem>>, vector<128x512xbf16>
    %cst = arith.constant dense<0.000000e+00> : vector<8x512xf32>
    %8 = tpu.matmul %6, %7, %cst {dimension_numbers = #tpu.dot_dimension_numbers<[1], [0], [0], [1], [0, 0, 1, 1], [], []>} : vector<8x128xbf16>, vector<128x512xbf16>, vector<8x512xf32> -> vector<8x512xf32>
    %9 = arith.addf %4, %8 : vector<8x512xf32>
    %10 = vector.extract_strided_slice %9 {offsets = [0, 0], sizes = [8, 128], strides = [1, 1]} : vector<8x512xf32> to vector<8x128xf32>
    %11 = arith.negf %10 : vector<8x128xf32>
    %12 = math.exp %11 : vector<8x128xf32>
    %cst_7 = arith.constant 1.000000e+00 : f32
    %13 = vector.broadcast %cst_7 : f32 to vector<8x128xf32>
    %14 = arith.addf %13, %12 : vector<8x128xf32>
    %15 = arith.divf %13, %14 : vector<8x128xf32>
    %16 = vector.extract_strided_slice %9 {offsets = [0, 128], sizes = [8, 128], strides = [1, 1]} : vector<8x512xf32> to vector<8x128xf32>
    %17 = arith.negf %16 : vector<8x128xf32>
    %18 = math.exp %17 : vector<8x128xf32>
    %cst_8 = arith.constant 1.000000e+00 : f32
    %19 = vector.broadcast %cst_8 : f32 to vector<8x128xf32>
    %20 = arith.addf %19, %18 : vector<8x128xf32>
    %21 = arith.divf %19, %20 : vector<8x128xf32>
    %22 = vector.extract_strided_slice %9 {offsets = [0, 256], sizes = [8, 128], strides = [1, 1]} : vector<8x512xf32> to vector<8x128xf32>
    %23 = math.tanh %22 : vector<8x128xf32>
    %24 = vector.extract_strided_slice %9 {offsets = [0, 384], sizes = [8, 128], strides = [1, 1]} : vector<8x512xf32> to vector<8x128xf32>
    %25 = arith.negf %24 : vector<8x128xf32>
    %26 = math.exp %25 : vector<8x128xf32>
    %cst_9 = arith.constant 1.000000e+00 : f32
    %27 = vector.broadcast %cst_9 : f32 to vector<8x128xf32>
    %28 = arith.addf %27, %26 : vector<8x128xf32>
    %29 = arith.divf %27, %28 : vector<8x128xf32>
    %c0_10 = arith.constant 0 : index
    %c0_11 = arith.constant 0 : index
    %30 = vector.load %arg5[%c0_10, %c0_11] : memref<8x128xf32, #tpu.memory_space<vmem>>, vector<8x128xf32>
    %31 = arith.mulf %21, %30 : vector<8x128xf32>
    %32 = arith.mulf %15, %23 : vector<8x128xf32>
    %33 = arith.addf %31, %32 : vector<8x128xf32>
    %34 = math.tanh %33 : vector<8x128xf32>
    %35 = arith.mulf %29, %34 : vector<8x128xf32>
    %c0_12 = arith.constant 0 : index
    %c0_13 = arith.constant 0 : index
    %36 = vector.load %arg5[%c0_12, %c0_13] : memref<8x128xf32, #tpu.memory_space<vmem>>, vector<8x128xf32>
    tpu.vector_store %arg5[%c0_12, %c0_13], %33 {strides = array<i32>} : memref<8x128xf32, #tpu.memory_space<vmem>>, vector<8x128xf32>,
    %c0_14 = arith.constant 0 : index
    %c0_15 = arith.constant 0 : index
    %37 = vector.load %arg4[%c0_14, %c0_15] : memref<8x128xf32, #tpu.memory_space<vmem>>, vector<8x128xf32>
    tpu.vector_store %arg4[%c0_14, %c0_15], %35 {strides = array<i32>} : memref<8x128xf32, #tpu.memory_space<vmem>>, vector<8x128xf32>,
    %c0_16 = arith.constant 0 : index
    %c0_17 = arith.constant 0 : index
    %c0_18 = arith.constant 0 : index
    %38 = vector.load %arg3[%c0_16, %c0_17, %c0_18] : memref<1x8x128xf32, #tpu.memory_space<vmem>>, vector<1x8x128xf32>
    %39 = vector.shape_cast %38 : vector<1x8x128xf32> to vector<8x128xf32>
    %40 = vector.shape_cast %35 : vector<8x128xf32> to vector<1x8x128xf32>
    tpu.vector_store %arg3[%c0_16, %c0_17, %c0_18], %40 {strides = array<i32>} : memref<1x8x128xf32, #tpu.memory_space<vmem>>, vector<1x8x128xf32>,
    return
  }
  func.func @transform_0(%arg0: i32) -> (i32, i32, i32) {
    %c0_i32 = arith.constant 0 : i32
    %c0_i32_0 = arith.constant 0 : i32
    %c0_i32_1 = arith.constant 0 : i32
    return %arg0, %c0_i32, %c0_i32_0 : i32, i32, i32
  }
  func.func @transform_2(%arg0: i32) -> (i32, i32, i32) {
    %c0_i32 = arith.constant 0 : i32
    %c0_i32_0 = arith.constant 0 : i32
    %c0_i32_1 = arith.constant 0 : i32
    return %arg0, %c0_i32, %c0_i32_0 : i32, i32, i32
  }
}

module attributes {stable_mosaic.version = 11 : i64} {
  func.func @_mid_kernel(%arg0: i32, %arg1: memref<64x128xf32, #tpu.memory_space<vmem>>, %arg2: memref<64x64xf32, #tpu.memory_space<vmem>>, %arg3: memref<128x128xbf16, #tpu.memory_space<vmem>>, %arg4: memref<1x128xf32, #tpu.memory_space<vmem>>, %arg5: memref<64x128xbf16, #tpu.memory_space<vmem>>, %arg6: memref<1x128xf32, #tpu.memory_space<vmem>>, %arg7: memref<64x128xf32, #tpu.memory_space<vmem>>, %arg8: memref<64x128xf32, #tpu.memory_space<vmem>>) attributes {dimension_semantics = [#tpu.dimension_semantics<parallel>], iteration_bounds = array<i64: 1>, scalar_prefetch = 0 : i64, scratch_operands = 0 : i64, tpu.core_type = #tpu.core_type<tc>, window_params = [{transform_indices = @transform_0, window_bounds = array<i64: 64, 128>}, {transform_indices = @transform_1, window_bounds = array<i64: 64, 64>}, {pipeline_mode = #tpu.pipeline_mode<synchronous>, transform_indices = @transform_2, window_bounds = array<i64: 128, 128>}, {pipeline_mode = #tpu.pipeline_mode<synchronous>, transform_indices = @transform_3, window_bounds = array<i64: 1, 128>}, {pipeline_mode = #tpu.pipeline_mode<synchronous>, transform_indices = @transform_4, window_bounds = array<i64: 64, 128>}, {pipeline_mode = #tpu.pipeline_mode<synchronous>, transform_indices = @transform_5, window_bounds = array<i64: 1, 128>}, {transform_indices = @transform_6, window_bounds = array<i64: 64, 128>}, {transform_indices = @transform_7, window_bounds = array<i64: 64, 128>}]} {
    %c0 = arith.constant 0 : index
    %c0_0 = arith.constant 0 : index
    %0 = vector.load %arg1[%c0, %c0_0] : memref<64x128xf32, #tpu.memory_space<vmem>>, vector<64x128xf32>
    %cst = arith.constant 0.000000e+00 : f32
    %1 = vector.broadcast %cst : f32 to vector<64x128xf32>
    %2 = arith.maximumf %0, %1 : vector<64x128xf32>
    %3 = arith.truncf %2 : vector<64x128xf32> to vector<64x128xbf16>
    %c0_1 = arith.constant 0 : index
    %c0_2 = arith.constant 0 : index
    %4 = vector.load %arg3[%c0_1, %c0_2] : memref<128x128xbf16, #tpu.memory_space<vmem>>, vector<128x128xbf16>
    %cst_3 = arith.constant dense<0.000000e+00> : vector<64x128xf32>
    %5 = tpu.matmul %3, %4, %cst_3 {dimension_numbers = #tpu.dot_dimension_numbers<[1], [0], [0], [1], [0, 0, 1, 1], [], []>} : vector<64x128xbf16>, vector<128x128xbf16>, vector<64x128xf32> -> vector<64x128xf32>
    %c0_4 = arith.constant 0 : index
    %c0_5 = arith.constant 0 : index
    %6 = vector.load %arg4[%c0_4, %c0_5] : memref<1x128xf32, #tpu.memory_space<vmem>>, vector<1x128xf32>
    %7 = vector.broadcast %6 : vector<1x128xf32> to vector<64x128xf32>
    %8 = arith.addf %5, %7 : vector<64x128xf32>
    %c0_6 = arith.constant 0 : index
    %c0_7 = arith.constant 0 : index
    %9 = vector.load %arg7[%c0_6, %c0_7] : memref<64x128xf32, #tpu.memory_space<vmem>>, vector<64x128xf32>
    tpu.vector_store %arg7[%c0_6, %c0_7], %8 {strides = array<i32>} : memref<64x128xf32, #tpu.memory_space<vmem>>, vector<64x128xf32>,
    %10 = vector.extract_strided_slice %8 {offsets = [0, 0], sizes = [64, 64], strides = [1, 1]} : vector<64x128xf32> to vector<64x64xf32>
    %11 = vector.extract_strided_slice %8 {offsets = [0, 64], sizes = [64, 64], strides = [1, 1]} : vector<64x128xf32> to vector<64x64xf32>
    %cst_8 = arith.constant 5.000000e-01 : f32
    %12 = vector.broadcast %cst_8 : f32 to vector<64x64xf32>
    %13 = arith.mulf %12, %11 : vector<64x64xf32>
    %14 = math.exp %13 : vector<64x64xf32>
    %c0_9 = arith.constant 0 : index
    %c0_10 = arith.constant 0 : index
    %15 = vector.load %arg2[%c0_9, %c0_10] : memref<64x64xf32, #tpu.memory_space<vmem>>, vector<64x64xf32>
    %16 = arith.mulf %14, %15 : vector<64x64xf32>
    %17 = arith.addf %10, %16 : vector<64x64xf32>
    %18 = arith.truncf %17 : vector<64x64xf32> to vector<64x64xbf16>
    %c0_11 = arith.constant 0 : index
    %c0_12 = arith.constant 0 : index
    %19 = vector.load %arg5[%c0_11, %c0_12] : memref<64x128xbf16, #tpu.memory_space<vmem>>, vector<64x128xbf16>
    %cst_13 = arith.constant dense<0.000000e+00> : vector<64x128xf32>
    %20 = tpu.matmul %18, %19, %cst_13 {dimension_numbers = #tpu.dot_dimension_numbers<[1], [0], [0], [1], [0, 0, 1, 1], [], []>} : vector<64x64xbf16>, vector<64x128xbf16>, vector<64x128xf32> -> vector<64x128xf32>
    %c0_14 = arith.constant 0 : index
    %c0_15 = arith.constant 0 : index
    %21 = vector.load %arg6[%c0_14, %c0_15] : memref<1x128xf32, #tpu.memory_space<vmem>>, vector<1x128xf32>
    %22 = vector.broadcast %21 : vector<1x128xf32> to vector<64x128xf32>
    %23 = arith.addf %20, %22 : vector<64x128xf32>
    %cst_16 = arith.constant 0.000000e+00 : f32
    %24 = vector.broadcast %cst_16 : f32 to vector<64x128xf32>
    %25 = arith.maximumf %23, %24 : vector<64x128xf32>
    %c0_17 = arith.constant 0 : index
    %c0_18 = arith.constant 0 : index
    %26 = vector.load %arg8[%c0_17, %c0_18] : memref<64x128xf32, #tpu.memory_space<vmem>>, vector<64x128xf32>
    tpu.vector_store %arg8[%c0_17, %c0_18], %25 {strides = array<i32>} : memref<64x128xf32, #tpu.memory_space<vmem>>, vector<64x128xf32>,
    return
  }
  func.func @transform_0(%arg0: i32) -> (i32, i32) {
    %c0_i32 = arith.constant 0 : i32
    %c0_i32_0 = arith.constant 0 : i32
    return %arg0, %c0_i32 : i32, i32
  }
  func.func @transform_1(%arg0: i32) -> (i32, i32) {
    %c0_i32 = arith.constant 0 : i32
    %c0_i32_0 = arith.constant 0 : i32
    return %arg0, %c0_i32 : i32, i32
  }
  func.func @transform_2(%arg0: i32) -> (i32, i32) {
    %c0_i32 = arith.constant 0 : i32
    %c0_i32_0 = arith.constant 0 : i32
    %c0_i32_1 = arith.constant 0 : i32
    return %c0_i32, %c0_i32_0 : i32, i32
  }
  func.func @transform_3(%arg0: i32) -> (i32, i32) {
    %c0_i32 = arith.constant 0 : i32
    %c0_i32_0 = arith.constant 0 : i32
    %c0_i32_1 = arith.constant 0 : i32
    return %c0_i32, %c0_i32_0 : i32, i32
  }
  func.func @transform_4(%arg0: i32) -> (i32, i32) {
    %c0_i32 = arith.constant 0 : i32
    %c0_i32_0 = arith.constant 0 : i32
    %c0_i32_1 = arith.constant 0 : i32
    return %c0_i32, %c0_i32_0 : i32, i32
  }
  func.func @transform_5(%arg0: i32) -> (i32, i32) {
    %c0_i32 = arith.constant 0 : i32
    %c0_i32_0 = arith.constant 0 : i32
    %c0_i32_1 = arith.constant 0 : i32
    return %c0_i32, %c0_i32_0 : i32, i32
  }
  func.func @transform_6(%arg0: i32) -> (i32, i32) {
    %c0_i32 = arith.constant 0 : i32
    %c0_i32_0 = arith.constant 0 : i32
    return %arg0, %c0_i32 : i32, i32
  }
  func.func @transform_7(%arg0: i32) -> (i32, i32) {
    %c0_i32 = arith.constant 0 : i32
    %c0_i32_0 = arith.constant 0 : i32
    return %arg0, %c0_i32 : i32, i32
  }
}

module attributes {stable_mosaic.version = 11 : i64} {
  func.func @_dual_lstm_kernel(%arg0: i32, %arg1: memref<1x8x2048xf32, #tpu.memory_space<vmem>>, %arg2: memref<256x1024xbf16, #tpu.memory_space<any>>, %arg3: memref<256x1024xbf16, #tpu.memory_space<any>>, %arg4: memref<1x8x256xf32, #tpu.memory_space<vmem>>, %arg5: memref<1x8x256xf32, #tpu.memory_space<vmem>>, %arg6: memref<8x256xf32, #tpu.memory_space<vmem>>, %arg7: memref<8x256xf32, #tpu.memory_space<vmem>>, %arg8: memref<8x256xf32, #tpu.memory_space<vmem>>, %arg9: memref<8x256xf32, #tpu.memory_space<vmem>>, %arg10: memref<256x1024xbf16, #tpu.memory_space<vmem>>, %arg11: memref<256x1024xbf16, #tpu.memory_space<vmem>>, %arg12: memref<2x!tpu.dma_semaphore, #tpu.memory_space<semaphore_mem>>) attributes {dimension_semantics = [#tpu.dimension_semantics<arbitrary>], iteration_bounds = array<i64: 8>, scalar_prefetch = 0 : i64, scratch_operands = 7 : i64, tpu.core_type = #tpu.core_type<tc>, window_params = [{transform_indices = @transform_0, window_bounds = array<i64: 1, 8, 2048>}, {}, {}, {transform_indices = @transform_3, window_bounds = array<i64: 1, 8, 256>}, {transform_indices = @transform_4, window_bounds = array<i64: 1, 8, 256>}]} {
    %c0_i32 = arith.constant 0 : i32
    %0 = arith.cmpi eq, %arg0, %c0_i32 : i32
    %1 = arith.extui %0 : i1 to i32
    %c0_i32_0 = arith.constant 0 : i32
    %2 = arith.cmpi ne, %1, %c0_i32_0 : i32
    scf.if %2 {
      %c0_i32_37 = arith.constant 0 : i32
      %84 = tpu.memref_slice %arg12[%c0_i32_37] : memref<2x!tpu.dma_semaphore, #tpu.memory_space<semaphore_mem>> -> memref<1x!tpu.dma_semaphore, #tpu.memory_space<semaphore_mem>>
      %85 = tpu.memref_squeeze %84 : memref<1x!tpu.dma_semaphore, #tpu.memory_space<semaphore_mem>> -> memref<!tpu.dma_semaphore, #tpu.memory_space<semaphore_mem>>
      tpu.enqueue_dma source(%arg2 : memref<256x1024xbf16, #tpu.memory_space<any>>) target(%arg10 : memref<256x1024xbf16, #tpu.memory_space<vmem>>) target_semaphore(%85 : memref<!tpu.dma_semaphore, #tpu.memory_space<semaphore_mem>>)
      %c1_i32 = arith.constant 1 : i32
      %86 = tpu.memref_slice %arg12[%c1_i32] : memref<2x!tpu.dma_semaphore, #tpu.memory_space<semaphore_mem>> -> memref<1x!tpu.dma_semaphore, #tpu.memory_space<semaphore_mem>>
      %87 = tpu.memref_squeeze %86 : memref<1x!tpu.dma_semaphore, #tpu.memory_space<semaphore_mem>> -> memref<!tpu.dma_semaphore, #tpu.memory_space<semaphore_mem>>
      tpu.enqueue_dma source(%arg3 : memref<256x1024xbf16, #tpu.memory_space<any>>) target(%arg11 : memref<256x1024xbf16, #tpu.memory_space<vmem>>) target_semaphore(%87 : memref<!tpu.dma_semaphore, #tpu.memory_space<semaphore_mem>>)
      %c0_i32_38 = arith.constant 0 : i32
      %88 = tpu.memref_slice %arg12[%c0_i32_38] : memref<2x!tpu.dma_semaphore, #tpu.memory_space<semaphore_mem>> -> memref<1x!tpu.dma_semaphore, #tpu.memory_space<semaphore_mem>>
      %89 = tpu.memref_squeeze %88 : memref<1x!tpu.dma_semaphore, #tpu.memory_space<semaphore_mem>> -> memref<!tpu.dma_semaphore, #tpu.memory_space<semaphore_mem>>
      tpu.wait_dma2 semaphore(%89 : memref<!tpu.dma_semaphore, #tpu.memory_space<semaphore_mem>>) src(%arg2 : memref<256x1024xbf16, #tpu.memory_space<any>>) dst(%arg10 : memref<256x1024xbf16, #tpu.memory_space<vmem>>)
      %c1_i32_39 = arith.constant 1 : i32
      %90 = tpu.memref_slice %arg12[%c1_i32_39] : memref<2x!tpu.dma_semaphore, #tpu.memory_space<semaphore_mem>> -> memref<1x!tpu.dma_semaphore, #tpu.memory_space<semaphore_mem>>
      %91 = tpu.memref_squeeze %90 : memref<1x!tpu.dma_semaphore, #tpu.memory_space<semaphore_mem>> -> memref<!tpu.dma_semaphore, #tpu.memory_space<semaphore_mem>>
      tpu.wait_dma2 semaphore(%91 : memref<!tpu.dma_semaphore, #tpu.memory_space<semaphore_mem>>) src(%arg3 : memref<256x1024xbf16, #tpu.memory_space<any>>) dst(%arg11 : memref<256x1024xbf16, #tpu.memory_space<vmem>>)
      %cst_40 = arith.constant 0.000000e+00 : f32
      %92 = vector.broadcast %cst_40 : f32 to vector<8x256xf32>
      %c0_41 = arith.constant 0 : index
      %c0_42 = arith.constant 0 : index
      %93 = vector.load %arg6[%c0_41, %c0_42] : memref<8x256xf32, #tpu.memory_space<vmem>>, vector<8x256xf32>
      tpu.vector_store %arg6[%c0_41, %c0_42], %92 {strides = array<i32>} : memref<8x256xf32, #tpu.memory_space<vmem>>, vector<8x256xf32>,
      %cst_43 = arith.constant 0.000000e+00 : f32
      %94 = vector.broadcast %cst_43 : f32 to vector<8x256xf32>
      %c0_44 = arith.constant 0 : index
      %c0_45 = arith.constant 0 : index
      %95 = vector.load %arg7[%c0_44, %c0_45] : memref<8x256xf32, #tpu.memory_space<vmem>>, vector<8x256xf32>
      tpu.vector_store %arg7[%c0_44, %c0_45], %94 {strides = array<i32>} : memref<8x256xf32, #tpu.memory_space<vmem>>, vector<8x256xf32>,
      %cst_46 = arith.constant 0.000000e+00 : f32
      %96 = vector.broadcast %cst_46 : f32 to vector<8x256xf32>
      %c0_47 = arith.constant 0 : index
      %c0_48 = arith.constant 0 : index
      %97 = vector.load %arg8[%c0_47, %c0_48] : memref<8x256xf32, #tpu.memory_space<vmem>>, vector<8x256xf32>
      tpu.vector_store %arg8[%c0_47, %c0_48], %96 {strides = array<i32>} : memref<8x256xf32, #tpu.memory_space<vmem>>, vector<8x256xf32>,
      %cst_49 = arith.constant 0.000000e+00 : f32
      %98 = vector.broadcast %cst_49 : f32 to vector<8x256xf32>
      %c0_50 = arith.constant 0 : index
      %c0_51 = arith.constant 0 : index
      %99 = vector.load %arg9[%c0_50, %c0_51] : memref<8x256xf32, #tpu.memory_space<vmem>>, vector<8x256xf32>
      tpu.vector_store %arg9[%c0_50, %c0_51], %98 {strides = array<i32>} : memref<8x256xf32, #tpu.memory_space<vmem>>, vector<8x256xf32>,
    } else {
    }
    %c0 = arith.constant 0 : index
    %c0_1 = arith.constant 0 : index
    %c0_2 = arith.constant 0 : index
    %3 = vector.load %arg1[%c0, %c0_1, %c0_2] : memref<1x8x2048xf32, #tpu.memory_space<vmem>>, vector<1x8x2048xf32>
    %4 = vector.shape_cast %3 : vector<1x8x2048xf32> to vector<8x2048xf32>
    %5 = vector.extract_strided_slice %4 {offsets = [0, 0], sizes = [8, 1024], strides = [1, 1]} : vector<8x2048xf32> to vector<8x1024xf32>
    %c0_3 = arith.constant 0 : index
    %c0_4 = arith.constant 0 : index
    %6 = vector.load %arg6[%c0_3, %c0_4] : memref<8x256xf32, #tpu.memory_space<vmem>>, vector<8x256xf32>
    %7 = arith.truncf %6 : vector<8x256xf32> to vector<8x256xbf16>
    %c0_5 = arith.constant 0 : index
    %c0_6 = arith.constant 0 : index
    %8 = vector.load %arg10[%c0_5, %c0_6] : memref<256x1024xbf16, #tpu.memory_space<vmem>>, vector<256x1024xbf16>
    %cst = arith.constant dense<0.000000e+00> : vector<8x1024xf32>
    %9 = tpu.matmul %7, %8, %cst {dimension_numbers = #tpu.dot_dimension_numbers<[1], [0], [0], [1], [0, 0, 1, 1], [], []>} : vector<8x256xbf16>, vector<256x1024xbf16>, vector<8x1024xf32> -> vector<8x1024xf32>
    %10 = arith.addf %5, %9 : vector<8x1024xf32>
    %11 = vector.extract_strided_slice %4 {offsets = [0, 1024], sizes = [8, 1024], strides = [1, 1]} : vector<8x2048xf32> to vector<8x1024xf32>
    %c0_7 = arith.constant 0 : index
    %c0_8 = arith.constant 0 : index
    %12 = vector.load %arg8[%c0_7, %c0_8] : memref<8x256xf32, #tpu.memory_space<vmem>>, vector<8x256xf32>
    %13 = arith.truncf %12 : vector<8x256xf32> to vector<8x256xbf16>
    %c0_9 = arith.constant 0 : index
    %c0_10 = arith.constant 0 : index
    %14 = vector.load %arg11[%c0_9, %c0_10] : memref<256x1024xbf16, #tpu.memory_space<vmem>>, vector<256x1024xbf16>
    %cst_11 = arith.constant dense<0.000000e+00> : vector<8x1024xf32>
    %15 = tpu.matmul %13, %14, %cst_11 {dimension_numbers = #tpu.dot_dimension_numbers<[1], [0], [0], [1], [0, 0, 1, 1], [], []>} : vector<8x256xbf16>, vector<256x1024xbf16>, vector<8x1024xf32> -> vector<8x1024xf32>
    %16 = arith.addf %11, %15 : vector<8x1024xf32>
    %c0_12 = arith.constant 0 : index
    %c0_13 = arith.constant 0 : index
    %17 = vector.load %arg7[%c0_12, %c0_13] : memref<8x256xf32, #tpu.memory_space<vmem>>, vector<8x256xf32>
    %18 = vector.extract_strided_slice %10 {offsets = [0, 0], sizes = [8, 256], strides = [1, 1]} : vector<8x1024xf32> to vector<8x256xf32>
    %19 = arith.negf %18 : vector<8x256xf32>
    %20 = math.exp %19 : vector<8x256xf32>
    %cst_14 = arith.constant 1.000000e+00 : f32
    %21 = vector.broadcast %cst_14 : f32 to vector<8x256xf32>
    %22 = arith.addf %21, %20 : vector<8x256xf32>
    %23 = arith.divf %21, %22 : vector<8x256xf32>
    %24 = vector.extract_strided_slice %10 {offsets = [0, 256], sizes = [8, 256], strides = [1, 1]} : vector<8x1024xf32> to vector<8x256xf32>
    %25 = arith.negf %24 : vector<8x256xf32>
    %26 = math.exp %25 : vector<8x256xf32>
    %cst_15 = arith.constant 1.000000e+00 : f32
    %27 = vector.broadcast %cst_15 : f32 to vector<8x256xf32>
    %28 = arith.addf %27, %26 : vector<8x256xf32>
    %29 = arith.divf %27, %28 : vector<8x256xf32>
    %30 = vector.extract_strided_slice %10 {offsets = [0, 512], sizes = [8, 256], strides = [1, 1]} : vector<8x1024xf32> to vector<8x256xf32>
    %31 = math.tanh %30 : vector<8x256xf32>
    %32 = vector.extract_strided_slice %10 {offsets = [0, 768], sizes = [8, 256], strides = [1, 1]} : vector<8x1024xf32> to vector<8x256xf32>
    %33 = arith.negf %32 : vector<8x256xf32>
    %34 = math.exp %33 : vector<8x256xf32>
    %cst_16 = arith.constant 1.000000e+00 : f32
    %35 = vector.broadcast %cst_16 : f32 to vector<8x256xf32>
    %36 = arith.addf %35, %34 : vector<8x256xf32>
    %37 = arith.divf %35, %36 : vector<8x256xf32>
    %38 = arith.mulf %29, %17 : vector<8x256xf32>
    %39 = arith.mulf %23, %31 : vector<8x256xf32>
    %40 = arith.addf %38, %39 : vector<8x256xf32>
    %41 = math.tanh %40 : vector<8x256xf32>
    %42 = arith.mulf %37, %41 : vector<8x256xf32>
    %c0_17 = arith.constant 0 : index
    %c0_18 = arith.constant 0 : index
    %43 = vector.load %arg9[%c0_17, %c0_18] : memref<8x256xf32, #tpu.memory_space<vmem>>, vector<8x256xf32>
    %44 = vector.extract_strided_slice %16 {offsets = [0, 0], sizes = [8, 256], strides = [1, 1]} : vector<8x1024xf32> to vector<8x256xf32>
    %45 = arith.negf %44 : vector<8x256xf32>
    %46 = math.exp %45 : vector<8x256xf32>
    %cst_19 = arith.constant 1.000000e+00 : f32
    %47 = vector.broadcast %cst_19 : f32 to vector<8x256xf32>
    %48 = arith.addf %47, %46 : vector<8x256xf32>
    %49 = arith.divf %47, %48 : vector<8x256xf32>
    %50 = vector.extract_strided_slice %16 {offsets = [0, 256], sizes = [8, 256], strides = [1, 1]} : vector<8x1024xf32> to vector<8x256xf32>
    %51 = arith.negf %50 : vector<8x256xf32>
    %52 = math.exp %51 : vector<8x256xf32>
    %cst_20 = arith.constant 1.000000e+00 : f32
    %53 = vector.broadcast %cst_20 : f32 to vector<8x256xf32>
    %54 = arith.addf %53, %52 : vector<8x256xf32>
    %55 = arith.divf %53, %54 : vector<8x256xf32>
    %56 = vector.extract_strided_slice %16 {offsets = [0, 512], sizes = [8, 256], strides = [1, 1]} : vector<8x1024xf32> to vector<8x256xf32>
    %57 = math.tanh %56 : vector<8x256xf32>
    %58 = vector.extract_strided_slice %16 {offsets = [0, 768], sizes = [8, 256], strides = [1, 1]} : vector<8x1024xf32> to vector<8x256xf32>
    %59 = arith.negf %58 : vector<8x256xf32>
    %60 = math.exp %59 : vector<8x256xf32>
    %cst_21 = arith.constant 1.000000e+00 : f32
    %61 = vector.broadcast %cst_21 : f32 to vector<8x256xf32>
    %62 = arith.addf %61, %60 : vector<8x256xf32>
    %63 = arith.divf %61, %62 : vector<8x256xf32>
    %64 = arith.mulf %55, %43 : vector<8x256xf32>
    %65 = arith.mulf %49, %57 : vector<8x256xf32>
    %66 = arith.addf %64, %65 : vector<8x256xf32>
    %67 = math.tanh %66 : vector<8x256xf32>
    %68 = arith.mulf %63, %67 : vector<8x256xf32>
    %c0_22 = arith.constant 0 : index
    %c0_23 = arith.constant 0 : index
    %69 = vector.load %arg6[%c0_22, %c0_23] : memref<8x256xf32, #tpu.memory_space<vmem>>, vector<8x256xf32>
    tpu.vector_store %arg6[%c0_22, %c0_23], %42 {strides = array<i32>} : memref<8x256xf32, #tpu.memory_space<vmem>>, vector<8x256xf32>,
    %c0_24 = arith.constant 0 : index
    %c0_25 = arith.constant 0 : index
    %70 = vector.load %arg7[%c0_24, %c0_25] : memref<8x256xf32, #tpu.memory_space<vmem>>, vector<8x256xf32>
    tpu.vector_store %arg7[%c0_24, %c0_25], %40 {strides = array<i32>} : memref<8x256xf32, #tpu.memory_space<vmem>>, vector<8x256xf32>,
    %c0_26 = arith.constant 0 : index
    %c0_27 = arith.constant 0 : index
    %71 = vector.load %arg8[%c0_26, %c0_27] : memref<8x256xf32, #tpu.memory_space<vmem>>, vector<8x256xf32>
    tpu.vector_store %arg8[%c0_26, %c0_27], %68 {strides = array<i32>} : memref<8x256xf32, #tpu.memory_space<vmem>>, vector<8x256xf32>,
    %c0_28 = arith.constant 0 : index
    %c0_29 = arith.constant 0 : index
    %72 = vector.load %arg9[%c0_28, %c0_29] : memref<8x256xf32, #tpu.memory_space<vmem>>, vector<8x256xf32>
    tpu.vector_store %arg9[%c0_28, %c0_29], %66 {strides = array<i32>} : memref<8x256xf32, #tpu.memory_space<vmem>>, vector<8x256xf32>,
    %73 = arith.negf %42 : vector<8x256xf32>
    %74 = math.exp %73 : vector<8x256xf32>
    %cst_30 = arith.constant 1.000000e+00 : f32
    %75 = vector.broadcast %cst_30 : f32 to vector<8x256xf32>
    %76 = arith.addf %75, %74 : vector<8x256xf32>
    %77 = arith.divf %75, %76 : vector<8x256xf32>
    %c0_31 = arith.constant 0 : index
    %c0_32 = arith.constant 0 : index
    %c0_33 = arith.constant 0 : index
    %78 = vector.load %arg4[%c0_31, %c0_32, %c0_33] : memref<1x8x256xf32, #tpu.memory_space<vmem>>, vector<1x8x256xf32>
    %79 = vector.shape_cast %78 : vector<1x8x256xf32> to vector<8x256xf32>
    %80 = vector.shape_cast %77 : vector<8x256xf32> to vector<1x8x256xf32>
    tpu.vector_store %arg4[%c0_31, %c0_32, %c0_33], %80 {strides = array<i32>} : memref<1x8x256xf32, #tpu.memory_space<vmem>>, vector<1x8x256xf32>,
    %c0_34 = arith.constant 0 : index
    %c0_35 = arith.constant 0 : index
    %c0_36 = arith.constant 0 : index
    %81 = vector.load %arg5[%c0_34, %c0_35, %c0_36] : memref<1x8x256xf32, #tpu.memory_space<vmem>>, vector<1x8x256xf32>
    %82 = vector.shape_cast %81 : vector<1x8x256xf32> to vector<8x256xf32>
    %83 = vector.shape_cast %68 : vector<8x256xf32> to vector<1x8x256xf32>
    tpu.vector_store %arg5[%c0_34, %c0_35, %c0_36], %83 {strides = array<i32>} : memref<1x8x256xf32, #tpu.memory_space<vmem>>, vector<1x8x256xf32>,
    return
  }
  func.func @transform_0(%arg0: i32) -> (i32, i32, i32) {
    %c0_i32 = arith.constant 0 : i32
    %c0_i32_0 = arith.constant 0 : i32
    %c0_i32_1 = arith.constant 0 : i32
    return %arg0, %c0_i32, %c0_i32_0 : i32, i32, i32
  }
  func.func @transform_3(%arg0: i32) -> (i32, i32, i32) {
    %c0_i32 = arith.constant 0 : i32
    %c0_i32_0 = arith.constant 0 : i32
    %c0_i32_1 = arith.constant 0 : i32
    return %arg0, %c0_i32, %c0_i32_0 : i32, i32, i32
  }
  func.func @transform_4(%arg0: i32) -> (i32, i32, i32) {
    %c0_i32 = arith.constant 0 : i32
    %c0_i32_0 = arith.constant 0 : i32
    %c0_i32_1 = arith.constant 0 : i32
    return %arg0, %c0_i32, %c0_i32_0 : i32, i32, i32
  }
}

</mosaic_0001>

<bundles_post_ra>
// kernel: vae_gauss_forward.6
= control target key start
LH: loop header
LB: loop body
LE: loop exit
PB: predicated region body
PF: predicated region fallthrough
CT: control target
= control target key end

     0   :  { %s748_s9 = smov 0   ;;  %s870_s0 = inlined_call_operand.vmem [shape: f32[8,8,512], index: 0, kind: input, shape index: {}]   ;;  %s871_s1 = inlined_call_operand.vmem [shape: bf16[128,512], index: 1, kind: input, shape index: {}]   ;;  %s872_s2 = inlined_call_operand.vmem [shape: f32[8,8,128], index: 2, kind: output, shape index: {}]  }
   0x1 LB: > { %s611_s10 = sadd.s32 4294967295, %s729_s9   ;;  %p615_p0 = scmp.ge.s32.totalorder %s729_s9, 1  ;;  %s729_s9 = sphi %s748_s9, %s12_s9  }
   0x2   : > { %p88_p1 = scmp.lt.s32.totalorder %s729_s9, 9 }
   0x4   : > { %p89_p2 = pnand %p615_p0, %p88_p1 }
   0x5   : > { %p107_p3 = scmp.lt.s32.totalorder (!%p89_p2), %s611_s10, 7  ;;  %p619_p4 = scmp.ne.s32.totalorder (!%p89_p2), %s611_s10, 0 }
   0x6   : > { %92 = sbr.rel (%p89_p2) target bundleno = 325 (0x145), region = 24 }
   0xb   : > { %s108_s11 = scalar_select %p107_p3, %s611_s10, 7 }
   0xc   : > { %120 = sbr.rel (%p619_p4) target bundleno = 38 (0x26), region = 28 }
   0xd   : > { %s658_s12 = sshll.u32 %s108_s11, 5  ;;  %s618_s13 = sshll.u32 %s108_s11, 3 }
   0xe   : > { %s759_s16 = scalar_lea.vmem %s870_s0, %s658_s12  ;;  %s764_s19 = scalar_lea.vmem %s872_s2, %s618_s13 }
  0x11   : > { %v154_v0 = vld [vmem:[%s871_s1] sm:$0xff]  ;;  %v156_v1 = vld [vmem:[%s871_s1 + $0x8] sm:$0xff]  ;;  %v158_v2 = vld [vmem:[%s871_s1 + $0x10] sm:$0xff] }
  0x12   : > { %155 = vst [vmem:[#allocation4 + $0xb0] sm:$0xff] %v154_v0  ;;  %157 = vst [vmem:[#allocation4] sm:$0xff] %v156_v1  ;;  %v160_v3 = vld [vmem:[%s871_s1 + $0x18] sm:$0xff]  ;;  %v162_v4 = vld [vmem:[%s871_s1 + $0x20] sm:$0xff] }
  0x13   : > { %159 = vst [vmem:[#allocation4 + $0xd8] sm:$0xff] %v158_v2  ;;  %v164_v5 = vld [vmem:[%s871_s1 + $0x28] sm:$0xff]  ;;  %161 = vst [vmem:[#allocation4 + $0x18] sm:$0xff] %v160_v3  ;;  %v166_v6 = vld [vmem:[%s871_s1 + $0x30] sm:$0xff] }
  0x14   : > { %163 = vst [vmem:[#allocation4 + $0x50] sm:$0xff] %v162_v4  ;;  %165 = vst [vmem:[#allocation4 + $0x68] sm:$0xff] %v164_v5  ;;  %v168_v7 = vld [vmem:[%s871_s1 + $0x38] sm:$0xff]  ;;  %v170_v8 = vld [vmem:[%s871_s1 + $0x40] sm:$0xff] }
  0x15   : > { %167 = vst [vmem:[#allocation4 + $0x30] sm:$0xff] %v166_v6  ;;  %169 = vst [vmem:[#allocation4 + $0x48] sm:$0xff] %v168_v7  ;;  %v172_v9 = vld [vmem:[%s871_s1 + $0x48] sm:$0xff]  ;;  %v174_v10 = vld [vmem:[%s871_s1 + $0x50] sm:$0xff] }
  0x16   : > { %171 = vst [vmem:[#allocation4 + $0x80] sm:$0xff] %v170_v8  ;;  %v176_v11 = vld [vmem:[%s871_s1 + $0x58] sm:$0xff]  ;;  %173 = vst [vmem:[#allocation4 + $0x88] sm:$0xff] %v172_v9  ;;  %v178_v12 = vld [vmem:[%s871_s1 + $0x60] sm:$0xff] }
  0x17   : > { %175 = vst [vmem:[#allocation4 + $0xe8] sm:$0xff] %v174_v10  ;;  %177 = vst [vmem:[#allocation4 + $0xb8] sm:$0xff] %v176_v11  ;;  %v180_v13 = vld [vmem:[%s871_s1 + $0x68] sm:$0xff]  ;;  %v182_v14 = vld [vmem:[%s871_s1 + $0x70] sm:$0xff] }
  0x18   : > { %179 = vst [vmem:[#allocation4 + $0x60] sm:$0xff] %v178_v12  ;;  %181 = vst [vmem:[#allocation4 + $0xf0] sm:$0xff] %v180_v13  ;;  %v184_v15 = vld [vmem:[%s871_s1 + $0x78] sm:$0xff]  ;;  %v186_v16 = vld [vmem:[%s871_s1 + $0x80] sm:$0xff] }
  0x19   : > { %183 = vst [vmem:[#allocation4 + $0x8] sm:$0xff] %v182_v14  ;;  %v188_v17 = vld [vmem:[%s871_s1 + $0x88] sm:$0xff]  ;;  %185 = vst [vmem:[#allocation4 + $0x78] sm:$0xff] %v184_v15  ;;  %v190_v18 = vld [vmem:[%s871_s1 + $0x90] sm:$0xff] }
  0x1a   : > { %187 = vst [vmem:[#allocation4 + $0x38] sm:$0xff] %v186_v16  ;;  %189 = vst [vmem:[#allocation4 + $0x58] sm:$0xff] %v188_v17  ;;  %v192_v19 = vld [vmem:[%s871_s1 + $0x98] sm:$0xff]  ;;  %v194_v20 = vld [vmem:[%s871_s1 + $0xa0] sm:$0xff] }
  0x1b   : > { %191 = vst [vmem:[#allocation4 + $0x40] sm:$0xff] %v190_v18  ;;  %193 = vst [vmem:[#allocation4 + $0xc8] sm:$0xff] %v192_v19  ;;  %v196_v21 = vld [vmem:[%s871_s1 + $0xa8] sm:$0xff]  ;;  %v198_v22 = vld [vmem:[%s871_s1 + $0xb0] sm:$0xff] }
  0x1c   : > { %195 = vst [vmem:[#allocation4 + $0xe0] sm:$0xff] %v194_v20  ;;  %v200_v23 = vld [vmem:[%s871_s1 + $0xb8] sm:$0xff]  ;;  %197 = vst [vmem:[#allocation4 + $0x90] sm:$0xff] %v196_v21  ;;  %v202_v24 = vld [vmem:[%s871_s1 + $0xc0] sm:$0xff] }
  0x1d   : > { %199 = vst [vmem:[#allocation4 + $0x70] sm:$0xff] %v198_v22  ;;  %201 = vst [vmem:[#allocation4 + $0xc0] sm:$0xff] %v200_v23  ;;  %v204_v25 = vld [vmem:[%s871_s1 + $0xc8] sm:$0xff]  ;;  %v206_v26 = vld [vmem:[%s871_s1 + $0xd0] sm:$0xff] }
  0x1e   : > { %203 = vst [vmem:[#allocation4 + $0xa8] sm:$0xff] %v202_v24  ;;  %205 = vst [vmem:[#allocation4 + $0xd0] sm:$0xff] %v204_v25  ;;  %v208_v27 = vld [vmem:[%s871_s1 + $0xd8] sm:$0xff]  ;;  %v210_v28 = vld [vmem:[%s871_s1 + $0xe0] sm:$0xff] }
  0x1f   : > { %207 = vst [vmem:[#allocation4 + $0x10] sm:$0xff] %v206_v26  ;;  %v212_v29 = vld [vmem:[%s871_s1 + $0xe8] sm:$0xff]  ;;  %209 = vst [vmem:[#allocation4 + $0x28] sm:$0xff] %v208_v27  ;;  %v214_v30 = vld [vmem:[%s871_s1 + $0xf0] sm:$0xff] }
  0x20   : > { %211 = vst [vmem:[#allocation4 + $0xa0] sm:$0xff] %v210_v28  ;;  %213 = vst [vmem:[#allocation4 + $0xf8] sm:$0xff] %v212_v29  ;;  %v216_v31 = vld [vmem:[%s871_s1 + $0xf8] sm:$0xff] }
  0x21   : > { %215 = vst [vmem:[#allocation4 + $0x20] sm:$0xff] %v214_v30  ;;  %217 = vst [vmem:[#allocation4 + $0x98] sm:$0xff] %v216_v31 }
  0x22   : > { %225 = vsyncadd [#allocation5], 4096 }
  0x23   : > { %725 = dma.done.wait [#allocation5], 4096 }
  0x24   : > { %726 = vsyncadd [#allocation5], 4294963200  ;;  %v731_v32 = vmov 0.0  }
  0x25   : > { %230 = vst [vmem:[#allocation2] sm:$0xff] %v731_v32  ;;  %231 = vst [vmem:[#allocation3] sm:$0xff] %v731_v32 }
  0x26 PF: > { %v669_v37 = vld [vmem:[#allocation4 + $0xac] ss:$-152 sps:$4 sm:$0xff]   ;;  %v732_v38 = vmov 0   ;;  %v671_v39 = vld [vmem:[#allocation4 + $0xa8] ss:$-152 sps:$4 sm:$0xff]   ;;  %v233_v14 = vld [vmem:[%s759_s16 + $0x8] sm:$0xff] }
  0x27   : > { %v266_v33 = vld [vmem:[#allocation4 + $0xa0] sm:$0xff]  ;;  %462 = vmatprep.mubr.bf16.mxu0 %v732_v38  ;;  %503 = vmatprep.mubr.bf16.mxu1 %v732_v38  ;;  %v267_v40 = vld [vmem:[#allocation4 + $0xf8] sm:$0xff]  ;;  %v680_v47 = vld [vmem:[#allocation4 + $0xd4] ss:$-168 sps:$4 sm:$0xff]  }
  0x28   : > { %v268_v34 = vld [vmem:[#allocation4 + $0x20] sm:$0xff]  ;;  %v269_v41 = vld [vmem:[#allocation4 + $0x98] sm:$0xff]  ;;  %v683_v48 = vld [vmem:[#allocation4 + $0xd0] ss:$-168 sps:$4 sm:$0xff]  }
  0x29   : > { %v649_v35 = vcombine.high %v266_v33, %v268_v34  ;;  %v648_v36 = vcombine.low %v266_v33, %v268_v34  ;;  %v672_v42 = vld [vmem:[#allocation4 + $0xe4] ss:$-112 sps:$4 sm:$0xff]   ;;  %v651_v43 = vcombine.high %v267_v40, %v269_v41  ;;  %v650_v44 = vcombine.low %v267_v40, %v269_v41  ;;  %v674_v45 = vld [vmem:[#allocation4 + $0xe0] ss:$-112 sps:$4 sm:$0xff]   ;;  %v690_v53 = vld [vmem:[#allocation4 + $0x5c] ss:$112 sps:$4 sm:$0xff]  }
  0x2a   : > { %v675_v46 = vld [vmem:[#allocation4 + $0x3c] ss:$8 sps:$4 sm:$0xff]   ;;  %v677_v50 = vld [vmem:[#allocation4 + $0x38] ss:$8 sps:$4 sm:$0xff]   ;;  %v242_v58 = vld [vmem:[#allocation4 + $0x50] sm:$0xff] }
  0x2b   : > { %430 = vmatprep.subr.bf16.mxu0 %v649_v35  ;;  %471 = vmatprep.subr.bf16.mxu1 %v651_v43  ;;  %v686_v49 = vld [vmem:[#allocation4 + $0x94] ss:$48 sps:$4 sm:$0xff]   ;;  %v689_v52 = vld [vmem:[#allocation4 + $0x90] ss:$48 sps:$4 sm:$0xff]   ;;  %v692_v55 = vld [vmem:[#allocation4 + $0x58] ss:$112 sps:$4 sm:$0xff]  }
  0x2c   : > { %431 = vmatpush1.bf16.msra.mxu0 %v648_v36  ;;  %472 = vmatpush1.bf16.msra.mxu1 %v650_v44  ;;  %v678_v51 = vld [vmem:[#allocation4 + $0x64] ss:$-88 sps:$4 sm:$0xff]   ;;  %v682_v54 = vld [vmem:[#allocation4 + $0x60] ss:$-88 sps:$4 sm:$0xff]   ;;  %v695_v57 = vld [vmem:[#allocation4 + $0xf4] ss:$-120 sps:$4 sm:$0xff]  }
  0x2d   : > { %432 = vmatprep.subr.bf16.mxu0 %v669_v37  ;;  %473 = vmatprep.subr.bf16.mxu1 %v680_v47  ;;  %v684_v56 = vld [vmem:[#allocation4 + $0x84] ss:$104 sps:$4 sm:$0xff]   ;;  %v244_v59 = vld [vmem:[#allocation4 + $0x30] sm:$0xff]  ;;  %v688_v60 = vld [vmem:[#allocation4 + $0x80] ss:$104 sps:$4 sm:$0xff]  }
  0x2e   : > { %v698_v61 = vld [vmem:[#allocation4 + $0xf0] ss:$-120 sps:$4 sm:$0xff]   ;;  %v625_v62 = vcombine.high %v242_v58, %v244_v59  ;;  %v699_v63 = vld [vmem:[#allocation4 + $0x8c] ss:$48 sps:$4 sm:$0xff]   ;;  %v624_v2 = vcombine.low %v242_v58, %v244_v59  ;;  %v234_v27 = vld [vmem:[%s759_s16 + $0x10] sm:$0xff] }
  0x2f   : > { %v243_v0 = vld [vmem:[#allocation4 + $0x68] sm:$0xff]  ;;  %v693_v4 = vld [vmem:[#allocation4 + $0xb4] ss:$40 sps:$4 sm:$0xff]   ;;  %v697_v6 = vld [vmem:[#allocation4 + $0xb0] ss:$40 sps:$4 sm:$0xff]  }
  0x30   : > { %433 = vmatpush1.bf16.msra.mxu0 %v671_v39  ;;  %474 = vmatpush1.bf16.msra.mxu1 %v683_v48  ;;  %v245_v1 = vld [vmem:[#allocation4 + $0x48] sm:$0xff]  ;;  %v236_v7 = vld [vmem:[#allocation2] sm:$0xff]  ;;  %v702_v9 = vld [vmem:[#allocation4 + $0x4] ss:$24 sps:$4 sm:$0xff]  }
  0x31   : > { %434 = vmatprep.subr.bf16.mxu0 %v672_v42  ;;  %475 = vmatprep.subr.bf16.mxu1 %v686_v49  ;;  %v701_v3 = vld [vmem:[#allocation4 + $0x88] ss:$48 sps:$4 sm:$0xff]   ;;  %v627_v5 = vcombine.high %v243_v0, %v245_v1  ;;  %v626_v8 = vcombine.low %v243_v0, %v245_v1  ;;  %v237_v10 = vpack.c.bf16 %v236_v7, %v236_v7  ;;  %v232_v12 = vld [vmem:[%s759_s16] sm:$0xff] }
  0x32   : > { %v704_v11 = vld [vmem:[#allocation4] ss:$24 sps:$4 sm:$0xff]   ;;  %v235_v25 = vld [vmem:[%s759_s16 + $0x18] sm:$0xff] }
  0x33   : > { %v535_v38 = vld [vmem:[#allocation3] sm:$0xff] }
  0x34   : > { %435 = vmatpush1.bf16.msra.mxu0 %v674_v45  ;;  %476 = vmatpush1.bf16.msra.mxu1 %v689_v52 }
  0x35   : > { %436 = vmatprep.subr.bf16.mxu0 %v675_v46  ;;  %477 = vmatprep.subr.bf16.mxu1 %v690_v53 }
  0x38   : > { %437 = vmatpush1.bf16.msra.mxu0 %v677_v50  ;;  %478 = vmatpush1.bf16.msra.mxu1 %v692_v55 }
  0x39   : > { %438 = vmatprep.subr.bf16.mxu0 %v678_v51  ;;  %479 = vmatprep.subr.bf16.mxu1 %v695_v57 }
  0x3c   : > { %439 = vmatpush1.bf16.msra.mxu0 %v682_v54  ;;  %480 = vmatpush1.bf16.msra.mxu1 %v698_v61 }
  0x3d   : > { %440 = vmatprep.subr.bf16.mxu0 %v684_v56  ;;  %481 = vmatprep.subr.bf16.mxu1 %v699_v63 }
  0x40   : > { %441 = vmatpush1.bf16.msra.mxu0 %v688_v60  ;;  %482 = vmatpush1.bf16.msra.mxu1 %v701_v3 }
  0x41   : > { %442 = vmatprep.subr.bf16.mxu0 %v625_v62  ;;  %483 = vmatprep.subr.bf16.mxu1 %v627_v5 }
  0x44   : > { %443 = vmatpush1.bf16.msra.mxu0 %v624_v2  ;;  %484 = vmatpush1.bf16.msra.mxu1 %v626_v8 }
  0x45   : > { %444 = vmatprep.subr.bf16.mxu0 %v693_v4  ;;  %485 = vmatprep.subr.bf16.mxu1 %v702_v9 }
  0x48   : > { %445 = vmatpush1.bf16.msra.mxu0 %v697_v6  ;;  %486 = vmatpush1.bf16.msra.mxu1 %v704_v11 }
  0x4b   : > { %463 = vmatmul.mubr.bf16.vlgmr.msra.gmra.mxu0 %v237_v10  ;;  %504 = vmatmul.mubr.bf16.vlgmr.msra.gmra.mxu1 %v237_v10 }
 0x10b   : > { %v464_v13 = vpop.f32.mrf.mxu0  ;;  %v505_v20 = vpop.f32.mrf.mxu1 }
 0x10c   : > { %v512_v15 = vadd.f32 %v464_v13, %v232_v12  ;;  %v514_v29 = vadd.f32 %v505_v20, %v234_v27 }
 0x10d   : > { %v466_v16 = vpop.f32.mrf.mxu0  ;;  %v507_v23 = vpop.f32.mrf.mxu1 }
 0x10e   : > { %v652_v17 = vmul.f32 -1.442695, %v512_v15  ;;  %v513_v18 = vadd.f32 %v466_v16, %v233_v14  ;;  %v515_v28 = vadd.f32 %v507_v23, %v235_v25 }
 0x10f   : > { %v468_v19 = vpop.f32.mrf.mxu0  ;;  %v509_v24 = vpop.f32.mrf.mxu1 }
 0x110   : > { %705 = vpow2.f32 %v652_v17  ;;  %v653_v21 = vmul.f32 -1.442695, %v513_v18  ;;  %v654_v30 = vmul.f32 -1.442695, %v515_v28 }
 0x111   : > { %v469_v22 = vpop.f32.mrf.mxu0  ;;  %v510_v26 = vpop.f32.mrf.mxu1 }
 0x112   : > { %707 = vpow2.f32 %v653_v21 }
 0x113   : > { %709 = vtanh.f32 %v514_v29 }
 0x114   : > { %711 = vpow2.f32 %v654_v30 }
 0x11d   : > { %v706_v31 = vpop.eup %705 }
 0x11e   : > { %v519_v32 = vadd.f32 1.0, %v706_v31 }
 0x11f   : > { %v708_v33 = vpop.eup %707 }
 0x120   : > { %713 = vrcp.f32 %v519_v32  ;;  %v525_v34 = vadd.f32 1.0, %v708_v33  ;;  %v710_v35 = vpop.eup %709 }
 0x121   : > { %v712_v36 = vpop.eup %711 }
 0x122   : > { %715 = vrcp.f32 %v525_v34  ;;  %v532_v40 = vadd.f32 1.0, %v712_v36 }
 0x124   : > { %717 = vrcp.f32 %v532_v40 }
 0x12d   : > { %v714_v37 = vpop.eup %713 }
 0x12e   : > { %v537_v42 = vmul.f32 %v714_v37, %v710_v35 }
 0x12f   : > { %v716_v39 = vpop.eup %715 }
 0x130   : > { %v536_v41 = vmul.f32 %v716_v39, %v535_v38 }
 0x131   : > { %v718_v44 = vpop.eup %717 }
 0x132   : > { %v538_v43 = vadd.f32 %v537_v42, %v536_v41 }
 0x134   : > { %719 = vtanh.f32 %v538_v43  ;;  %541 = vst [vmem:[#allocation3] sm:$0xff] %v538_v43 }
 0x141   : > { %v720_v45 = vpop.eup %719 }
 0x142   : > { %v540_v46 = vmul.f32 %v720_v45, %v718_v44 }
 0x144   : > { %542 = vst [vmem:[#allocation2] sm:$0xff] %v540_v46  ;;  %543 = vst [vmem:[%s764_s19] sm:$0xff] %v540_v46 }
 0x145 PF: > { %s12_s9 = sadd.s32 1, %s729_s9  }
 0x146   : > { %p9_p5 = scmp.ge.s32.totalorder %s12_s9, 10  }
 0x148   :  { %11 = sbr.rel (!%p9_p5) target bundleno = 1 (0x1), region = 100 }
 0x14d   :  { %563 = vsyncmov [#allocation5] }
 0x150   :  { %s564_s16 = vpop.sfrf %563 }
 0x151   :  { %p657_p6 = scmp.ne.s32.totalorder %s564_s16, 0 }
 0x153   :  { %568 = shalt.err (%p657_p6)  }

// kernel: vae_gauss_forward.7
= control target key start
LH: loop header
LB: loop body
LE: loop exit
PB: predicated region body
PF: predicated region fallthrough
CT: control target
= control target key end

     0   :  { %s554_s15 = smov 64   ;;  %vm345_vm0 = vcmask 523264   ;;  %s788_s2 = inlined_call_operand.vmem [shape: bf16[128,128], index: 2, kind: input, shape index: {}]   ;;  %s789_s0 = inlined_call_operand.vmem [shape: f32[64,128], index: 0, kind: input, shape index: {}]   ;;  %s790_s1 = inlined_call_operand.vmem [shape: f32[64,64], index: 1, kind: input, shape index: {}]   ;;  %s791_s4 = inlined_call_operand.vmem [shape: bf16[64,128], index: 4, kind: input, shape index: {}]   ;;  %s792_s3 = inlined_call_operand.vmem [shape: f32[1,128], index: 3, kind: input, shape index: {}]   ;;  %s793_s6 = inlined_call_operand.vmem [shape: f32[64,128], index: 6, kind: output, shape index: {0}]   ;;  %s794_s5 = inlined_call_operand.vmem [shape: f32[1,128], index: 5, kind: input, shape index: {}]   ;;  %s795_s7 = inlined_call_operand.vmem [shape: f32[64,128], index: 7, kind: output, shape index: {1}]  }
   0x1   :  { %v526_v0 = vld [vmem:[%s788_s2 + $0x38] sm:$0xff]   ;;  %v527_v1 = vld [vmem:[%s788_s2 + $0x30] sm:$0xff]   ;;  %v528_v2 = vld [vmem:[%s788_s2 + $0x28] sm:$0xff]  }
   0x2   :  { %485 = vmatprep.subr.bf16.mxu0 %v526_v0  ;;  %v529_v3 = vld [vmem:[%s788_s2 + $0x20] sm:$0xff]   ;;  %v27_v5 = vld [vmem:[%s789_s0 + $0x8] sm:$0xff]  ;;  %v216_v10 = vld [vmem:[%s790_s1 + $0x10] sm:$0xff] }
   0x3   :  { %486 = vmatpush3.bf16.msra.mxu0 %v526_v0  ;;  %v26_v4 = vld [vmem:[%s789_s0] sm:$0xff]  ;;  %v35_v7 = vmax.f32 %v27_v5, 0.0  ;;  %v530_v11 = vld [vmem:[%s788_s2 + $0x18] sm:$0xff]   ;;  %234 = vrot.lane.b32.xlu1 %v216_v10, %s554_s15  ;;  %v215_v12 = vld [vmem:[%s790_s1 + $0x8] sm:$0xff] }
   0x4   :  { %487 = vmatprep.subr.bf16.mxu0 %v527_v1  ;;  %v34_v6 = vmax.f32 %v26_v4, 0.0  ;;  %v214_v8 = vld [vmem:[%s790_s1] sm:$0xff]  ;;  %v217_v13 = vld [vmem:[%s790_s1 + $0x18] sm:$0xff]  ;;  %v531_v14 = vld [vmem:[%s788_s2 + $0x10] sm:$0xff]  }
   0x5   :  { %230 = vrot.lane.b32.xlu0 %v214_v8, %s554_s15  ;;  %v218_v15 = vld [vmem:[%s790_s1 + $0x20] sm:$0xff]  ;;  %v219_v16 = vld [vmem:[%s790_s1 + $0x28] sm:$0xff]  ;;  %v220_v18 = vld [vmem:[%s790_s1 + $0x30] sm:$0xff] }
   0x6   :  { %v42_v9 = vpack.c.bf16 %v35_v7, %v34_v6  ;;  %v532_v17 = vld [vmem:[%s788_s2 + $0x8] sm:$0xff]   ;;  %v221_v19 = vld [vmem:[%s790_s1 + $0x38] sm:$0xff]  ;;  %v28_v20 = vld [vmem:[%s789_s0 + $0x10] sm:$0xff] }
   0x7   :  { %488 = vmatpush3.bf16.msra.mxu0 %v527_v1  ;;  %236 = vrot.lane.b32.xlu1 %v217_v13, %s554_s15  ;;  %v29_v21 = vld [vmem:[%s789_s0 + $0x18] sm:$0xff]  ;;  %v533_v22 = vld [vmem:[%s788_s2] sm:$0xff]   ;;  %v31_v24 = vld [vmem:[%s789_s0 + $0x28] sm:$0xff]  ;;  %v36_v25 = vmax.f32 %v28_v20, 0.0 }
   0x8   :  { %489 = vmatprep.subr.bf16.mxu0 %v528_v2  ;;  %501 = vmatprep.mubr.bf16.mxu0 %v42_v9  ;;  %v30_v23 = vld [vmem:[%s789_s0 + $0x20] sm:$0xff]  ;;  %v37_v26 = vmax.f32 %v29_v21, 0.0  ;;  %v39_v28 = vmax.f32 %v31_v24, 0.0  ;;  %v32_v31 = vld [vmem:[%s789_s0 + $0x30] sm:$0xff]  ;;  %v33_v32 = vld [vmem:[%s789_s0 + $0x38] sm:$0xff] }
   0x9   :  { %232 = vrot.lane.b32.xlu0 %v215_v12, %s554_s15  ;;  %v38_v27 = vmax.f32 %v30_v23, 0.0  ;;  %v40_v33 = vmax.f32 %v32_v31, 0.0  ;;  %v41_v34 = vmax.f32 %v33_v32, 0.0  ;;  %v534_v36 = vld [vmem:[%s791_s4 + $0x18] sm:$0xff]   ;;  %v447_v37 = vld [vmem:[%s792_s3] ss:$0 sm:$0xff] }
   0xa   :  { %v43_v29 = vpack.c.bf16 %v37_v26, %v36_v25  ;;  %509 = vmatprep.subr.bf16.mxu1 %v534_v36  ;;  %v535_v56 = vld [vmem:[%s791_s4 + $0x10] sm:$0xff]   ;;  %v536_v1 = vld [vmem:[%s791_s4 + $0x8] sm:$0xff]   ;;  %v537_v8 = vld [vmem:[%s791_s4] sm:$0xff]  }
   0xb   :  { %490 = vmatpush3.bf16.msra.mxu0 %v528_v2  ;;  %240 = vrot.lane.b32.xlu1 %v219_v16, %s554_s15  ;;  %v44_v30 = vpack.c.bf16 %v39_v28, %v38_v27  ;;  %v45_v35 = vpack.c.bf16 %v41_v34, %v40_v33 }
   0xc   :  { %491 = vmatprep.subr.bf16.mxu0 %v529_v3  ;;  %510 = vmatpush3.bf16.msra.mxu1 %v534_v36 }
   0xd   :  { %238 = vrot.lane.b32.xlu0 %v218_v15, %s554_s15  ;;  %511 = vmatprep.subr.bf16.mxu1 %v535_v56 }
   0xf   :  { %492 = vmatpush3.bf16.msra.mxu0 %v529_v3  ;;  %244 = vrot.lane.b32.xlu1 %v221_v19, %s554_s15 }
  0x10   :  { %493 = vmatprep.subr.bf16.mxu0 %v530_v11  ;;  %512 = vmatpush3.bf16.msra.mxu1 %v535_v56 }
  0x11   :  { %242 = vrot.lane.b32.xlu0 %v220_v18, %s554_s15  ;;  %513 = vmatprep.subr.bf16.mxu1 %v536_v1 }
  0x13   :  { %494 = vmatpush3.bf16.msra.mxu0 %v530_v11 }
  0x14   :  { %495 = vmatprep.subr.bf16.mxu0 %v531_v14  ;;  %514 = vmatpush3.bf16.msra.mxu1 %v536_v1 }
  0x15   :  { %515 = vmatprep.subr.bf16.mxu1 %v537_v8 }
  0x17   :  { %496 = vmatpush3.bf16.msra.mxu0 %v531_v14 }
  0x18   :  { %497 = vmatprep.subr.bf16.mxu0 %v532_v17  ;;  %516 = vmatpush3.bf16.msra.mxu1 %v537_v8 }
  0x1b   :  { %498 = vmatpush3.bf16.msra.mxu0 %v532_v17 }
  0x1c   :  { %499 = vmatprep.subr.bf16.mxu0 %v533_v22 }
  0x1f   :  { %500 = vmatpush3.bf16.msra.mxu0 %v533_v22 }
  0x22   :  { %502 = vmatmul.mubr.bf16.vlgmr.msra.gmra.mxu0 %v43_v29 }
  0x23   :  { %505 = vmatprep.mubr.bf16.mxu0 %v44_v30 }
  0x2a   :  { %506 = vmatmul.mubr.bf16.gmra.mxu0 %v45_v35 }
  0x75   :  { %v235_v7 = vpop.permute.xlu1 %234 }
  0x77   :  { %v231_v0 = vpop.permute.xlu0 %230 }
  0x79   :  { %v237_v15 = vpop.permute.xlu1 %236 }
  0x7b   :  { %v233_v11 = vpop.permute.xlu0 %232 }
  0x7d   :  { %v241_v22 = vpop.permute.xlu1 %240 }
  0x7f   :  { %v239_v17 = vpop.permute.xlu0 %238 }
  0x81   :  { %v245_v31 = vpop.permute.xlu1 %244 }
  0x83   :  { %v243_v26 = vpop.permute.xlu0 %242 }
  0xe2   :  { %v503_v38 = vpop.f32.mrf.mxu0 }
  0xe3   :  { %v681_v39 = vadd.f32 %v503_v38, %v447_v37 }
  0xe4   :  { %v151_v40 = vpop.f32.mrf.mxu0 }
  0xe5   :  { %184 = vst [vmem:[%s793_s6 + $0x10] sm:$0xff] %v681_v39  ;;  %v192_v41 = vmul.f32 0.5, %v681_v39  ;;  %v688_v42 = vadd.f32 %v447_v37, %v151_v40 }
  0xe6   :  { %v504_v43 = vpop.f32.mrf.mxu0 }
  0xe7   :  { %182 = vst [vmem:[%s793_s6] sm:$0xff] %v688_v42  ;;  %v190_v44 = vmul.f32 0.5, %v688_v42  ;;  %v695_v45 = vadd.f32 %v504_v43, %v447_v37  ;;  %v202_v47 = vmul.f32 1.442695, %v192_v41 }
  0xe8   :  { %v154_v46 = vpop.f32.mrf.mxu0 }
  0xe9   :  { %v198_v48 = vmul.f32 1.442695, %v190_v44  ;;  %185 = vst [vmem:[%s793_s6 + $0x18] sm:$0xff] %v695_v45  ;;  %v193_v49 = vmul.f32 0.5, %v695_v45  ;;  %v702_v50 = vadd.f32 %v447_v37, %v154_v46 }
  0xea   :  { %v507_v51 = vpop.f32.mrf.mxu0 }
  0xeb   :  { %538 = vpow2.f32 %v198_v48  ;;  %183 = vst [vmem:[%s793_s6 + $0x8] sm:$0xff] %v702_v50  ;;  %v191_v52 = vmul.f32 0.5, %v702_v50  ;;  %v709_v53 = vadd.f32 %v507_v51, %v447_v37  ;;  %v204_v54 = vmul.f32 1.442695, %v193_v49 }
  0xec   :  { %v167_v55 = vpop.f32.mrf.mxu0  ;;  %540 = vpow2.f32 %v202_v47 }
  0xed   :  { %v200_v57 = vmul.f32 1.442695, %v191_v52  ;;  %188 = vst [vmem:[%s793_s6 + $0x30] sm:$0xff] %v709_v53  ;;  %v196_v58 = vmul.f32 0.5, %v709_v53  ;;  %v719_v59 = vadd.f32 %v447_v37, %v167_v55 }
  0xee   :  { %v508_v60 = vpop.f32.mrf.mxu0 }
  0xef   :  { %542 = vpow2.f32 %v200_v57  ;;  %186 = vst [vmem:[%s793_s6 + $0x20] sm:$0xff] %v719_v59  ;;  %v194_v61 = vmul.f32 0.5, %v719_v59  ;;  %v726_v62 = vadd.f32 %v508_v60, %v447_v37  ;;  %v210_v2 = vmul.f32 1.442695, %v196_v58 }
  0xf0   :  { %544 = vpow2.f32 %v204_v54  ;;  %v170_v63 = vpop.f32.mrf.mxu0 }
  0xf1   :  { %v206_v3 = vmul.f32 1.442695, %v194_v61  ;;  %189 = vst [vmem:[%s793_s6 + $0x38] sm:$0xff] %v726_v62  ;;  %v197_v4 = vmul.f32 0.5, %v726_v62  ;;  %v171_v5 = vadd.f32 %v447_v37, %v170_v63 }
  0xf3   :  { %546 = vpow2.f32 %v206_v3  ;;  %187 = vst [vmem:[%s793_s6 + $0x28] sm:$0xff] %v171_v5  ;;  %v195_v6 = vmul.f32 0.5, %v171_v5  ;;  %v212_v9 = vmul.f32 1.442695, %v197_v4 }
  0xf4   :  { %548 = vpow2.f32 %v210_v2 }
  0xf5   :  { %v208_v10 = vmul.f32 1.442695, %v195_v6 }
  0xf7   :  { %550 = vpow2.f32 %v208_v10 }
  0xf8   :  { %v539_v12 = vpop.eup %538  ;;  %552 = vpow2.f32 %v212_v9 }
  0xf9   :  { %v254_v13 = vmul.f32 %v539_v12, %v231_v0  ;;  %v541_v14 = vpop.eup %540 }
  0xfa   :  { %v256_v19 = vmul.f32 %v541_v14, %v235_v7 }
  0xfb   :  { %270 = vrot.lane.b32.xlu0 %v254_v13, %s554_s15 }
  0xfc   :  { %v543_v16 = vpop.eup %542 }
  0xfd   :  { %v545_v18 = vpop.eup %544  ;;  %v255_v20 = vmul.f32 %v543_v16, %v233_v11 }
  0xfe   :  { %v257_v23 = vmul.f32 %v545_v18, %v237_v15 }
  0xff   :  { %272 = vrot.lane.b32.xlu1 %v255_v20, %s554_s15  ;;  %274 = vrot.lane.b32.xlu0 %v256_v19, %s554_s15 }
 0x100   :  { %v547_v21 = vpop.eup %546 }
 0x101   :  { %v258_v24 = vmul.f32 %v547_v21, %v239_v17  ;;  %v549_v25 = vpop.eup %548 }
 0x102   :  { %v260_v29 = vmul.f32 %v549_v25, %v243_v26 }
 0x103   :  { %276 = vrot.lane.b32.xlu1 %v257_v23, %s554_s15  ;;  %278 = vrot.lane.b32.xlu0 %v258_v24, %s554_s15 }
 0x104   :  { %v551_v27 = vpop.eup %550 }
 0x105   :  { %v259_v28 = vmul.f32 %v551_v27, %v241_v22  ;;  %v553_v30 = vpop.eup %552 }
 0x106   :  { %v261_v32 = vmul.f32 %v553_v30, %v245_v31 }
 0x107   :  { %280 = vrot.lane.b32.xlu1 %v259_v28, %s554_s15  ;;  %282 = vrot.lane.b32.xlu0 %v260_v29, %s554_s15 }
 0x10b   :  { %284 = vrot.lane.b32.xlu1 %v261_v32, %s554_s15 }
 0x16d   :  { %v271_v33 = vpop.permute.xlu0 %270 }
 0x16e   :  { %v294_v36 = vadd.f32 %v271_v33, %v688_v42 }
 0x171   :  { %v273_v34 = vpop.permute.xlu1 %272  ;;  %v275_v35 = vpop.permute.xlu0 %274 }
 0x172   :  { %v295_v37 = vadd.f32 %v273_v34, %v702_v50  ;;  %v296_v43 = vadd.f32 %v275_v35, %v681_v39 }
 0x174   :  { %v302_v38 = vpack.c.bf16 %v295_v37, %v294_v36 }
 0x175   :  { %v277_v40 = vpop.permute.xlu1 %276  ;;  %v279_v41 = vpop.permute.xlu0 %278 }
 0x176   :  { %v297_v44 = vadd.f32 %v277_v40, %v695_v45  ;;  %517 = vmatprep.mubr.msk.bf16.mxu1 %vm345_vm0, %v302_v38  ;;  %v298_v48 = vadd.f32 %v279_v41, %v719_v59  ;;  %v456_v45 = vld [vmem:[%s794_s5] ss:$0 sm:$0xff] }
 0x178   :  { %v303_v46 = vpack.c.bf16 %v297_v44, %v296_v43 }
 0x179   :  { %v281_v47 = vpop.permute.xlu1 %280  ;;  %v283_v42 = vpop.permute.xlu0 %282 }
 0x17a   :  { %v299_v49 = vadd.f32 %v281_v47, %v171_v5  ;;  %518 = vmatmul.mubr.msk.bf16.vlgmr.msra.gmra.mxu1 %vm345_vm0, %v303_v46  ;;  %v300_v52 = vadd.f32 %v283_v42, %v709_v53 }
 0x17c   :  { %v304_v51 = vpack.c.bf16 %v299_v49, %v298_v48 }
 0x17d   :  { %v285_v50 = vpop.permute.xlu1 %284 }
 0x17e   :  { %v301_v54 = vadd.f32 %v285_v50, %v726_v62  ;;  %521 = vmatprep.mubr.msk.bf16.mxu1 %vm345_vm0, %v304_v51 }
 0x180   :  { %v305_v39 = vpack.c.bf16 %v301_v54, %v300_v52 }
 0x182   :  { %522 = vmatmul.mubr.msk.bf16.gmra.mxu1 %vm345_vm0, %v305_v39 }
 0x23a   :  { %v519_v55 = vpop.f32.mrf.mxu1 }
 0x23b   :  { %v401_v56 = vadd.f32 %v519_v55, %v456_v45 }
 0x23c   :  { %v392_v57 = vpop.f32.mrf.mxu1 }
 0x23d   :  { %v425_v58 = vmax.f32 %v401_v56, 0.0  ;;  %v393_v59 = vadd.f32 %v456_v45, %v392_v57 }
 0x23e   :  { %v520_v60 = vpop.f32.mrf.mxu1 }
 0x23f   :  { %433 = vst [vmem:[%s795_s7 + $0x10] sm:$0xff] %v425_v58  ;;  %v423_v53 = vmax.f32 %v393_v59, 0.0  ;;  %v404_v61 = vadd.f32 %v520_v60, %v456_v45 }
 0x240   :  { %v395_v62 = vpop.f32.mrf.mxu1 }
 0x241   :  { %431 = vst [vmem:[%s795_s7] sm:$0xff] %v423_v53  ;;  %v426_v63 = vmax.f32 %v404_v61, 0.0  ;;  %v396_v0 = vadd.f32 %v456_v45, %v395_v62 }
 0x242   :  { %v523_v1 = vpop.f32.mrf.mxu1 }
 0x243   :  { %434 = vst [vmem:[%s795_s7 + $0x18] sm:$0xff] %v426_v63  ;;  %v424_v2 = vmax.f32 %v396_v0, 0.0  ;;  %v417_v3 = vadd.f32 %v523_v1, %v456_v45 }
 0x244   :  { %v408_v4 = vpop.f32.mrf.mxu1 }
 0x245   :  { %432 = vst [vmem:[%s795_s7 + $0x8] sm:$0xff] %v424_v2  ;;  %v429_v5 = vmax.f32 %v417_v3, 0.0  ;;  %v409_v6 = vadd.f32 %v456_v45, %v408_v4 }
 0x246   :  { %v524_v7 = vpop.f32.mrf.mxu1 }
 0x247   :  { %437 = vst [vmem:[%s795_s7 + $0x30] sm:$0xff] %v429_v5  ;;  %v427_v8 = vmax.f32 %v409_v6, 0.0  ;;  %v420_v9 = vadd.f32 %v524_v7, %v456_v45 }
 0x248   :  { %v411_v10 = vpop.f32.mrf.mxu1 }
 0x249   :  { %435 = vst [vmem:[%s795_s7 + $0x20] sm:$0xff] %v427_v8  ;;  %v430_v11 = vmax.f32 %v420_v9, 0.0  ;;  %v412_v12 = vadd.f32 %v456_v45, %v411_v10 }
 0x24b   :  { %438 = vst [vmem:[%s795_s7 + $0x38] sm:$0xff] %v430_v11  ;;  %v428_v13 = vmax.f32 %v412_v12, 0.0 }
 0x24d   :  { %436 = vst [vmem:[%s795_s7 + $0x28] sm:$0xff] %v428_v13 }

// kernel: vae_gauss_forward.5
= control target key start
LH: loop header
LB: loop body
LE: loop exit
PB: predicated region body
PF: predicated region fallthrough
CT: control target
= control target key end

     0   :  { %8 = vsyncpa [#allocation3], 0  ;;  %s1033_s0 = inlined_call_operand.hbm [shape: f32[64,256], index: 0, kind: input, shape index: {}]   ;;  %s1034_s1 = inlined_call_operand.hbm [shape: bf16[256,512], index: 1, kind: input, shape index: {}]   ;;  %s1035_s2 = inlined_call_operand.vmem [shape: f32[1,512], index: 2, kind: input, shape index: {}]   ;;  %s1036_s3 = inlined_call_operand.vmem [shape: f32[64,512], index: 3, kind: output, shape index: {}]  }
   0x1   :  { %9 = vsyncpa [#allocation5], 0  ;;  %s864_s12 = smov [#allocation2]  }
   0x2   :  { %s15_s13 = sshll.u32 %s864_s12, 4  ;;  %s16_s13 = int_to_ptr.vmem [resolvable:$true] %s15_s13 }
   0x3   :  { %s828_s14 = scalar_lea.vmem %s16_s13, 2048  ;;  %p833_p1 = scmp.lt.s32.totalorder %s16_s13, %s16_s13 }
   0x4   :  { %p829_p0 = scmp.ne.s32.totalorder %s16_s13, %s828_s14  ;;  %p834_p2 = scmp.lt.s32.totalorder %s828_s14, %s828_s14 }
   0x6   :  { %p835_p3 = por %p834_p2, %p833_p1 }
   0x8   :  { %p836_p4 = pnand %p835_p3, %p829_p0 }
   0xa   :  { %839 = shalt.err (!%p836_p4)
}
   0xb   :  { %s865_s15 = smov 256   ;;  %s866_s16 = smov 16  }
   0xc   :  { %21 = dma.hbm_to_vmem [thread:$0]  %s1033_s0, 2048, %s16_s13, [#allocation3], %s865_s15, %s865_s15, %s866_s16  }
   0xd   :  { %s867_s19 = smov [#allocation4]  }
   0xe   :  { %s27_s20 = sshll.u32 %s867_s19, 4  ;;  %s28_s20 = int_to_ptr.vmem [resolvable:$true] %s27_s20 }
   0xf   :  { %s848_s21 = scalar_lea.vmem %s28_s20, 8192  ;;  %p853_p6 = scmp.lt.s32.totalorder %s28_s20, %s28_s20 }
  0x10   :  { %p849_p5 = scmp.ne.s32.totalorder %s28_s20, %s848_s21  ;;  %p854_p7 = scmp.lt.s32.totalorder %s848_s21, %s848_s21 }
  0x12   :  { %p855_p8 = por %p854_p7, %p853_p6 }
  0x14   :  { %p856_p9 = pnand %p855_p8, %p849_p5 }
  0x16   :  { %859 = shalt.err (!%p856_p9)
}
  0x17   :  { %33 = dma.hbm_to_vmem [thread:$0]  %s1034_s1, 8192, %s28_s20, [#allocation5], %s865_s15, %s865_s15, %s866_s16  }
  0x18   :  { %860 = dma.done.wait [#allocation3], 2048  }
  0x19   :  { %861 = vsyncadd [#allocation3], 4294965248 }
  0x1a   :  { %862 = dma.done.wait [#allocation5], 8192  }
  0x1b   :  { %863 = vsyncadd [#allocation5], 4294959104  ;;  %v724_v0 = vld [vmem:[#allocation4 + $0xe4] ss:$16 sps:$4 sm:$0xff]   ;;  %v726_v1 = vld [vmem:[#allocation4 + $0xec] ss:$16 sps:$4 sm:$0xff]  }
  0x1c   :  { %472 = vmatprep.subr.bf16.mxu0 %v724_v0  ;;  %v728_v2 = vld [vmem:[#allocation4 + $0xe0] ss:$16 sps:$4 sm:$0xff]   ;;  %v729_v3 = vld [vmem:[#allocation4 + $0xe8] ss:$16 sps:$4 sm:$0xff]   ;;  %545 = vmatprep.subr.bf16.mxu1 %v726_v1  ;;  %v730_v4 = vld [vmem:[#allocation4 + $0xc4] ss:$16 sps:$4 sm:$0xff]  }
  0x1d   :  { %473 = vmatpush1.bf16.msra.mxu0 %v728_v2  ;;  %546 = vmatpush1.bf16.msra.mxu1 %v729_v3  ;;  %v732_v5 = vld [vmem:[#allocation4 + $0xcc] ss:$16 sps:$4 sm:$0xff]   ;;  %v734_v6 = vld [vmem:[#allocation4 + $0xc0] ss:$16 sps:$4 sm:$0xff]   ;;  %v735_v7 = vld [vmem:[#allocation4 + $0xc8] ss:$16 sps:$4 sm:$0xff]  }
  0x1e   :  { %474 = vmatprep.subr.bf16.mxu0 %v730_v4  ;;  %547 = vmatprep.subr.bf16.mxu1 %v732_v5  ;;  %v736_v8 = vld [vmem:[#allocation4 + $0xa4] ss:$16 sps:$4 sm:$0xff]   ;;  %v738_v9 = vld [vmem:[#allocation4 + $0xac] ss:$16 sps:$4 sm:$0xff]   ;;  %v740_v10 = vld [vmem:[#allocation4 + $0xa0] ss:$16 sps:$4 sm:$0xff]  }
  0x1f   :  { %v741_v11 = vld [vmem:[#allocation4 + $0xa8] ss:$16 sps:$4 sm:$0xff]   ;;  %v742_v12 = vld [vmem:[#allocation4 + $0x84] ss:$16 sps:$4 sm:$0xff]   ;;  %v744_v13 = vld [vmem:[#allocation4 + $0x8c] ss:$16 sps:$4 sm:$0xff]  }
  0x20   :  { %v746_v14 = vld [vmem:[#allocation4 + $0x80] ss:$16 sps:$4 sm:$0xff]   ;;  %v747_v15 = vld [vmem:[#allocation4 + $0x88] ss:$16 sps:$4 sm:$0xff]   ;;  %v748_v16 = vld [vmem:[#allocation4 + $0x64] ss:$16 sps:$4 sm:$0xff]  }
  0x21   :  { %475 = vmatpush1.bf16.msra.mxu0 %v734_v6  ;;  %548 = vmatpush1.bf16.msra.mxu1 %v735_v7  ;;  %v750_v17 = vld [vmem:[#allocation4 + $0x6c] ss:$16 sps:$4 sm:$0xff]   ;;  %v752_v18 = vld [vmem:[#allocation4 + $0x60] ss:$16 sps:$4 sm:$0xff]   ;;  %v753_v19 = vld [vmem:[#allocation4 + $0x68] ss:$16 sps:$4 sm:$0xff]  }
  0x22   :  { %476 = vmatprep.subr.bf16.mxu0 %v736_v8  ;;  %549 = vmatprep.subr.bf16.mxu1 %v738_v9  ;;  %v754_v20 = vld [vmem:[#allocation4 + $0x44] ss:$16 sps:$4 sm:$0xff]   ;;  %v756_v21 = vld [vmem:[#allocation4 + $0x4c] ss:$16 sps:$4 sm:$0xff]   ;;  %v758_v22 = vld [vmem:[#allocation4 + $0x40] ss:$16 sps:$4 sm:$0xff]  }
  0x23   :  { %v759_v23 = vld [vmem:[#allocation4 + $0x48] ss:$16 sps:$4 sm:$0xff]   ;;  %v760_v24 = vld [vmem:[#allocation4 + $0x24] ss:$16 sps:$4 sm:$0xff]   ;;  %v762_v25 = vld [vmem:[#allocation4 + $0x2c] ss:$16 sps:$4 sm:$0xff]  }
  0x24   :  { %v764_v26 = vld [vmem:[#allocation4 + $0x20] ss:$16 sps:$4 sm:$0xff]   ;;  %v765_v27 = vld [vmem:[#allocation4 + $0x28] ss:$16 sps:$4 sm:$0xff]   ;;  %v766_v28 = vld [vmem:[#allocation4 + $0x4] ss:$16 sps:$4 sm:$0xff]  }
  0x25   :  { %477 = vmatpush1.bf16.msra.mxu0 %v740_v10  ;;  %550 = vmatpush1.bf16.msra.mxu1 %v741_v11  ;;  %v768_v29 = vld [vmem:[#allocation4 + $0xc] ss:$16 sps:$4 sm:$0xff]   ;;  %v770_v30 = vld [vmem:[#allocation4] ss:$16 sps:$4 sm:$0xff]   ;;  %v771_v31 = vld [vmem:[#allocation4 + $0x8] ss:$16 sps:$4 sm:$0xff]  }
  0x26   :  { %478 = vmatprep.subr.bf16.mxu0 %v742_v12  ;;  %551 = vmatprep.subr.bf16.mxu1 %v744_v13  ;;  %v772_v32 = vld [vmem:[#allocation4 + $0x1e4] ss:$16 sps:$4 sm:$0xff]   ;;  %v774_v33 = vld [vmem:[#allocation4 + $0x1ec] ss:$16 sps:$4 sm:$0xff]   ;;  %v776_v34 = vld [vmem:[#allocation4 + $0x1e0] ss:$16 sps:$4 sm:$0xff]  }
  0x27   :  { %v777_v35 = vld [vmem:[#allocation4 + $0x1e8] ss:$16 sps:$4 sm:$0xff]   ;;  %v778_v36 = vld [vmem:[#allocation4 + $0x1c4] ss:$16 sps:$4 sm:$0xff]   ;;  %v780_v37 = vld [vmem:[#allocation4 + $0x1cc] ss:$16 sps:$4 sm:$0xff]  }
  0x28   :  { %v782_v38 = vld [vmem:[#allocation4 + $0x1c0] ss:$16 sps:$4 sm:$0xff]   ;;  %v783_v39 = vld [vmem:[#allocation4 + $0x1c8] ss:$16 sps:$4 sm:$0xff]   ;;  %v784_v40 = vld [vmem:[#allocation4 + $0x1a4] ss:$16 sps:$4 sm:$0xff]  }
  0x29   :  { %479 = vmatpush1.bf16.msra.mxu0 %v746_v14  ;;  %552 = vmatpush1.bf16.msra.mxu1 %v747_v15  ;;  %v786_v41 = vld [vmem:[#allocation4 + $0x1ac] ss:$16 sps:$4 sm:$0xff]   ;;  %v788_v42 = vld [vmem:[#allocation4 + $0x1a0] ss:$16 sps:$4 sm:$0xff]   ;;  %v789_v43 = vld [vmem:[#allocation4 + $0x1a8] ss:$16 sps:$4 sm:$0xff]  }
  0x2a   :  { %480 = vmatprep.subr.bf16.mxu0 %v748_v16  ;;  %553 = vmatprep.subr.bf16.mxu1 %v750_v17  ;;  %v790_v44 = vld [vmem:[#allocation4 + $0x184] ss:$16 sps:$4 sm:$0xff]   ;;  %v792_v45 = vld [vmem:[#allocation4 + $0x18c] ss:$16 sps:$4 sm:$0xff]   ;;  %v794_v48 = vld [vmem:[#allocation4 + $0x180] ss:$16 sps:$4 sm:$0xff]  }
  0x2b   :  { %v43_v46 = vld [vmem:[#allocation2 + $0x8] sm:$0xff]  ;;  %v45_v47 = vld [vmem:[#allocation2 + $0x18] sm:$0xff]  ;;  %v796_v51 = vld [vmem:[#allocation4 + $0x164] ss:$16 sps:$4 sm:$0xff]  }
  0x2c   :  { %v795_v49 = vld [vmem:[#allocation4 + $0x188] ss:$16 sps:$4 sm:$0xff]   ;;  %v59_v50 = vpack.c.bf16 %v45_v47, %v43_v46  ;;  %v798_v52 = vld [vmem:[#allocation4 + $0x16c] ss:$16 sps:$4 sm:$0xff]   ;;  %v800_v53 = vld [vmem:[#allocation4 + $0x160] ss:$16 sps:$4 sm:$0xff]  }
  0x2d   :  { %481 = vmatpush1.bf16.msra.mxu0 %v752_v18  ;;  %554 = vmatpush1.bf16.msra.mxu1 %v753_v19  ;;  %v801_v54 = vld [vmem:[#allocation4 + $0x168] ss:$16 sps:$4 sm:$0xff]   ;;  %v802_v55 = vld [vmem:[#allocation4 + $0x144] ss:$16 sps:$4 sm:$0xff]   ;;  %v804_v56 = vld [vmem:[#allocation4 + $0x14c] ss:$16 sps:$4 sm:$0xff]  }
  0x2e   :  { %482 = vmatprep.subr.bf16.mxu0 %v754_v20  ;;  %555 = vmatprep.subr.bf16.mxu1 %v756_v21  ;;  %v806_v57 = vld [vmem:[#allocation4 + $0x140] ss:$16 sps:$4 sm:$0xff]   ;;  %v807_v58 = vld [vmem:[#allocation4 + $0x148] ss:$16 sps:$4 sm:$0xff]   ;;  %v808_v59 = vld [vmem:[#allocation4 + $0x124] ss:$16 sps:$4 sm:$0xff]  }
  0x2f   :  { %504 = vmatprep.mubr.bf16.mxu0 %v59_v50  ;;  %577 = vmatprep.mubr.bf16.mxu1 %v59_v50  ;;  %v810_v60 = vld [vmem:[#allocation4 + $0x12c] ss:$16 sps:$4 sm:$0xff]   ;;  %v812_v61 = vld [vmem:[#allocation4 + $0x120] ss:$16 sps:$4 sm:$0xff]   ;;  %v813_v62 = vld [vmem:[#allocation4 + $0x128] ss:$16 sps:$4 sm:$0xff]  }
  0x30   :  { %v814_v63 = vld [vmem:[#allocation4 + $0x104] ss:$16 sps:$4 sm:$0xff]   ;;  %v816_v0 = vld [vmem:[#allocation4 + $0x10c] ss:$16 sps:$4 sm:$0xff]   ;;  %v818_v1 = vld [vmem:[#allocation4 + $0x100] ss:$16 sps:$4 sm:$0xff]  }
  0x31   :  { %483 = vmatpush1.bf16.msra.mxu0 %v758_v22  ;;  %556 = vmatpush1.bf16.msra.mxu1 %v759_v23  ;;  %v819_v2 = vld [vmem:[#allocation4 + $0x108] ss:$16 sps:$4 sm:$0xff]   ;;  %v42_v3 = vld [vmem:[#allocation2] sm:$0xff]  ;;  %v44_v4 = vld [vmem:[#allocation2 + $0x10] sm:$0xff] }
  0x32   :  { %484 = vmatprep.subr.bf16.mxu0 %v760_v24  ;;  %557 = vmatprep.subr.bf16.mxu1 %v762_v25  ;;  %v47_v5 = vld [vmem:[#allocation2 + $0x28] sm:$0xff]  ;;  %v49_v6 = vld [vmem:[#allocation2 + $0x38] sm:$0xff]  ;;  %v58_v7 = vpack.c.bf16 %v44_v4, %v42_v3  ;;  %v46_v9 = vld [vmem:[#allocation2 + $0x20] sm:$0xff]  ;;  %v132_v24 = vlaneseq }
  0x33   :  { %v61_v8 = vpack.c.bf16 %v49_v6, %v47_v5  ;;  %v48_v10 = vld [vmem:[#allocation2 + $0x30] sm:$0xff]  ;;  %v51_v11 = vld [vmem:[#allocation2 + $0x48] sm:$0xff]  ;;  %v53_v12 = vld [vmem:[#allocation2 + $0x58] sm:$0xff] }
  0x34   :  { %v60_v13 = vpack.c.bf16 %v48_v10, %v46_v9  ;;  %v63_v14 = vpack.c.bf16 %v53_v12, %v51_v11  ;;  %v50_v15 = vld [vmem:[#allocation2 + $0x40] sm:$0xff]  ;;  %v52_v16 = vld [vmem:[#allocation2 + $0x50] sm:$0xff]  ;;  %v55_v17 = vld [vmem:[#allocation2 + $0x68] sm:$0xff]  ;;  %v133_v25 = vshrl.u32 %v132_v24, 7 }
  0x35   :  { %485 = vmatpush1.bf16.msra.mxu0 %v764_v26  ;;  %558 = vmatpush1.bf16.msra.mxu1 %v765_v27  ;;  %v57_v18 = vld [vmem:[#allocation2 + $0x78] sm:$0xff]  ;;  %v62_v19 = vpack.c.bf16 %v52_v16, %v50_v15  ;;  %v54_v21 = vld [vmem:[#allocation2 + $0x60] sm:$0xff]  ;;  %v56_v22 = vld [vmem:[#allocation2 + $0x70] sm:$0xff] }
  0x36   :  { %486 = vmatprep.subr.bf16.mxu0 %v766_v28  ;;  %559 = vmatprep.subr.bf16.mxu1 %v768_v29  ;;  %v65_v20 = vpack.c.bf16 %v57_v18, %v55_v17  ;;  %v64_v23 = vpack.c.bf16 %v56_v22, %v54_v21  ;;  %v134_v26 = vsub.s32 0, %v133_v25  ;;  %v142_v27 = vsub.s32 2, %v133_v25  ;;  %v130_v28 = vld [vmem:[%s1035_s2] sm:$0xf] }
  0x37   :  { %v138_v29 = vsub.s32 1, %v133_v25 }
  0x39   :  { %487 = vmatpush1.bf16.msra.mxu0 %v770_v30  ;;  %560 = vmatpush1.bf16.msra.mxu1 %v771_v31  ;;  %v146_v30 = vsub.s32 3, %v133_v25  ;;  %v897_v31 = vrot.slane %v130_v28, %v134_v26 }
  0x3a   :  { %488 = vmatprep.subr.bf16.mxu0 %v772_v32  ;;  %561 = vmatprep.subr.bf16.mxu1 %v774_v33  ;;  %v899_v32 = vrot.slane %v130_v28, %v142_v27  ;;  %v901_v33 = vrot.slane %v130_v28, %v138_v29 }
  0x3d   :  { %489 = vmatpush2.bf16.msra.mxu0 %v776_v34  ;;  %562 = vmatpush2.bf16.msra.mxu1 %v777_v35  ;;  %v903_v34 = vrot.slane %v130_v28, %v146_v30 }
  0x3e   :  { %490 = vmatprep.subr.bf16.mxu0 %v778_v36  ;;  %563 = vmatprep.subr.bf16.mxu1 %v780_v37 }
  0x41   :  { %491 = vmatpush2.bf16.msra.mxu0 %v782_v38  ;;  %564 = vmatpush2.bf16.msra.mxu1 %v783_v39 }
  0x42   :  { %492 = vmatprep.subr.bf16.mxu0 %v784_v40  ;;  %565 = vmatprep.subr.bf16.mxu1 %v786_v41 }
  0x45   :  { %493 = vmatpush2.bf16.msra.mxu0 %v788_v42  ;;  %566 = vmatpush2.bf16.msra.mxu1 %v789_v43 }
  0x46   :  { %494 = vmatprep.subr.bf16.mxu0 %v790_v44  ;;  %567 = vmatprep.subr.bf16.mxu1 %v792_v45 }
  0x49   :  { %495 = vmatpush2.bf16.msra.mxu0 %v794_v48  ;;  %568 = vmatpush2.bf16.msra.mxu1 %v795_v49 }
  0x4a   :  { %496 = vmatprep.subr.bf16.mxu0 %v796_v51  ;;  %569 = vmatprep.subr.bf16.mxu1 %v798_v52 }
  0x4d   :  { %497 = vmatpush2.bf16.msra.mxu0 %v800_v53  ;;  %570 = vmatpush2.bf16.msra.mxu1 %v801_v54 }
  0x4e   :  { %498 = vmatprep.subr.bf16.mxu0 %v802_v55  ;;  %571 = vmatprep.subr.bf16.mxu1 %v804_v56 }
  0x51   :  { %499 = vmatpush2.bf16.msra.mxu0 %v806_v57  ;;  %572 = vmatpush2.bf16.msra.mxu1 %v807_v58 }
  0x52   :  { %500 = vmatprep.subr.bf16.mxu0 %v808_v59  ;;  %573 = vmatprep.subr.bf16.mxu1 %v810_v60 }
  0x55   :  { %501 = vmatpush2.bf16.msra.mxu0 %v812_v61  ;;  %574 = vmatpush2.bf16.msra.mxu1 %v813_v62 }
  0x56   :  { %502 = vmatprep.subr.bf16.mxu0 %v814_v63  ;;  %575 = vmatprep.subr.bf16.mxu1 %v816_v0 }
  0x59   :  { %503 = vmatpush2.bf16.msra.mxu0 %v818_v1  ;;  %576 = vmatpush2.bf16.msra.mxu1 %v819_v2 }
  0x5c   :  { %505 = vmatmul.mubr.bf16.vlgmr.msra.gmra.mxu0 %v58_v7  ;;  %578 = vmatmul.mubr.bf16.vlgmr.msra.gmra.mxu1 %v58_v7 }
  0x5d   :  { %514 = vmatprep.mubr.bf16.mxu0 %v61_v8  ;;  %587 = vmatprep.mubr.bf16.mxu1 %v61_v8 }
  0x64   :  { %515 = vmatmul.mubr.bf16.gmra.mxu0 %v60_v13  ;;  %588 = vmatmul.mubr.bf16.gmra.mxu1 %v60_v13 }
  0x65   :  { %524 = vmatprep.mubr.bf16.mxu0 %v63_v14  ;;  %597 = vmatprep.mubr.bf16.mxu1 %v63_v14 }
  0x6c   :  { %525 = vmatmul.mubr.bf16.gmra.mxu0 %v62_v19  ;;  %598 = vmatmul.mubr.bf16.gmra.mxu1 %v62_v19 }
  0x6d   :  { %534 = vmatprep.mubr.bf16.mxu0 %v65_v20  ;;  %607 = vmatprep.mubr.bf16.mxu1 %v65_v20 }
  0x74   :  { %535 = vmatmul.mubr.bf16.gmra.mxu0 %v64_v23  ;;  %608 = vmatmul.mubr.bf16.gmra.mxu1 %v64_v23 }
 0x11c   :  { %v506_v35 = vpop.f32.mrf.mxu0  ;;  %v579_v36 = vpop.f32.mrf.mxu1 }
 0x11d   :  { %v507_v37 = vadd.f32 %v506_v35, %v897_v31  ;;  %v580_v38 = vadd.f32 %v579_v36, %v899_v32 }
 0x11e   :  { %v508_v39 = vpop.f32.mrf.mxu0  ;;  %v581_v40 = vpop.f32.mrf.mxu1 }
 0x11f   :  { %618 = vst [vmem:[%s1036_s3] sm:$0xff] %v507_v37  ;;  %620 = vst [vmem:[%s1036_s3 + $0x10] sm:$0xff] %v580_v38  ;;  %v509_v41 = vadd.f32 %v508_v39, %v901_v33  ;;  %v582_v42 = vadd.f32 %v581_v40, %v903_v34 }
 0x120   :  { %v510_v43 = vpop.f32.mrf.mxu0  ;;  %v583_v44 = vpop.f32.mrf.mxu1 }
 0x121   :  { %619 = vst [vmem:[%s1036_s3 + $0x8] sm:$0xff] %v509_v41  ;;  %621 = vst [vmem:[%s1036_s3 + $0x18] sm:$0xff] %v582_v42  ;;  %v511_v45 = vadd.f32 %v510_v43, %v897_v31  ;;  %v584_v46 = vadd.f32 %v583_v44, %v899_v32 }
 0x122   :  { %v512_v47 = vpop.f32.mrf.mxu0  ;;  %v585_v48 = vpop.f32.mrf.mxu1 }
 0x123   :  { %622 = vst [vmem:[%s1036_s3 + $0x20] sm:$0xff] %v511_v45  ;;  %624 = vst [vmem:[%s1036_s3 + $0x30] sm:$0xff] %v584_v46  ;;  %v513_v49 = vadd.f32 %v512_v47, %v901_v33  ;;  %v586_v50 = vadd.f32 %v585_v48, %v903_v34 }
 0x124   :  { %v516_v51 = vpop.f32.mrf.mxu0  ;;  %v589_v52 = vpop.f32.mrf.mxu1 }
 0x125   :  { %623 = vst [vmem:[%s1036_s3 + $0x28] sm:$0xff] %v513_v49  ;;  %625 = vst [vmem:[%s1036_s3 + $0x38] sm:$0xff] %v586_v50  ;;  %v517_v53 = vadd.f32 %v516_v51, %v897_v31  ;;  %v590_v54 = vadd.f32 %v589_v52, %v899_v32 }
 0x126   :  { %v518_v55 = vpop.f32.mrf.mxu0  ;;  %v591_v56 = vpop.f32.mrf.mxu1 }
 0x127   :  { %626 = vst [vmem:[%s1036_s3 + $0x40] sm:$0xff] %v517_v53  ;;  %628 = vst [vmem:[%s1036_s3 + $0x50] sm:$0xff] %v590_v54  ;;  %v519_v57 = vadd.f32 %v518_v55, %v901_v33  ;;  %v592_v58 = vadd.f32 %v591_v56, %v903_v34 }
 0x128   :  { %v520_v59 = vpop.f32.mrf.mxu0  ;;  %v593_v60 = vpop.f32.mrf.mxu1 }
 0x129   :  { %627 = vst [vmem:[%s1036_s3 + $0x48] sm:$0xff] %v519_v57  ;;  %629 = vst [vmem:[%s1036_s3 + $0x58] sm:$0xff] %v592_v58  ;;  %v521_v61 = vadd.f32 %v520_v59, %v897_v31  ;;  %v594_v62 = vadd.f32 %v593_v60, %v899_v32 }
 0x12a   :  { %v522_v63 = vpop.f32.mrf.mxu0  ;;  %v595_v0 = vpop.f32.mrf.mxu1 }
 0x12b   :  { %630 = vst [vmem:[%s1036_s3 + $0x60] sm:$0xff] %v521_v61  ;;  %632 = vst [vmem:[%s1036_s3 + $0x70] sm:$0xff] %v594_v62  ;;  %v523_v1 = vadd.f32 %v522_v63, %v901_v33  ;;  %v596_v2 = vadd.f32 %v595_v0, %v903_v34 }
 0x12c   :  { %v526_v3 = vpop.f32.mrf.mxu0  ;;  %v599_v4 = vpop.f32.mrf.mxu1 }
 0x12d   :  { %631 = vst [vmem:[%s1036_s3 + $0x68] sm:$0xff] %v523_v1  ;;  %633 = vst [vmem:[%s1036_s3 + $0x78] sm:$0xff] %v596_v2  ;;  %v527_v5 = vadd.f32 %v526_v3, %v897_v31  ;;  %v600_v6 = vadd.f32 %v599_v4, %v899_v32 }
 0x12e   :  { %v528_v7 = vpop.f32.mrf.mxu0  ;;  %v601_v8 = vpop.f32.mrf.mxu1 }
 0x12f   :  { %634 = vst [vmem:[%s1036_s3 + $0x80] sm:$0xff] %v527_v5  ;;  %636 = vst [vmem:[%s1036_s3 + $0x90] sm:$0xff] %v600_v6  ;;  %v529_v9 = vadd.f32 %v528_v7, %v901_v33  ;;  %v602_v10 = vadd.f32 %v601_v8, %v903_v34 }
 0x130   :  { %v530_v11 = vpop.f32.mrf.mxu0  ;;  %v603_v12 = vpop.f32.mrf.mxu1 }
 0x131   :  { %635 = vst [vmem:[%s1036_s3 + $0x88] sm:$0xff] %v529_v9  ;;  %637 = vst [vmem:[%s1036_s3 + $0x98] sm:$0xff] %v602_v10  ;;  %v531_v13 = vadd.f32 %v530_v11, %v897_v31  ;;  %v604_v14 = vadd.f32 %v603_v12, %v899_v32 }
 0x132   :  { %v532_v15 = vpop.f32.mrf.mxu0  ;;  %v605_v16 = vpop.f32.mrf.mxu1 }
 0x133   :  { %638 = vst [vmem:[%s1036_s3 + $0xa0] sm:$0xff] %v531_v13  ;;  %640 = vst [vmem:[%s1036_s3 + $0xb0] sm:$0xff] %v604_v14  ;;  %v533_v17 = vadd.f32 %v532_v15, %v901_v33  ;;  %v606_v18 = vadd.f32 %v605_v16, %v903_v34 }
 0x134   :  { %v536_v19 = vpop.f32.mrf.mxu0  ;;  %v609_v20 = vpop.f32.mrf.mxu1 }
 0x135   :  { %639 = vst [vmem:[%s1036_s3 + $0xa8] sm:$0xff] %v533_v17  ;;  %641 = vst [vmem:[%s1036_s3 + $0xb8] sm:$0xff] %v606_v18  ;;  %v537_v21 = vadd.f32 %v536_v19, %v897_v31  ;;  %v610_v22 = vadd.f32 %v609_v20, %v899_v32 }
 0x136   :  { %v538_v23 = vpop.f32.mrf.mxu0  ;;  %v611_v24 = vpop.f32.mrf.mxu1 }
 0x137   :  { %642 = vst [vmem:[%s1036_s3 + $0xc0] sm:$0xff] %v537_v21  ;;  %644 = vst [vmem:[%s1036_s3 + $0xd0] sm:$0xff] %v610_v22  ;;  %v539_v25 = vadd.f32 %v538_v23, %v901_v33  ;;  %v612_v26 = vadd.f32 %v611_v24, %v903_v34 }
 0x138   :  { %v540_v27 = vpop.f32.mrf.mxu0  ;;  %v613_v28 = vpop.f32.mrf.mxu1 }
 0x139   :  { %643 = vst [vmem:[%s1036_s3 + $0xc8] sm:$0xff] %v539_v25  ;;  %645 = vst [vmem:[%s1036_s3 + $0xd8] sm:$0xff] %v612_v26  ;;  %v541_v29 = vadd.f32 %v540_v27, %v897_v31  ;;  %v614_v30 = vadd.f32 %v613_v28, %v899_v32 }
 0x13a   :  { %v542_v35 = vpop.f32.mrf.mxu0  ;;  %v615_v36 = vpop.f32.mrf.mxu1 }
 0x13b   :  { %646 = vst [vmem:[%s1036_s3 + $0xe0] sm:$0xff] %v541_v29  ;;  %648 = vst [vmem:[%s1036_s3 + $0xf0] sm:$0xff] %v614_v30  ;;  %v543_v37 = vadd.f32 %v542_v35, %v901_v33  ;;  %v616_v38 = vadd.f32 %v615_v36, %v903_v34 }
 0x13d   :  { %647 = vst [vmem:[%s1036_s3 + $0xe8] sm:$0xff] %v543_v37  ;;  %649 = vst [vmem:[%s1036_s3 + $0xf8] sm:$0xff] %v616_v38 }
 0x13e   :  { %654 = vsyncpa [#allocation3], 1 }
 0x13f   :  { %655 = vsyncpa [#allocation5], 1 }

// kernel: vae_gauss_forward.8
= control target key start
LH: loop header
LB: loop body
LE: loop exit
PB: predicated region body
PF: predicated region fallthrough
CT: control target
= control target key end

     0   :  { %s1597_s12 = smov 0   ;;  %s1599_s13 = smov 0   ;;  %s2223_s0 = inlined_call_operand.vmem [shape: f32[64,128], index: 0, kind: input, shape index: {}]   ;;  %s2224_s1 = inlined_call_operand.vmem [shape: bf16[128,2048], index: 1, kind: input, shape index: {}]   ;;  %s2225_s2 = inlined_call_operand.vmem [shape: f32[1,2048], index: 2, kind: input, shape index: {}]   ;;  %s2226_s3 = inlined_call_operand.vmem [shape: f32[64,2048], index: 3, kind: output, shape index: {}]  }
   0x1   :  { %s1601_s14 = smov 0   ;;  %s1603_s15 = smov 0  }
   0x2   :  { %s1605_s16 = smov 0  }
   0x3 LB: > { %s22_s17 = sadd.s32 1, %s1570_s15  ;;  %s1412_s18 = sadd.s32 4294967295, %s1574_s16   ;;  %s1574_s16 = sphi %s1605_s16, %s13_s16   ;;  %s1570_s15 = sphi %s1603_s15, %s2231_s15   ;;  %s1566_s14 = sphi %s1601_s14, %s2230_s14   ;;  %s1562_s13 = sphi %s1599_s13, %s2229_s13   ;;  %s1558_s12 = sphi %s1597_s12, %s2228_s12  }
   0x4   : > { %p23_p0 = scmp.ge.s32.totalorder %s22_s17, 2  ;;  %p65_p1 = scmp.ne.s32.totalorder %s1562_s13, %s1558_s12 }
   0x5   : > { %p66_p2 = scmp.eq.s32.totalorder %s1574_s16, 0  ;;  %p123_p4 = scmp.eq.s32.totalorder %s1412_s18, 1 }
   0x6   : > { %s2233_s17 = smov (%p23_p0, %s22_s17), 0  ;;  %s58_s20 = sadd.s32 1, %s1562_s13 }
   0x7   : > { %p67_p3 = por %p66_p2, %p65_p1  ;;  %s55_s19 = ssub.s32 %s1570_s15, %s2233_s17 }
   0x8   : > { %p56_p5 = scmp.eq.s32.totalorder %s55_s19, 0  ;;  %p1632_p6 = por %p123_p4, %p65_p1 }
   0x9   : > { %p1416_p7 = scmp.ge.s32.totalorder %s1574_s16, 2 }
   0xa   : > { %s1637_s22 = scalar_select %p56_p5, %s1562_s13, %s58_s20  }
   0xb   : > { %154 = sbr.rel (%p1416_p7) target bundleno = 52 (0x34), region = 20 }
  0x10   : > { %157 = sbr.rel (!%p67_p3) target bundleno = 52 (0x34), region = 24  ;;  %s159_s23 = sand.u32 (%p67_p3), 1, %s1562_s13  }
  0x11   : > { %s1493_s24 = sshll.u32 (%p67_p3), %s1570_s15, 5  ;;  %s1417_s25 = sshll.u32 (%p67_p3), %s159_s23, 9 }
  0x12   : > { %s1645_s28 = scalar_lea.vmem (%p67_p3), %s2224_s1, %s1493_s24  ;;  %s1650_s29 = scalar_lea.vmem (%p67_p3), [#allocation2], %s1417_s25 }
  0x13   : > { %v177_v0 = vld [vmem:[%s1645_s28] sm:$0xff] (%p67_p3)  ;;  %v179_v1 = vld [vmem:[%s1645_s28 + $0x8] sm:$0xff] (%p67_p3)  ;;  %v181_v2 = vld [vmem:[%s1645_s28 + $0x10] sm:$0xff] (%p67_p3) }
  0x14   : > { %178 = vst [vmem:[%s1650_s29] sm:$0xff] (%p67_p3), %v177_v0  ;;  %180 = vst [vmem:[%s1650_s29 + $0x8] sm:$0xff] (%p67_p3), %v179_v1  ;;  %v183_v3 = vld [vmem:[%s1645_s28 + $0x18] sm:$0xff] (%p67_p3)  ;;  %v185_v4 = vld [vmem:[%s1645_s28 + $0x40] sm:$0xff] (%p67_p3) }
  0x15   : > { %182 = vst [vmem:[%s1650_s29 + $0x10] sm:$0xff] %v181_v2  ;;  %v187_v5 = vld [vmem:[%s1645_s28 + $0x48] sm:$0xff]  ;;  %184 = vst [vmem:[%s1650_s29 + $0x18] sm:$0xff] %v183_v3  ;;  %v189_v6 = vld [vmem:[%s1645_s28 + $0x50] sm:$0xff] }
  0x16   : > { %186 = vst [vmem:[%s1650_s29 + $0x20] sm:$0xff] %v185_v4  ;;  %188 = vst [vmem:[%s1650_s29 + $0x28] sm:$0xff] %v187_v5  ;;  %v191_v7 = vld [vmem:[%s1645_s28 + $0x58] sm:$0xff]  ;;  %v193_v8 = vld [vmem:[%s1645_s28 + $0x80] sm:$0xff] }
  0x17   : > { %190 = vst [vmem:[%s1650_s29 + $0x30] sm:$0xff] %v189_v6  ;;  %192 = vst [vmem:[%s1650_s29 + $0x38] sm:$0xff] %v191_v7  ;;  %v195_v9 = vld [vmem:[%s1645_s28 + $0x88] sm:$0xff]  ;;  %v197_v10 = vld [vmem:[%s1645_s28 + $0x90] sm:$0xff] }
  0x18   : > { %194 = vst [vmem:[%s1650_s29 + $0x40] sm:$0xff] %v193_v8  ;;  %v199_v11 = vld [vmem:[%s1645_s28 + $0x98] sm:$0xff]  ;;  %196 = vst [vmem:[%s1650_s29 + $0x48] sm:$0xff] %v195_v9  ;;  %v201_v12 = vld [vmem:[%s1645_s28 + $0xc0] sm:$0xff] }
  0x19   : > { %198 = vst [vmem:[%s1650_s29 + $0x50] sm:$0xff] %v197_v10  ;;  %200 = vst [vmem:[%s1650_s29 + $0x58] sm:$0xff] %v199_v11  ;;  %v203_v13 = vld [vmem:[%s1645_s28 + $0xc8] sm:$0xff]  ;;  %v205_v14 = vld [vmem:[%s1645_s28 + $0xd0] sm:$0xff] }
  0x1a   : > { %202 = vst [vmem:[%s1650_s29 + $0x60] sm:$0xff] %v201_v12  ;;  %204 = vst [vmem:[%s1650_s29 + $0x68] sm:$0xff] %v203_v13  ;;  %v207_v15 = vld [vmem:[%s1645_s28 + $0xd8] sm:$0xff]  ;;  %v209_v16 = vld [vmem:[%s1645_s28 + $0x100] sm:$0xff] }
  0x1b   : > { %206 = vst [vmem:[%s1650_s29 + $0x70] sm:$0xff] %v205_v14  ;;  %v211_v17 = vld [vmem:[%s1645_s28 + $0x108] sm:$0xff]  ;;  %208 = vst [vmem:[%s1650_s29 + $0x78] sm:$0xff] %v207_v15  ;;  %v213_v18 = vld [vmem:[%s1645_s28 + $0x110] sm:$0xff] }
  0x1c   : > { %210 = vst [vmem:[%s1650_s29 + $0x80] sm:$0xff] %v209_v16  ;;  %212 = vst [vmem:[%s1650_s29 + $0x88] sm:$0xff] %v211_v17  ;;  %v215_v19 = vld [vmem:[%s1645_s28 + $0x118] sm:$0xff]  ;;  %v217_v20 = vld [vmem:[%s1645_s28 + $0x140] sm:$0xff] }
  0x1d   : > { %214 = vst [vmem:[%s1650_s29 + $0x90] sm:$0xff] %v213_v18  ;;  %216 = vst [vmem:[%s1650_s29 + $0x98] sm:$0xff] %v215_v19  ;;  %v219_v21 = vld [vmem:[%s1645_s28 + $0x148] sm:$0xff]  ;;  %v221_v22 = vld [vmem:[%s1645_s28 + $0x150] sm:$0xff] }
  0x1e   : > { %218 = vst [vmem:[%s1650_s29 + $0xa0] sm:$0xff] %v217_v20  ;;  %v223_v23 = vld [vmem:[%s1645_s28 + $0x158] sm:$0xff]  ;;  %220 = vst [vmem:[%s1650_s29 + $0xa8] sm:$0xff] %v219_v21  ;;  %v225_v24 = vld [vmem:[%s1645_s28 + $0x180] sm:$0xff] }
  0x1f   : > { %222 = vst [vmem:[%s1650_s29 + $0xb0] sm:$0xff] %v221_v22  ;;  %224 = vst [vmem:[%s1650_s29 + $0xb8] sm:$0xff] %v223_v23  ;;  %v227_v25 = vld [vmem:[%s1645_s28 + $0x188] sm:$0xff]  ;;  %v229_v26 = vld [vmem:[%s1645_s28 + $0x190] sm:$0xff] }
  0x20   : > { %226 = vst [vmem:[%s1650_s29 + $0xc0] sm:$0xff] %v225_v24  ;;  %228 = vst [vmem:[%s1650_s29 + $0xc8] sm:$0xff] %v227_v25  ;;  %v231_v27 = vld [vmem:[%s1645_s28 + $0x198] sm:$0xff]  ;;  %v233_v28 = vld [vmem:[%s1645_s28 + $0x1c0] sm:$0xff] }
  0x21   : > { %230 = vst [vmem:[%s1650_s29 + $0xd0] sm:$0xff] %v229_v26  ;;  %v235_v29 = vld [vmem:[%s1645_s28 + $0x1c8] sm:$0xff]  ;;  %232 = vst [vmem:[%s1650_s29 + $0xd8] sm:$0xff] %v231_v27  ;;  %v237_v30 = vld [vmem:[%s1645_s28 + $0x1d0] sm:$0xff] }
  0x22   : > { %234 = vst [vmem:[%s1650_s29 + $0xe0] sm:$0xff] %v233_v28  ;;  %236 = vst [vmem:[%s1650_s29 + $0xe8] sm:$0xff] %v235_v29  ;;  %v239_v31 = vld [vmem:[%s1645_s28 + $0x1d8] sm:$0xff]  ;;  %v241_v32 = vld [vmem:[%s1645_s28 + $0x200] sm:$0xff] }
  0x23   : > { %238 = vst [vmem:[%s1650_s29 + $0xf0] sm:$0xff] %v237_v30  ;;  %240 = vst [vmem:[%s1650_s29 + $0xf8] sm:$0xff] %v239_v31  ;;  %v243_v33 = vld [vmem:[%s1645_s28 + $0x208] sm:$0xff]  ;;  %v245_v34 = vld [vmem:[%s1645_s28 + $0x210] sm:$0xff] }
  0x24   : > { %242 = vst [vmem:[%s1650_s29 + $0x100] sm:$0xff] %v241_v32  ;;  %v247_v35 = vld [vmem:[%s1645_s28 + $0x218] sm:$0xff]  ;;  %244 = vst [vmem:[%s1650_s29 + $0x108] sm:$0xff] %v243_v33  ;;  %v249_v36 = vld [vmem:[%s1645_s28 + $0x240] sm:$0xff] }
  0x25   : > { %246 = vst [vmem:[%s1650_s29 + $0x110] sm:$0xff] %v245_v34  ;;  %248 = vst [vmem:[%s1650_s29 + $0x118] sm:$0xff] %v247_v35  ;;  %v251_v37 = vld [vmem:[%s1645_s28 + $0x248] sm:$0xff]  ;;  %v253_v38 = vld [vmem:[%s1645_s28 + $0x250] sm:$0xff] }
  0x26   : > { %250 = vst [vmem:[%s1650_s29 + $0x120] sm:$0xff] %v249_v36  ;;  %252 = vst [vmem:[%s1650_s29 + $0x128] sm:$0xff] %v251_v37  ;;  %v255_v39 = vld [vmem:[%s1645_s28 + $0x258] sm:$0xff]  ;;  %v257_v40 = vld [vmem:[%s1645_s28 + $0x280] sm:$0xff] }
  0x27   : > { %254 = vst [vmem:[%s1650_s29 + $0x130] sm:$0xff] %v253_v38  ;;  %v259_v41 = vld [vmem:[%s1645_s28 + $0x288] sm:$0xff]  ;;  %256 = vst [vmem:[%s1650_s29 + $0x138] sm:$0xff] %v255_v39  ;;  %v261_v42 = vld [vmem:[%s1645_s28 + $0x290] sm:$0xff] }
  0x28   : > { %258 = vst [vmem:[%s1650_s29 + $0x140] sm:$0xff] %v257_v40  ;;  %260 = vst [vmem:[%s1650_s29 + $0x148] sm:$0xff] %v259_v41  ;;  %v263_v43 = vld [vmem:[%s1645_s28 + $0x298] sm:$0xff]  ;;  %v265_v44 = vld [vmem:[%s1645_s28 + $0x2c0] sm:$0xff] }
  0x29   : > { %262 = vst [vmem:[%s1650_s29 + $0x150] sm:$0xff] %v261_v42  ;;  %264 = vst [vmem:[%s1650_s29 + $0x158] sm:$0xff] %v263_v43  ;;  %v267_v45 = vld [vmem:[%s1645_s28 + $0x2c8] sm:$0xff]  ;;  %v269_v46 = vld [vmem:[%s1645_s28 + $0x2d0] sm:$0xff] }
  0x2a   : > { %266 = vst [vmem:[%s1650_s29 + $0x160] sm:$0xff] %v265_v44  ;;  %v271_v47 = vld [vmem:[%s1645_s28 + $0x2d8] sm:$0xff]  ;;  %268 = vst [vmem:[%s1650_s29 + $0x168] sm:$0xff] %v267_v45  ;;  %v273_v48 = vld [vmem:[%s1645_s28 + $0x300] sm:$0xff] }
  0x2b   : > { %270 = vst [vmem:[%s1650_s29 + $0x170] sm:$0xff] %v269_v46  ;;  %272 = vst [vmem:[%s1650_s29 + $0x178] sm:$0xff] %v271_v47  ;;  %v275_v49 = vld [vmem:[%s1645_s28 + $0x308] sm:$0xff]  ;;  %v277_v50 = vld [vmem:[%s1645_s28 + $0x310] sm:$0xff] }
  0x2c   : > { %274 = vst [vmem:[%s1650_s29 + $0x180] sm:$0xff] %v273_v48  ;;  %276 = vst [vmem:[%s1650_s29 + $0x188] sm:$0xff] %v275_v49  ;;  %v279_v51 = vld [vmem:[%s1645_s28 + $0x318] sm:$0xff]  ;;  %v281_v52 = vld [vmem:[%s1645_s28 + $0x340] sm:$0xff] }
  0x2d   : > { %278 = vst [vmem:[%s1650_s29 + $0x190] sm:$0xff] %v277_v50  ;;  %v283_v53 = vld [vmem:[%s1645_s28 + $0x348] sm:$0xff]  ;;  %280 = vst [vmem:[%s1650_s29 + $0x198] sm:$0xff] %v279_v51  ;;  %v285_v54 = vld [vmem:[%s1645_s28 + $0x350] sm:$0xff] }
  0x2e   : > { %282 = vst [vmem:[%s1650_s29 + $0x1a0] sm:$0xff] %v281_v52  ;;  %284 = vst [vmem:[%s1650_s29 + $0x1a8] sm:$0xff] %v283_v53  ;;  %v287_v55 = vld [vmem:[%s1645_s28 + $0x358] sm:$0xff]  ;;  %v289_v56 = vld [vmem:[%s1645_s28 + $0x380] sm:$0xff] }
  0x2f   : > { %286 = vst [vmem:[%s1650_s29 + $0x1b0] sm:$0xff] %v285_v54  ;;  %288 = vst [vmem:[%s1650_s29 + $0x1b8] sm:$0xff] %v287_v55  ;;  %v291_v57 = vld [vmem:[%s1645_s28 + $0x388] sm:$0xff]  ;;  %v293_v58 = vld [vmem:[%s1645_s28 + $0x390] sm:$0xff] }
  0x30   : > { %290 = vst [vmem:[%s1650_s29 + $0x1c0] sm:$0xff] %v289_v56  ;;  %v295_v59 = vld [vmem:[%s1645_s28 + $0x398] sm:$0xff]  ;;  %292 = vst [vmem:[%s1650_s29 + $0x1c8] sm:$0xff] %v291_v57  ;;  %v297_v60 = vld [vmem:[%s1645_s28 + $0x3c0] sm:$0xff] }
  0x31   : > { %294 = vst [vmem:[%s1650_s29 + $0x1d0] sm:$0xff] %v293_v58  ;;  %296 = vst [vmem:[%s1650_s29 + $0x1d8] sm:$0xff] %v295_v59  ;;  %v299_v61 = vld [vmem:[%s1645_s28 + $0x3c8] sm:$0xff]  ;;  %v301_v62 = vld [vmem:[%s1645_s28 + $0x3d0] sm:$0xff] }
  0x32   : > { %298 = vst [vmem:[%s1650_s29 + $0x1e0] sm:$0xff] %v297_v60  ;;  %300 = vst [vmem:[%s1650_s29 + $0x1e8] sm:$0xff] %v299_v61  ;;  %v303_v63 = vld [vmem:[%s1645_s28 + $0x3d8] sm:$0xff] }
  0x33   : > { %302 = vst [vmem:[%s1650_s29 + $0x1f0] sm:$0xff] %v301_v62  ;;  %304 = vst [vmem:[%s1650_s29 + $0x1f8] sm:$0xff] %v303_v63 }
  0x34 PF: > { %p1420_p8 = scmp.ge.s32.totalorder %s1574_s16, 1  ;;  %p317_p9 = scmp.lt.s32.totalorder %s1574_s16, 3 }
  0x36   : > { %p318_p10 = pnand %p1420_p8, %p317_p9 }
  0x37   : > { %s324_s30 = sand.u32 (!%p318_p10), 1, %s1558_s12   ;;  %s1423_s29 = sshll.u32 (!%p318_p10), %s1566_s14, 3 }
  0x38   : > { %321 = sbr.rel (%p318_p10) target bundleno = 373 (0x175), region = 51  ;;  %s1780_s4 = sshll.u32 (!%p318_p10), %s324_s30, 9 }
  0x39   : > { %s1785_s5 = scalar_lea.vmem (!%p318_p10), [#allocation2], %s1780_s4  ;;  %p363_p11 = scmp.lt.s32.totalorder (!%p318_p10), %s1423_s29, 15 }
  0x3a   : > { %s1928_s7 = scalar_lea.vmem (!%p318_p10), [#allocation3], %s1780_s4 }
  0x3d   : > { %v1576_v0 = vmov 0   ;;  %v438_v1 = vld [vmem:[%s1785_s5 + $0x1c0] sm:$0xff]  ;;  %v439_v3 = vld [vmem:[%s1785_s5 + $0x1c8] sm:$0xff]  ;;  %v440_v63 = vld [vmem:[%s1785_s5 + $0x1d0] sm:$0xff]  ;;  %s2235_s29 = smov (!%p363_p11, %s1423_s29), 15  ;;  %s1494_s4 = sshll.u32 (%p1632_p6), %s1566_s14, 6 }
  0x3e   : > { %840 = vmatprep.mubr.bf16.mxu0 %v1576_v0  ;;  %913 = vmatprep.mubr.bf16.mxu1 %v1576_v0  ;;  %v442_v2 = vld [vmem:[%s1785_s5 + $0x1e0] sm:$0xff]  ;;  %v443_v5 = vld [vmem:[%s1785_s5 + $0x1e8] sm:$0xff]  ;;  %s365_s6 = scalar_lea.vmem %s2225_s2, %s2235_s29  ;;  %s2081_s10 = scalar_lea.vmem (%p1632_p6), %s2226_s3, %s1494_s4 }
  0x3f   : > { %v1481_v4 = vcombine.high %v438_v1, %v442_v2  ;;  %v1480_v6 = vcombine.low %v438_v1, %v442_v2  ;;  %v430_v7 = vld [vmem:[%s1785_s5 + $0x180] sm:$0xff]  ;;  %v1483_v9 = vcombine.high %v439_v3, %v443_v5  ;;  %v1482_v10 = vcombine.low %v439_v3, %v443_v5  ;;  %v431_v12 = vld [vmem:[%s1785_s5 + $0x188] sm:$0xff]  ;;  %v444_v1 = vld [vmem:[%s1785_s5 + $0x1f0] sm:$0xff] }
  0x40   : > { %v434_v8 = vld [vmem:[%s1785_s5 + $0x1a0] sm:$0xff]  ;;  %v435_v13 = vld [vmem:[%s1785_s5 + $0x1a8] sm:$0xff]  ;;  %v441_v2 = vld [vmem:[%s1785_s5 + $0x1d8] sm:$0xff] }
  0x41   : > { %v1473_v11 = vcombine.high %v430_v7, %v434_v8  ;;  %v422_v14 = vld [vmem:[%s1785_s5 + $0x140] sm:$0xff]  ;;  %808 = vmatprep.subr.bf16.mxu0 %v1481_v4  ;;  %v1475_v15 = vcombine.high %v431_v12, %v435_v13  ;;  %v423_v17 = vld [vmem:[%s1785_s5 + $0x148] sm:$0xff]  ;;  %881 = vmatprep.subr.bf16.mxu1 %v1483_v9  ;;  %v1472_v19 = vcombine.low %v430_v7, %v434_v8  ;;  %v445_v3 = vld [vmem:[%s1785_s5 + $0x1f8] sm:$0xff] }
  0x42   : > { %v426_v16 = vld [vmem:[%s1785_s5 + $0x160] sm:$0xff]  ;;  %v427_v18 = vld [vmem:[%s1785_s5 + $0x168] sm:$0xff]  ;;  %809 = vmatpush1.bf16.msra.mxu0 %v1480_v6  ;;  %882 = vmatpush1.bf16.msra.mxu1 %v1482_v10  ;;  %v1474_v20 = vcombine.low %v431_v12, %v435_v13  ;;  %v1485_v8 = vcombine.high %v440_v63, %v444_v1  ;;  %v1487_v9 = vcombine.high %v441_v2, %v445_v3  ;;  %v432_v10 = vld [vmem:[%s1785_s5 + $0x190] sm:$0xff] }
  0x43   : > { %810 = vmatprep.subr.bf16.mxu0 %v1473_v11  ;;  %v1465_v21 = vcombine.high %v422_v14, %v426_v16  ;;  %883 = vmatprep.subr.bf16.mxu1 %v1475_v15  ;;  %v1467_v22 = vcombine.high %v423_v17, %v427_v18  ;;  %v414_v23 = vld [vmem:[%s1785_s5 + $0x100] sm:$0xff]  ;;  %v415_v25 = vld [vmem:[%s1785_s5 + $0x108] sm:$0xff]  ;;  %v1464_v27 = vcombine.low %v422_v14, %v426_v16  ;;  %v436_v11 = vld [vmem:[%s1785_s5 + $0x1b0] sm:$0xff] }
  0x44   : > { %v418_v24 = vld [vmem:[%s1785_s5 + $0x120] sm:$0xff]  ;;  %v419_v26 = vld [vmem:[%s1785_s5 + $0x128] sm:$0xff]  ;;  %v1466_v28 = vcombine.low %v423_v17, %v427_v18  ;;  %v433_v13 = vld [vmem:[%s1785_s5 + $0x198] sm:$0xff]  ;;  %v1484_v15 = vcombine.low %v440_v63, %v444_v1  ;;  %v1486_v16 = vcombine.low %v441_v2, %v445_v3  ;;  %v1477_v17 = vcombine.high %v432_v10, %v436_v11 }
  0x45   : > { %v1457_v29 = vcombine.high %v414_v23, %v418_v24  ;;  %v1459_v30 = vcombine.high %v415_v25, %v419_v26  ;;  %v406_v31 = vld [vmem:[%s1785_s5 + $0xc0] sm:$0xff]  ;;  %v407_v33 = vld [vmem:[%s1785_s5 + $0xc8] sm:$0xff]  ;;  %v1456_v35 = vcombine.low %v414_v23, %v418_v24  ;;  %v1458_v36 = vcombine.low %v415_v25, %v419_v26  ;;  %v437_v14 = vld [vmem:[%s1785_s5 + $0x1b8] sm:$0xff] }
  0x46   : > { %811 = vmatpush1.bf16.msra.mxu0 %v1472_v19  ;;  %884 = vmatpush1.bf16.msra.mxu1 %v1474_v20  ;;  %v410_v32 = vld [vmem:[%s1785_s5 + $0xe0] sm:$0xff]  ;;  %v411_v34 = vld [vmem:[%s1785_s5 + $0xe8] sm:$0xff]  ;;  %v1479_v18 = vcombine.high %v433_v13, %v437_v14  ;;  %v424_v19 = vld [vmem:[%s1785_s5 + $0x150] sm:$0xff]  ;;  %v1476_v23 = vcombine.low %v432_v10, %v436_v11  ;;  %v1478_v26 = vcombine.low %v433_v13, %v437_v14 }
  0x47   : > { %812 = vmatprep.subr.bf16.mxu0 %v1465_v21  ;;  %885 = vmatprep.subr.bf16.mxu1 %v1467_v22  ;;  %v1449_v37 = vcombine.high %v406_v31, %v410_v32  ;;  %v1451_v38 = vcombine.high %v407_v33, %v411_v34  ;;  %v398_v39 = vld [vmem:[%s1785_s5 + $0x80] sm:$0xff]  ;;  %v399_v41 = vld [vmem:[%s1785_s5 + $0x88] sm:$0xff]  ;;  %v1448_v43 = vcombine.low %v406_v31, %v410_v32  ;;  %v428_v20 = vld [vmem:[%s1785_s5 + $0x170] sm:$0xff] }
  0x48   : > { %v402_v40 = vld [vmem:[%s1785_s5 + $0xa0] sm:$0xff]  ;;  %v403_v42 = vld [vmem:[%s1785_s5 + $0xa8] sm:$0xff]  ;;  %v1450_v44 = vcombine.low %v407_v33, %v411_v34  ;;  %v425_v21 = vld [vmem:[%s1785_s5 + $0x158] sm:$0xff]  ;;  %v1468_v34 = vcombine.low %v424_v19, %v428_v20 }
  0x49   : > { %v1441_v45 = vcombine.high %v398_v39, %v402_v40  ;;  %v1443_v46 = vcombine.high %v399_v41, %v403_v42  ;;  %v390_v47 = vld [vmem:[%s1785_s5 + $0x40] sm:$0xff]  ;;  %v391_v49 = vld [vmem:[%s1785_s5 + $0x48] sm:$0xff]  ;;  %v1440_v51 = vcombine.low %v398_v39, %v402_v40  ;;  %v1442_v52 = vcombine.low %v399_v41, %v403_v42  ;;  %v429_v22 = vld [vmem:[%s1785_s5 + $0x178] sm:$0xff] }
  0x4a   : > { %813 = vmatpush1.bf16.msra.mxu0 %v1464_v27  ;;  %886 = vmatpush1.bf16.msra.mxu1 %v1466_v28  ;;  %v394_v48 = vld [vmem:[%s1785_s5 + $0x60] sm:$0xff]  ;;  %v395_v50 = vld [vmem:[%s1785_s5 + $0x68] sm:$0xff]  ;;  %v372_v24 = vld [vmem:[%s2223_s0 + $0x10] sm:$0xff]  ;;  %v1469_v27 = vcombine.high %v424_v19, %v428_v20  ;;  %v1471_v28 = vcombine.high %v425_v21, %v429_v22 }
  0x4b   : > { %814 = vmatprep.subr.bf16.mxu0 %v1457_v29  ;;  %887 = vmatprep.subr.bf16.mxu1 %v1459_v30  ;;  %v1433_v53 = vcombine.high %v390_v47, %v394_v48  ;;  %v1435_v54 = vcombine.high %v391_v49, %v395_v50  ;;  %v382_v55 = vld [vmem:[%s1785_s5] sm:$0xff]  ;;  %v383_v57 = vld [vmem:[%s1785_s5 + $0x8] sm:$0xff]  ;;  %v1432_v59 = vcombine.low %v390_v47, %v394_v48  ;;  %v373_v25 = vld [vmem:[%s2223_s0 + $0x18] sm:$0xff] }
  0x4c   : > { %v386_v56 = vld [vmem:[%s1785_s5 + $0x20] sm:$0xff]  ;;  %v387_v58 = vld [vmem:[%s1785_s5 + $0x28] sm:$0xff]  ;;  %v1434_v60 = vcombine.low %v391_v49, %v395_v50  ;;  %v416_v29 = vld [vmem:[%s1785_s5 + $0x110] sm:$0xff]  ;;  %v1851_v31 = vpack.c.bf16 %v373_v25, %v372_v24 }
  0x4d   : > { %v1425_v61 = vcombine.high %v382_v55, %v386_v56  ;;  %v1427_v62 = vcombine.high %v383_v57, %v387_v58  ;;  %v1424_v4 = vcombine.low %v382_v55, %v386_v56  ;;  %v370_v5 = vld [vmem:[%s2223_s0] sm:$0xff]  ;;  %v371_v6 = vld [vmem:[%s2223_s0 + $0x8] sm:$0xff]  ;;  %v1426_v7 = vcombine.low %v383_v57, %v387_v58  ;;  %v420_v30 = vld [vmem:[%s1785_s5 + $0x130] sm:$0xff] }
  0x4e   : > { %815 = vmatpush1.bf16.msra.mxu0 %v1456_v35  ;;  %888 = vmatpush1.bf16.msra.mxu1 %v1458_v36  ;;  %v1831_v12 = vpack.c.bf16 %v371_v6, %v370_v5  ;;  %v417_v32 = vld [vmem:[%s1785_s5 + $0x118] sm:$0xff]  ;;  %v1470_v35 = vcombine.low %v425_v21, %v429_v22  ;;  %v1461_v36 = vcombine.high %v416_v29, %v420_v30  ;;  %v412_v39 = vld [vmem:[%s1785_s5 + $0xf0] sm:$0xff] }
  0x4f   : > { %816 = vmatprep.subr.bf16.mxu0 %v1449_v37  ;;  %889 = vmatprep.subr.bf16.mxu1 %v1451_v38  ;;  %v421_v33 = vld [vmem:[%s1785_s5 + $0x138] sm:$0xff]  ;;  %v408_v38 = vld [vmem:[%s1785_s5 + $0xd0] sm:$0xff]  ;;  %v1460_v42 = vcombine.low %v416_v29, %v420_v30 }
  0x50   : > { %v1463_v37 = vcombine.high %v417_v32, %v421_v33  ;;  %v409_v40 = vld [vmem:[%s1785_s5 + $0xd8] sm:$0xff]  ;;  %v400_v48 = vld [vmem:[%s1785_s5 + $0x90] sm:$0xff] }
  0x51   : > { %v413_v41 = vld [vmem:[%s1785_s5 + $0xf8] sm:$0xff]  ;;  %v404_v49 = vld [vmem:[%s1785_s5 + $0xb0] sm:$0xff] }
  0x52   : > { %817 = vmatpush1.bf16.msra.mxu0 %v1448_v43  ;;  %890 = vmatpush1.bf16.msra.mxu1 %v1450_v44  ;;  %v374_v43 = vld [vmem:[%s2223_s0 + $0x20] sm:$0xff]  ;;  %v375_v44 = vld [vmem:[%s2223_s0 + $0x28] sm:$0xff]  ;;  %v1455_v47 = vcombine.high %v409_v40, %v413_v41  ;;  %v1445_v55 = vcombine.high %v400_v48, %v404_v49  ;;  %v392_v57 = vld [vmem:[%s1785_s5 + $0x50] sm:$0xff] }
  0x53   : > { %818 = vmatprep.subr.bf16.mxu0 %v1441_v45  ;;  %891 = vmatprep.subr.bf16.mxu1 %v1443_v46  ;;  %v1462_v45 = vcombine.low %v417_v32, %v421_v33  ;;  %v1453_v46 = vcombine.high %v408_v38, %v412_v39  ;;  %v380_v50 = vpack.c.bf16 %v375_v44, %v374_v43  ;;  %v396_v58 = vld [vmem:[%s1785_s5 + $0x70] sm:$0xff]  ;;  %v377_v63 = vld [vmem:[%s2223_s0 + $0x38] sm:$0xff] }
  0x54   : > { %v1437_v2 = vcombine.high %v392_v57, %v396_v58  ;;  %v388_v5 = vld [vmem:[%s1785_s5 + $0x30] sm:$0xff] }
  0x56   : > { %819 = vmatpush1.bf16.msra.mxu0 %v1440_v51  ;;  %892 = vmatpush1.bf16.msra.mxu1 %v1442_v52  ;;  %v401_v51 = vld [vmem:[%s1785_s5 + $0x98] sm:$0xff] }
  0x57   : > { %820 = vmatprep.subr.bf16.mxu0 %v1433_v53  ;;  %893 = vmatprep.subr.bf16.mxu1 %v1435_v54  ;;  %v405_v52 = vld [vmem:[%s1785_s5 + $0xb8] sm:$0xff]  ;;  %v1452_v53 = vcombine.low %v408_v38, %v412_v39  ;;  %v1454_v54 = vcombine.low %v409_v40, %v413_v41 }
  0x58   : > { %v1447_v56 = vcombine.high %v401_v51, %v405_v52  ;;  %v1446_v1 = vcombine.low %v401_v51, %v405_v52 }
  0x5a   : > { %821 = vmatpush1.bf16.msra.mxu0 %v1432_v59  ;;  %894 = vmatpush1.bf16.msra.mxu1 %v1434_v60  ;;  %v393_v59 = vld [vmem:[%s1785_s5 + $0x58] sm:$0xff] }
  0x5b   : > { %822 = vmatprep.subr.bf16.mxu0 %v1425_v61  ;;  %895 = vmatprep.subr.bf16.mxu1 %v1427_v62  ;;  %v397_v60 = vld [vmem:[%s1785_s5 + $0x78] sm:$0xff]  ;;  %v1444_v61 = vcombine.low %v400_v48, %v404_v49  ;;  %v376_v62 = vld [vmem:[%s2223_s0 + $0x30] sm:$0xff] }
  0x5c   : > { %v1439_v3 = vcombine.high %v393_v59, %v397_v60  ;;  %v381_v6 = vpack.c.bf16 %v377_v63, %v376_v62  ;;  %v1438_v10 = vcombine.low %v393_v59, %v397_v60 }
  0x5e   : > { %823 = vmatpush1.bf16.msra.mxu0 %v1424_v4  ;;  %896 = vmatpush1.bf16.msra.mxu1 %v1426_v7  ;;  %v384_v4 = vld [vmem:[%s1785_s5 + $0x10] sm:$0xff]  ;;  %v385_v7 = vld [vmem:[%s1785_s5 + $0x18] sm:$0xff] }
  0x5f   : > { %954 = vmatprep.subr.bf16.mxu0 %v1485_v8  ;;  %1027 = vmatprep.subr.bf16.mxu1 %v1487_v9  ;;  %v389_v8 = vld [vmem:[%s1785_s5 + $0x38] sm:$0xff]  ;;  %v1436_v9 = vcombine.low %v392_v57, %v396_v58  ;;  %v1429_v11 = vcombine.high %v384_v4, %v388_v5  ;;  %v1428_v14 = vcombine.low %v384_v4, %v388_v5 }
  0x60   : > { %v1431_v13 = vcombine.high %v385_v7, %v389_v8 }
  0x61   : > { %841 = vmatmul.mubr.bf16.vlgmr.msra.gmra.mxu0 %v1831_v12  ;;  %914 = vmatmul.mubr.bf16.vlgmr.msra.gmra.mxu1 %v1831_v12 }
  0x62   : > { %955 = vmatpush1.bf16.msra.mxu0 %v1484_v15  ;;  %1028 = vmatpush1.bf16.msra.mxu1 %v1486_v16  ;;  %v1430_v15 = vcombine.low %v385_v7, %v389_v8 }
  0x63   : > { %956 = vmatprep.subr.bf16.mxu0 %v1477_v17  ;;  %1029 = vmatprep.subr.bf16.mxu1 %v1479_v18  ;;  %v1908_v18 = vld [vmem:[%s365_s6] sm:$0xff] }
  0x64   : > { %850 = vmatprep.mubr.bf16.mxu0 %v1576_v0  ;;  %923 = vmatprep.mubr.bf16.mxu1 %v1576_v0 }
  0x66   : > { %957 = vmatpush1.bf16.msra.mxu0 %v1476_v23  ;;  %1030 = vmatpush1.bf16.msra.mxu1 %v1478_v26 }
  0x67   : > { %958 = vmatprep.subr.bf16.mxu0 %v1469_v27  ;;  %1031 = vmatprep.subr.bf16.mxu1 %v1471_v28 }
  0x69   : > { %851 = vmatmul.mubr.bf16.gmra.mxu0 %v1851_v31  ;;  %924 = vmatmul.mubr.bf16.gmra.mxu1 %v1851_v31 }
  0x6a   : > { %959 = vmatpush1.bf16.msra.mxu0 %v1468_v34  ;;  %1032 = vmatpush1.bf16.msra.mxu1 %v1470_v35 }
  0x6b   : > { %960 = vmatprep.subr.bf16.mxu0 %v1461_v36  ;;  %1033 = vmatprep.subr.bf16.mxu1 %v1463_v37 }
  0x6c   : > { %860 = vmatprep.mubr.bf16.mxu0 %v1576_v0  ;;  %933 = vmatprep.mubr.bf16.mxu1 %v1576_v0 }
  0x6e   : > { %961 = vmatpush1.bf16.msra.mxu0 %v1460_v42  ;;  %1034 = vmatpush1.bf16.msra.mxu1 %v1462_v45 }
  0x6f   : > { %962 = vmatprep.subr.bf16.mxu0 %v1453_v46  ;;  %1035 = vmatprep.subr.bf16.mxu1 %v1455_v47 }
  0x71   : > { %861 = vmatmul.mubr.bf16.gmra.mxu0 %v380_v50  ;;  %934 = vmatmul.mubr.bf16.gmra.mxu1 %v380_v50 }
  0x72   : > { %963 = vmatpush1.bf16.msra.mxu0 %v1452_v53  ;;  %1036 = vmatpush1.bf16.msra.mxu1 %v1454_v54 }
  0x73   : > { %964 = vmatprep.subr.bf16.mxu0 %v1445_v55  ;;  %1037 = vmatprep.subr.bf16.mxu1 %v1447_v56 }
  0x74   : > { %870 = vmatprep.mubr.bf16.mxu0 %v1576_v0  ;;  %943 = vmatprep.mubr.bf16.mxu1 %v1576_v0 }
  0x76   : > { %965 = vmatpush1.bf16.msra.mxu0 %v1444_v61  ;;  %1038 = vmatpush1.bf16.msra.mxu1 %v1446_v1 }
  0x77   : > { %966 = vmatprep.subr.bf16.mxu0 %v1437_v2  ;;  %1039 = vmatprep.subr.bf16.mxu1 %v1439_v3 }
  0x79   : > { %871 = vmatmul.mubr.bf16.gmra.mxu0 %v381_v6  ;;  %944 = vmatmul.mubr.bf16.gmra.mxu1 %v381_v6 }
  0x7a   : > { %967 = vmatpush1.bf16.msra.mxu0 %v1436_v9  ;;  %1040 = vmatpush1.bf16.msra.mxu1 %v1438_v10 }
  0x7b   : > { %968 = vmatprep.subr.bf16.mxu0 %v1429_v11  ;;  %1041 = vmatprep.subr.bf16.mxu1 %v1431_v13 }
  0x7c   : > { %986 = vmatprep.mubr.bf16.mxu0 %v1576_v0  ;;  %1059 = vmatprep.mubr.bf16.mxu1 %v1576_v0 }
  0x7e   : > { %969 = vmatpush1.bf16.msra.mxu0 %v1428_v14  ;;  %1042 = vmatpush1.bf16.msra.mxu1 %v1430_v15 }
  0x81   : > { %987 = vmatmul.mubr.bf16.vlgmr.msra.gmra.mxu0 %v1831_v12  ;;  %1060 = vmatmul.mubr.bf16.vlgmr.msra.gmra.mxu1 %v1831_v12  ;;  %v448_v12 = vlaneseq }
  0x82   : > { %996 = vmatprep.mubr.bf16.mxu0 %v1576_v0  ;;  %1069 = vmatprep.mubr.bf16.mxu1 %v1576_v0 }
  0x83   : > { %v1902_v16 = vshrl.u32 %v448_v12, 7 }
  0x85   : > { %v450_v17 = vsub.s32 0, %v1902_v16  ;;  %v458_v19 = vsub.s32 2, %v1902_v16  ;;  %v462_v20 = vsub.s32 3, %v1902_v16  ;;  %v466_v14 = vsub.s32 4, %v1902_v16 }
  0x87   : > { %v1914_v21 = vrot.slane %v1908_v18, %v450_v17  ;;  %v1917_v22 = vrot.slane %v1908_v18, %v458_v19  ;;  %v1923_v25 = vrot.slane %v1908_v18, %v462_v20  ;;  %v474_v17 = vsub.s32 6, %v1902_v16 }
  0x88   : > { %v470_v20 = vsub.s32 5, %v1902_v16 }
  0x89   : > { %997 = vmatmul.mubr.bf16.gmra.mxu0 %v1851_v31  ;;  %1070 = vmatmul.mubr.bf16.gmra.mxu1 %v1851_v31 }
  0x8a   : > { %1006 = vmatprep.mubr.bf16.mxu0 %v1576_v0  ;;  %1079 = vmatprep.mubr.bf16.mxu1 %v1576_v0 }
  0x91   : > { %1007 = vmatmul.mubr.bf16.gmra.mxu0 %v380_v50  ;;  %1080 = vmatmul.mubr.bf16.gmra.mxu1 %v380_v50 }
  0x92   : > { %1016 = vmatprep.mubr.bf16.mxu0 %v1576_v0  ;;  %1089 = vmatprep.mubr.bf16.mxu1 %v1576_v0  ;;  %v454_v0 = vsub.s32 1, %v1902_v16 }
  0x94   : > { %v1920_v23 = vrot.slane %v1908_v18, %v454_v0 }
  0x99   : > { %1017 = vmatmul.mubr.bf16.gmra.mxu0 %v381_v6  ;;  %1090 = vmatmul.mubr.bf16.gmra.mxu1 %v381_v6 }
 0x121   : > { %v842_v24 = vpop.f32.mrf.mxu0  ;;  %v915_v27 = vpop.f32.mrf.mxu1 }
 0x122   : > { %v843_v26 = vadd.f32 %v842_v24, %v1914_v21  ;;  %v916_v28 = vadd.f32 %v915_v27, %v1917_v22  ;;  %v478_v27 = vsub.s32 7, %v1902_v16 }
 0x123   : > { %v844_v29 = vpop.f32.mrf.mxu0  ;;  %v917_v31 = vpop.f32.mrf.mxu1 }
 0x124   : > { %1100 = vst [vmem:[%s1928_s7] sm:$0xff] %v843_v26  ;;  %v845_v30 = vadd.f32 %v844_v29, %v1920_v23  ;;  %1102 = vst [vmem:[%s1928_s7 + $0x10] sm:$0xff] %v916_v28  ;;  %v918_v32 = vadd.f32 %v917_v31, %v1923_v25 }
 0x125   : > { %v846_v33 = vpop.f32.mrf.mxu0  ;;  %v919_v35 = vpop.f32.mrf.mxu1 }
 0x126   : > { %1101 = vst [vmem:[%s1928_s7 + $0x8] sm:$0xff] %v845_v30  ;;  %v847_v34 = vadd.f32 %v846_v33, %v1914_v21  ;;  %1103 = vst [vmem:[%s1928_s7 + $0x18] sm:$0xff] %v918_v32  ;;  %v920_v36 = vadd.f32 %v919_v35, %v1917_v22  ;;  %v1989_v30 = vrot.slane %v1908_v18, %v466_v14 }
 0x127   : > { %v848_v37 = vpop.f32.mrf.mxu0  ;;  %v921_v39 = vpop.f32.mrf.mxu1  ;;  %v1994_v33 = vrot.slane %v1908_v18, %v474_v17 }
 0x128   : > { %1108 = vst [vmem:[%s1928_s7 + $0x40] sm:$0xff] %v847_v34  ;;  %v849_v38 = vadd.f32 %v848_v37, %v1920_v23  ;;  %1110 = vst [vmem:[%s1928_s7 + $0x50] sm:$0xff] %v920_v36  ;;  %v922_v40 = vadd.f32 %v921_v39, %v1923_v25 }
 0x129   : > { %v852_v41 = vpop.f32.mrf.mxu0  ;;  %v925_v43 = vpop.f32.mrf.mxu1 }
 0x12a   : > { %1109 = vst [vmem:[%s1928_s7 + $0x48] sm:$0xff] %v849_v38  ;;  %v853_v42 = vadd.f32 %v852_v41, %v1914_v21  ;;  %1111 = vst [vmem:[%s1928_s7 + $0x58] sm:$0xff] %v922_v40  ;;  %v926_v44 = vadd.f32 %v925_v43, %v1917_v22 }
 0x12b   : > { %v854_v45 = vpop.f32.mrf.mxu0  ;;  %v927_v47 = vpop.f32.mrf.mxu1 }
 0x12c   : > { %1116 = vst [vmem:[%s1928_s7 + $0x80] sm:$0xff] %v853_v42  ;;  %v855_v46 = vadd.f32 %v854_v45, %v1920_v23  ;;  %1118 = vst [vmem:[%s1928_s7 + $0x90] sm:$0xff] %v926_v44  ;;  %v928_v48 = vadd.f32 %v927_v47, %v1923_v25 }
 0x12d   : > { %v856_v49 = vpop.f32.mrf.mxu0  ;;  %v929_v51 = vpop.f32.mrf.mxu1 }
 0x12e   : > { %1117 = vst [vmem:[%s1928_s7 + $0x88] sm:$0xff] %v855_v46  ;;  %v857_v50 = vadd.f32 %v856_v49, %v1914_v21  ;;  %1119 = vst [vmem:[%s1928_s7 + $0x98] sm:$0xff] %v928_v48  ;;  %v930_v52 = vadd.f32 %v929_v51, %v1917_v22 }
 0x12f   : > { %v858_v53 = vpop.f32.mrf.mxu0  ;;  %v931_v55 = vpop.f32.mrf.mxu1 }
 0x130   : > { %1124 = vst [vmem:[%s1928_s7 + $0xc0] sm:$0xff] %v857_v50  ;;  %v859_v54 = vadd.f32 %v858_v53, %v1920_v23  ;;  %1126 = vst [vmem:[%s1928_s7 + $0xd0] sm:$0xff] %v930_v52  ;;  %v932_v56 = vadd.f32 %v931_v55, %v1923_v25 }
 0x131   : > { %v862_v57 = vpop.f32.mrf.mxu0  ;;  %v935_v59 = vpop.f32.mrf.mxu1 }
 0x132   : > { %1125 = vst [vmem:[%s1928_s7 + $0xc8] sm:$0xff] %v859_v54  ;;  %v863_v58 = vadd.f32 %v862_v57, %v1914_v21  ;;  %1127 = vst [vmem:[%s1928_s7 + $0xd8] sm:$0xff] %v932_v56  ;;  %v936_v60 = vadd.f32 %v935_v59, %v1917_v22 }
 0x133   : > { %v864_v61 = vpop.f32.mrf.mxu0  ;;  %v937_v63 = vpop.f32.mrf.mxu1 }
 0x134   : > { %1132 = vst [vmem:[%s1928_s7 + $0x100] sm:$0xff] %v863_v58  ;;  %v865_v62 = vadd.f32 %v864_v61, %v1920_v23  ;;  %1134 = vst [vmem:[%s1928_s7 + $0x110] sm:$0xff] %v936_v60  ;;  %v938_v1 = vadd.f32 %v937_v63, %v1923_v25 }
 0x135   : > { %v866_v2 = vpop.f32.mrf.mxu0  ;;  %v939_v4 = vpop.f32.mrf.mxu1 }
 0x136   : > { %1133 = vst [vmem:[%s1928_s7 + $0x108] sm:$0xff] %v865_v62  ;;  %v867_v3 = vadd.f32 %v866_v2, %v1914_v21  ;;  %1135 = vst [vmem:[%s1928_s7 + $0x118] sm:$0xff] %v938_v1  ;;  %v940_v5 = vadd.f32 %v939_v4, %v1917_v22 }
 0x137   : > { %v868_v6 = vpop.f32.mrf.mxu0  ;;  %v941_v8 = vpop.f32.mrf.mxu1 }
 0x138   : > { %1140 = vst [vmem:[%s1928_s7 + $0x140] sm:$0xff] %v867_v3  ;;  %v869_v7 = vadd.f32 %v868_v6, %v1920_v23  ;;  %1142 = vst [vmem:[%s1928_s7 + $0x150] sm:$0xff] %v940_v5  ;;  %v942_v9 = vadd.f32 %v941_v8, %v1923_v25 }
 0x139   : > { %v872_v10 = vpop.f32.mrf.mxu0  ;;  %v945_v13 = vpop.f32.mrf.mxu1 }
 0x13a   : > { %1141 = vst [vmem:[%s1928_s7 + $0x148] sm:$0xff] %v869_v7  ;;  %v873_v11 = vadd.f32 %v872_v10, %v1914_v21  ;;  %1143 = vst [vmem:[%s1928_s7 + $0x158] sm:$0xff] %v942_v9  ;;  %v946_v15 = vadd.f32 %v945_v13, %v1917_v22 }
 0x13b   : > { %v874_v12 = vpop.f32.mrf.mxu0  ;;  %v947_v0 = vpop.f32.mrf.mxu1 }
 0x13c   : > { %1148 = vst [vmem:[%s1928_s7 + $0x180] sm:$0xff] %v873_v11  ;;  %v875_v19 = vadd.f32 %v874_v12, %v1920_v23  ;;  %1150 = vst [vmem:[%s1928_s7 + $0x190] sm:$0xff] %v946_v15  ;;  %v948_v24 = vadd.f32 %v947_v0, %v1923_v25 }
 0x13d   : > { %v876_v26 = vpop.f32.mrf.mxu0  ;;  %v949_v29 = vpop.f32.mrf.mxu1 }
 0x13e   : > { %1149 = vst [vmem:[%s1928_s7 + $0x188] sm:$0xff] %v875_v19  ;;  %v877_v28 = vadd.f32 %v876_v26, %v1914_v21  ;;  %1151 = vst [vmem:[%s1928_s7 + $0x198] sm:$0xff] %v948_v24  ;;  %v950_v31 = vadd.f32 %v949_v29, %v1917_v22  ;;  %v1999_v21 = vrot.slane %v1908_v18, %v470_v20 }
 0x13f   : > { %v878_v32 = vpop.f32.mrf.mxu0  ;;  %v951_v34 = vpop.f32.mrf.mxu1  ;;  %v2004_v22 = vrot.slane %v1908_v18, %v478_v27 }
 0x140   : > { %1156 = vst [vmem:[%s1928_s7 + $0x1c0] sm:$0xff] %v877_v28  ;;  %v879_v16 = vadd.f32 %v878_v32, %v1920_v23  ;;  %1158 = vst [vmem:[%s1928_s7 + $0x1d0] sm:$0xff] %v950_v31  ;;  %v952_v35 = vadd.f32 %v951_v34, %v1923_v25 }
 0x141   : > { %v988_v36 = vpop.f32.mrf.mxu0  ;;  %v1061_v38 = vpop.f32.mrf.mxu1 }
 0x142   : > { %1157 = vst [vmem:[%s1928_s7 + $0x1c8] sm:$0xff] %v879_v16  ;;  %v989_v37 = vadd.f32 %v988_v36, %v1989_v30  ;;  %1159 = vst [vmem:[%s1928_s7 + $0x1d8] sm:$0xff] %v952_v35  ;;  %v1062_v23 = vadd.f32 %v1061_v38, %v1994_v33 }
 0x143   : > { %v990_v39 = vpop.f32.mrf.mxu0  ;;  %v1063_v41 = vpop.f32.mrf.mxu1 }
 0x144   : > { %1104 = vst [vmem:[%s1928_s7 + $0x20] sm:$0xff] %v989_v37  ;;  %v991_v40 = vadd.f32 %v990_v39, %v1999_v21  ;;  %1106 = vst [vmem:[%s1928_s7 + $0x30] sm:$0xff] %v1062_v23  ;;  %v1064_v18 = vadd.f32 %v1063_v41, %v2004_v22 }
 0x145   : > { %v992_v25 = vpop.f32.mrf.mxu0  ;;  %v1065_v43 = vpop.f32.mrf.mxu1 }
 0x146   : > { %1105 = vst [vmem:[%s1928_s7 + $0x28] sm:$0xff] %v991_v40  ;;  %v993_v42 = vadd.f32 %v992_v25, %v1989_v30  ;;  %1107 = vst [vmem:[%s1928_s7 + $0x38] sm:$0xff] %v1064_v18  ;;  %v1066_v44 = vadd.f32 %v1065_v43, %v1994_v33  ;;  %v1205_v25 = vld [vmem:[%s1928_s7 + $0x40] sm:$0xff] (%p1632_p6)  ;;  %v1209_v43 = vld [vmem:[%s1928_s7 + $0x50] sm:$0xff] (%p1632_p6) }
 0x147   : > { %v994_v45 = vpop.f32.mrf.mxu0  ;;  %v1067_v47 = vpop.f32.mrf.mxu1  ;;  %1206 = vst [vmem:[%s2081_s10 + $0x80] sm:$0xff] (%p1632_p6), %v1205_v25  ;;  %1210 = vst [vmem:[%s2081_s10 + $0x90] sm:$0xff] (%p1632_p6), %v1209_v43 }
 0x148   : > { %1112 = vst [vmem:[%s1928_s7 + $0x60] sm:$0xff] %v993_v42  ;;  %v995_v46 = vadd.f32 %v994_v45, %v1999_v21  ;;  %1114 = vst [vmem:[%s1928_s7 + $0x70] sm:$0xff] %v1066_v44  ;;  %v1068_v48 = vadd.f32 %v1067_v47, %v2004_v22  ;;  %v1207_v42 = vld [vmem:[%s1928_s7 + $0x48] sm:$0xff] (%p1632_p6)  ;;  %v1211_v44 = vld [vmem:[%s1928_s7 + $0x58] sm:$0xff] (%p1632_p6) }
 0x149   : > { %v998_v49 = vpop.f32.mrf.mxu0  ;;  %v1071_v51 = vpop.f32.mrf.mxu1  ;;  %1208 = vst [vmem:[%s2081_s10 + $0x88] sm:$0xff] (%p1632_p6), %v1207_v42  ;;  %1212 = vst [vmem:[%s2081_s10 + $0x98] sm:$0xff] (%p1632_p6), %v1211_v44 }
 0x14a   : > { %1113 = vst [vmem:[%s1928_s7 + $0x68] sm:$0xff] %v995_v46  ;;  %v999_v50 = vadd.f32 %v998_v49, %v1989_v30  ;;  %1115 = vst [vmem:[%s1928_s7 + $0x78] sm:$0xff] %v1068_v48  ;;  %v1072_v52 = vadd.f32 %v1071_v51, %v1994_v33  ;;  %v1221_v49 = vld [vmem:[%s1928_s7 + $0x80] sm:$0xff] (%p1632_p6)  ;;  %v1225_v51 = vld [vmem:[%s1928_s7 + $0x90] sm:$0xff] (%p1632_p6) }
 0x14b   : > { %v1000_v53 = vpop.f32.mrf.mxu0  ;;  %v1073_v55 = vpop.f32.mrf.mxu1  ;;  %v1197_v39 = vld [vmem:[%s1928_s7 + $0x20] sm:$0xff] (%p1632_p6)  ;;  %v1201_v41 = vld [vmem:[%s1928_s7 + $0x30] sm:$0xff] (%p1632_p6)  ;;  %1222 = vst [vmem:[%s2081_s10 + $0x100] sm:$0xff] (%p1632_p6), %v1221_v49  ;;  %1226 = vst [vmem:[%s2081_s10 + $0x110] sm:$0xff] (%p1632_p6), %v1225_v51 }
 0x14c   : > { %1120 = vst [vmem:[%s1928_s7 + $0xa0] sm:$0xff] %v999_v50  ;;  %v1001_v54 = vadd.f32 %v1000_v53, %v1999_v21  ;;  %1122 = vst [vmem:[%s1928_s7 + $0xb0] sm:$0xff] %v1072_v52  ;;  %v1074_v56 = vadd.f32 %v1073_v55, %v2004_v22  ;;  %v1223_v50 = vld [vmem:[%s1928_s7 + $0x88] sm:$0xff] (%p1632_p6)  ;;  %v1227_v52 = vld [vmem:[%s1928_s7 + $0x98] sm:$0xff] (%p1632_p6) }
 0x14d   : > { %v1002_v57 = vpop.f32.mrf.mxu0  ;;  %v1075_v59 = vpop.f32.mrf.mxu1  ;;  %v1199_v40 = vld [vmem:[%s1928_s7 + $0x28] sm:$0xff] (%p1632_p6)  ;;  %1198 = vst [vmem:[%s2081_s10 + $0x20] sm:$0xff] (%p1632_p6), %v1197_v39  ;;  %v1203_v18 = vld [vmem:[%s1928_s7 + $0x38] sm:$0xff] (%p1632_p6)  ;;  %1202 = vst [vmem:[%s2081_s10 + $0x30] sm:$0xff] (%p1632_p6), %v1201_v41 }
 0x14e   : > { %1121 = vst [vmem:[%s1928_s7 + $0xa8] sm:$0xff] %v1001_v54  ;;  %v1003_v58 = vadd.f32 %v1002_v57, %v1989_v30  ;;  %1123 = vst [vmem:[%s1928_s7 + $0xb8] sm:$0xff] %v1074_v56  ;;  %v1076_v60 = vadd.f32 %v1075_v59, %v1994_v33  ;;  %v1237_v57 = vld [vmem:[%s1928_s7 + $0xc0] sm:$0xff] (%p1632_p6)  ;;  %v1241_v59 = vld [vmem:[%s1928_s7 + $0xd0] sm:$0xff] (%p1632_p6) }
 0x14f   : > { %v1004_v61 = vpop.f32.mrf.mxu0  ;;  %v1077_v63 = vpop.f32.mrf.mxu1  ;;  %1200 = vst [vmem:[%s2081_s10 + $0x28] sm:$0xff] (%p1632_p6), %v1199_v40  ;;  %1204 = vst [vmem:[%s2081_s10 + $0x38] sm:$0xff] (%p1632_p6), %v1203_v18  ;;  %v1213_v45 = vld [vmem:[%s1928_s7 + $0x60] sm:$0xff] (%p1632_p6)  ;;  %v1217_v47 = vld [vmem:[%s1928_s7 + $0x70] sm:$0xff] (%p1632_p6) }
 0x150   : > { %1128 = vst [vmem:[%s1928_s7 + $0xe0] sm:$0xff] %v1003_v58  ;;  %v1005_v62 = vadd.f32 %v1004_v61, %v1999_v21  ;;  %1130 = vst [vmem:[%s1928_s7 + $0xf0] sm:$0xff] %v1076_v60  ;;  %v1078_v1 = vadd.f32 %v1077_v63, %v2004_v22  ;;  %v1239_v58 = vld [vmem:[%s1928_s7 + $0xc8] sm:$0xff] (%p1632_p6)  ;;  %v1243_v60 = vld [vmem:[%s1928_s7 + $0xd8] sm:$0xff] (%p1632_p6) }
 0x151   : > { %v1008_v2 = vpop.f32.mrf.mxu0  ;;  %v1081_v4 = vpop.f32.mrf.mxu1  ;;  %v1215_v46 = vld [vmem:[%s1928_s7 + $0x68] sm:$0xff] (%p1632_p6)  ;;  %1214 = vst [vmem:[%s2081_s10 + $0xa0] sm:$0xff] (%p1632_p6), %v1213_v45  ;;  %1218 = vst [vmem:[%s2081_s10 + $0xb0] sm:$0xff] (%p1632_p6), %v1217_v47  ;;  %v1219_v48 = vld [vmem:[%s1928_s7 + $0x78] sm:$0xff] (%p1632_p6) }
 0x152   : > { %1129 = vst [vmem:[%s1928_s7 + $0xe8] sm:$0xff] %v1005_v62  ;;  %v1009_v3 = vadd.f32 %v1008_v2, %v1989_v30  ;;  %1131 = vst [vmem:[%s1928_s7 + $0xf8] sm:$0xff] %v1078_v1  ;;  %v1082_v5 = vadd.f32 %v1081_v4, %v1994_v33  ;;  %v1253_v2 = vld [vmem:[%s1928_s7 + $0x100] sm:$0xff] (%p1632_p6)  ;;  %v1257_v4 = vld [vmem:[%s1928_s7 + $0x110] sm:$0xff] (%p1632_p6) }
 0x153   : > { %v1010_v6 = vpop.f32.mrf.mxu0  ;;  %v1083_v8 = vpop.f32.mrf.mxu1  ;;  %1216 = vst [vmem:[%s2081_s10 + $0xa8] sm:$0xff] (%p1632_p6), %v1215_v46  ;;  %1220 = vst [vmem:[%s2081_s10 + $0xb8] sm:$0xff] (%p1632_p6), %v1219_v48  ;;  %v1229_v53 = vld [vmem:[%s1928_s7 + $0xa0] sm:$0xff] (%p1632_p6)  ;;  %v1233_v55 = vld [vmem:[%s1928_s7 + $0xb0] sm:$0xff] (%p1632_p6) }
 0x154   : > { %1136 = vst [vmem:[%s1928_s7 + $0x120] sm:$0xff] %v1009_v3  ;;  %v1011_v7 = vadd.f32 %v1010_v6, %v1999_v21  ;;  %1138 = vst [vmem:[%s1928_s7 + $0x130] sm:$0xff] %v1082_v5  ;;  %v1084_v9 = vadd.f32 %v1083_v8, %v2004_v22  ;;  %v1255_v3 = vld [vmem:[%s1928_s7 + $0x108] sm:$0xff] (%p1632_p6)  ;;  %v1259_v5 = vld [vmem:[%s1928_s7 + $0x118] sm:$0xff] (%p1632_p6) }
 0x155   : > { %v1012_v10 = vpop.f32.mrf.mxu0  ;;  %v1085_v13 = vpop.f32.mrf.mxu1  ;;  %1224 = vst [vmem:[%s2081_s10 + $0x108] sm:$0xff] (%p1632_p6), %v1223_v50  ;;  %1228 = vst [vmem:[%s2081_s10 + $0x118] sm:$0xff] (%p1632_p6), %v1227_v52  ;;  %v1231_v54 = vld [vmem:[%s1928_s7 + $0xa8] sm:$0xff] (%p1632_p6)  ;;  %v1235_v56 = vld [vmem:[%s1928_s7 + $0xb8] sm:$0xff] (%p1632_p6) }
 0x156   : > { %1137 = vst [vmem:[%s1928_s7 + $0x128] sm:$0xff] %v1011_v7  ;;  %v1013_v11 = vadd.f32 %v1012_v10, %v1989_v30  ;;  %1139 = vst [vmem:[%s1928_s7 + $0x138] sm:$0xff] %v1084_v9  ;;  %v1086_v14 = vadd.f32 %v1085_v13, %v1994_v33  ;;  %v1269_v10 = vld [vmem:[%s1928_s7 + $0x140] sm:$0xff] (%p1632_p6)  ;;  %v1273_v13 = vld [vmem:[%s1928_s7 + $0x150] sm:$0xff] (%p1632_p6) }
 0x157   : > { %v1014_v15 = vpop.f32.mrf.mxu0  ;;  %v1087_v17 = vpop.f32.mrf.mxu1  ;;  %1230 = vst [vmem:[%s2081_s10 + $0x120] sm:$0xff] (%p1632_p6), %v1229_v53  ;;  %1232 = vst [vmem:[%s2081_s10 + $0x128] sm:$0xff] (%p1632_p6), %v1231_v54  ;;  %v1245_v61 = vld [vmem:[%s1928_s7 + $0xe0] sm:$0xff] (%p1632_p6)  ;;  %v1249_v63 = vld [vmem:[%s1928_s7 + $0xf0] sm:$0xff] (%p1632_p6) }
 0x158   : > { %1144 = vst [vmem:[%s1928_s7 + $0x160] sm:$0xff] %v1013_v11  ;;  %v1015_v12 = vadd.f32 %v1014_v15, %v1999_v21  ;;  %1146 = vst [vmem:[%s1928_s7 + $0x170] sm:$0xff] %v1086_v14  ;;  %v1088_v19 = vadd.f32 %v1087_v17, %v2004_v22  ;;  %v1271_v11 = vld [vmem:[%s1928_s7 + $0x148] sm:$0xff] (%p1632_p6)  ;;  %v1275_v14 = vld [vmem:[%s1928_s7 + $0x158] sm:$0xff] (%p1632_p6) }
 0x159   : > { %v1018_v0 = vpop.f32.mrf.mxu0  ;;  %v1091_v24 = vpop.f32.mrf.mxu1  ;;  %1234 = vst [vmem:[%s2081_s10 + $0x130] sm:$0xff] (%p1632_p6), %v1233_v55  ;;  %1236 = vst [vmem:[%s2081_s10 + $0x138] sm:$0xff] (%p1632_p6), %v1235_v56  ;;  %v1247_v62 = vld [vmem:[%s1928_s7 + $0xe8] sm:$0xff] (%p1632_p6)  ;;  %v1251_v1 = vld [vmem:[%s1928_s7 + $0xf8] sm:$0xff] (%p1632_p6) }
 0x15a   : > { %1145 = vst [vmem:[%s1928_s7 + $0x168] sm:$0xff] %v1015_v12  ;;  %v1019_v20 = vadd.f32 %v1018_v0, %v1989_v30  ;;  %1147 = vst [vmem:[%s1928_s7 + $0x178] sm:$0xff] %v1088_v19  ;;  %v1092_v26 = vadd.f32 %v1091_v24, %v1994_v33  ;;  %v1285_v0 = vld [vmem:[%s1928_s7 + $0x180] sm:$0xff] (%p1632_p6)  ;;  %v1289_v24 = vld [vmem:[%s1928_s7 + $0x190] sm:$0xff] (%p1632_p6) }
 0x15b   : > { %v1020_v27 = vpop.f32.mrf.mxu0  ;;  %v1093_v29 = vpop.f32.mrf.mxu1  ;;  %1238 = vst [vmem:[%s2081_s10 + $0x180] sm:$0xff] (%p1632_p6), %v1237_v57  ;;  %1240 = vst [vmem:[%s2081_s10 + $0x188] sm:$0xff] (%p1632_p6), %v1239_v58  ;;  %v1261_v6 = vld [vmem:[%s1928_s7 + $0x120] sm:$0xff] (%p1632_p6)  ;;  %v1265_v8 = vld [vmem:[%s1928_s7 + $0x130] sm:$0xff] (%p1632_p6) }
 0x15c   : > { %1152 = vst [vmem:[%s1928_s7 + $0x1a0] sm:$0xff] %v1019_v20  ;;  %v1021_v28 = vadd.f32 %v1020_v27, %v1999_v21  ;;  %1154 = vst [vmem:[%s1928_s7 + $0x1b0] sm:$0xff] %v1092_v26  ;;  %v1094_v31 = vadd.f32 %v1093_v29, %v2004_v22  ;;  %v1287_v20 = vld [vmem:[%s1928_s7 + $0x188] sm:$0xff] (%p1632_p6)  ;;  %v1291_v26 = vld [vmem:[%s1928_s7 + $0x198] sm:$0xff] (%p1632_p6) }
 0x15d   : > { %v1022_v32 = vpop.f32.mrf.mxu0  ;;  %v1095_v34 = vpop.f32.mrf.mxu1  ;;  %1242 = vst [vmem:[%s2081_s10 + $0x190] sm:$0xff] (%p1632_p6), %v1241_v59  ;;  %1244 = vst [vmem:[%s2081_s10 + $0x198] sm:$0xff] (%p1632_p6), %v1243_v60  ;;  %v1263_v7 = vld [vmem:[%s1928_s7 + $0x128] sm:$0xff] (%p1632_p6)  ;;  %v1267_v9 = vld [vmem:[%s1928_s7 + $0x138] sm:$0xff] (%p1632_p6) }
 0x15e   : > { %1153 = vst [vmem:[%s1928_s7 + $0x1a8] sm:$0xff] %v1021_v28  ;;  %v1023_v16 = vadd.f32 %v1022_v32, %v1989_v30  ;;  %1155 = vst [vmem:[%s1928_s7 + $0x1b8] sm:$0xff] %v1094_v31  ;;  %v1096_v35 = vadd.f32 %v1095_v34, %v1994_v33  ;;  %1170 = sbr.rel (!%p1632_p6) target bundleno = 373 (0x175), region = 59  ;;  %v1189_v30 = vld [vmem:[%s1928_s7] sm:$0xff] (%p1632_p6)  ;;  %v1191_v33 = vld [vmem:[%s1928_s7 + $0x8] sm:$0xff] (%p1632_p6) }
 0x15f   : > { %v1024_v36 = vpop.f32.mrf.mxu0  ;;  %v1097_v38 = vpop.f32.mrf.mxu1  ;;  %1190 = vst [vmem:[%s2081_s10] sm:$0xff] (%p1632_p6), %v1189_v30  ;;  %1192 = vst [vmem:[%s2081_s10 + $0x8] sm:$0xff] (%p1632_p6), %v1191_v33  ;;  %v1277_v15 = vld [vmem:[%s1928_s7 + $0x160] sm:$0xff] (%p1632_p6)  ;;  %v1281_v17 = vld [vmem:[%s1928_s7 + $0x170] sm:$0xff] (%p1632_p6) }
 0x160   : > { %1160 = vst [vmem:[%s1928_s7 + $0x1e0] sm:$0xff] %v1023_v16  ;;  %v1025_v37 = vadd.f32 %v1024_v36, %v1999_v21  ;;  %1162 = vst [vmem:[%s1928_s7 + $0x1f0] sm:$0xff] %v1096_v35  ;;  %v1098_v23 = vadd.f32 %v1097_v38, %v2004_v22  ;;  %v1193_v21 = vld [vmem:[%s1928_s7 + $0x10] sm:$0xff] (%p1632_p6)  ;;  %v1195_v22 = vld [vmem:[%s1928_s7 + $0x18] sm:$0xff] (%p1632_p6) }
 0x161   : > { %1194 = vst [vmem:[%s2081_s10 + $0x10] sm:$0xff] (%p1632_p6), %v1193_v21  ;;  %1196 = vst [vmem:[%s2081_s10 + $0x18] sm:$0xff] (%p1632_p6), %v1195_v22  ;;  %v1279_v12 = vld [vmem:[%s1928_s7 + $0x168] sm:$0xff] (%p1632_p6)  ;;  %v1283_v19 = vld [vmem:[%s1928_s7 + $0x178] sm:$0xff] (%p1632_p6) }
 0x162   : > { %1161 = vst [vmem:[%s1928_s7 + $0x1e8] sm:$0xff] %v1025_v37  ;;  %1163 = vst [vmem:[%s1928_s7 + $0x1f8] sm:$0xff] %v1098_v23  ;;  %v1301_v32 = vld [vmem:[%s1928_s7 + $0x1c0] sm:$0xff] (%p1632_p6)  ;;  %v1303_v16 = vld [vmem:[%s1928_s7 + $0x1c8] sm:$0xff] (%p1632_p6) }
 0x163   : > { %1246 = vst [vmem:[%s2081_s10 + $0x1a0] sm:$0xff] %v1245_v61  ;;  %1248 = vst [vmem:[%s2081_s10 + $0x1a8] sm:$0xff] %v1247_v62  ;;  %v1293_v27 = vld [vmem:[%s1928_s7 + $0x1a0] sm:$0xff]  ;;  %v1297_v29 = vld [vmem:[%s1928_s7 + $0x1b0] sm:$0xff] }
 0x164   : > { %1250 = vst [vmem:[%s2081_s10 + $0x1b0] sm:$0xff] %v1249_v63  ;;  %1252 = vst [vmem:[%s2081_s10 + $0x1b8] sm:$0xff] %v1251_v1  ;;  %v1305_v34 = vld [vmem:[%s1928_s7 + $0x1d0] sm:$0xff]  ;;  %v1307_v35 = vld [vmem:[%s1928_s7 + $0x1d8] sm:$0xff] }
 0x165   : > { %1254 = vst [vmem:[%s2081_s10 + $0x200] sm:$0xff] %v1253_v2  ;;  %1256 = vst [vmem:[%s2081_s10 + $0x208] sm:$0xff] %v1255_v3  ;;  %v1295_v28 = vld [vmem:[%s1928_s7 + $0x1a8] sm:$0xff]  ;;  %v1299_v31 = vld [vmem:[%s1928_s7 + $0x1b8] sm:$0xff] }
 0x166   : > { %1258 = vst [vmem:[%s2081_s10 + $0x210] sm:$0xff] %v1257_v4  ;;  %1260 = vst [vmem:[%s2081_s10 + $0x218] sm:$0xff] %v1259_v5 }
 0x167   : > { %1262 = vst [vmem:[%s2081_s10 + $0x220] sm:$0xff] %v1261_v6  ;;  %1264 = vst [vmem:[%s2081_s10 + $0x228] sm:$0xff] %v1263_v7  ;;  %v1309_v36 = vld [vmem:[%s1928_s7 + $0x1e0] sm:$0xff]  ;;  %v1313_v38 = vld [vmem:[%s1928_s7 + $0x1f0] sm:$0xff] }
 0x168   : > { %1266 = vst [vmem:[%s2081_s10 + $0x230] sm:$0xff] %v1265_v8  ;;  %1268 = vst [vmem:[%s2081_s10 + $0x238] sm:$0xff] %v1267_v9 }
 0x169   : > { %1270 = vst [vmem:[%s2081_s10 + $0x280] sm:$0xff] %v1269_v10  ;;  %1272 = vst [vmem:[%s2081_s10 + $0x288] sm:$0xff] %v1271_v11  ;;  %v1311_v37 = vld [vmem:[%s1928_s7 + $0x1e8] sm:$0xff]  ;;  %v1315_v23 = vld [vmem:[%s1928_s7 + $0x1f8] sm:$0xff] }
 0x16a   : > { %1274 = vst [vmem:[%s2081_s10 + $0x290] sm:$0xff] %v1273_v13  ;;  %1276 = vst [vmem:[%s2081_s10 + $0x298] sm:$0xff] %v1275_v14 }
 0x16b   : > { %1278 = vst [vmem:[%s2081_s10 + $0x2a0] sm:$0xff] %v1277_v15  ;;  %1280 = vst [vmem:[%s2081_s10 + $0x2a8] sm:$0xff] %v1279_v12 }
 0x16c   : > { %1282 = vst [vmem:[%s2081_s10 + $0x2b0] sm:$0xff] %v1281_v17  ;;  %1284 = vst [vmem:[%s2081_s10 + $0x2b8] sm:$0xff] %v1283_v19 }
 0x16d   : > { %1286 = vst [vmem:[%s2081_s10 + $0x300] sm:$0xff] %v1285_v0  ;;  %1288 = vst [vmem:[%s2081_s10 + $0x308] sm:$0xff] %v1287_v20 }
 0x16e   : > { %1290 = vst [vmem:[%s2081_s10 + $0x310] sm:$0xff] %v1289_v24  ;;  %1292 = vst [vmem:[%s2081_s10 + $0x318] sm:$0xff] %v1291_v26 }
 0x16f   : > { %1294 = vst [vmem:[%s2081_s10 + $0x320] sm:$0xff] %v1293_v27  ;;  %1296 = vst [vmem:[%s2081_s10 + $0x328] sm:$0xff] %v1295_v28 }
 0x170   : > { %1298 = vst [vmem:[%s2081_s10 + $0x330] sm:$0xff] %v1297_v29  ;;  %1300 = vst [vmem:[%s2081_s10 + $0x338] sm:$0xff] %v1299_v31 }
 0x171   : > { %1302 = vst [vmem:[%s2081_s10 + $0x380] sm:$0xff] %v1301_v32  ;;  %1304 = vst [vmem:[%s2081_s10 + $0x388] sm:$0xff] %v1303_v16 }
 0x172   : > { %1306 = vst [vmem:[%s2081_s10 + $0x390] sm:$0xff] %v1305_v34  ;;  %1308 = vst [vmem:[%s2081_s10 + $0x398] sm:$0xff] %v1307_v35 }
 0x173   : > { %1310 = vst [vmem:[%s2081_s10 + $0x3a0] sm:$0xff] %v1309_v36  ;;  %1312 = vst [vmem:[%s2081_s10 + $0x3a8] sm:$0xff] %v1311_v37 }
 0x174   : > { %1314 = vst [vmem:[%s2081_s10 + $0x3b0] sm:$0xff] %v1313_v38  ;;  %1316 = vst [vmem:[%s2081_s10 + $0x3b8] sm:$0xff] %v1315_v23 }
 0x175 PF: > { %s13_s16 = sadd.s32 1, %s1574_s16   ;;  %s2228_s12 = smov %s1562_s13 }
 0x176   : > { %p10_p12 = scmp.ge.s32.totalorder %s13_s16, 4   ;;  %s2229_s13 = smov %s1637_s22 }
 0x177   : > { %s2230_s14 = smov %s1570_s15  ;;  %s2231_s15 = smov %s2233_s17 }
 0x178   :  { %12 = sbr.rel (!%p10_p12) target bundleno = 3 (0x3), region = 119 }

// kernel: vae_gauss_forward.9
= control target key start
LH: loop header
LB: loop body
LE: loop exit
PB: predicated region body
PF: predicated region fallthrough
CT: control target
= control target key end

     0   :  { %10 = vsyncpa [#allocation10], 0  ;;  %s4721_s0 = inlined_call_operand.vmem [shape: f32[8,8,2048], index: 0, kind: input, shape index: {}]   ;;  %s4722_s1 = inlined_call_operand.vmem [shape: bf16[256,1024], index: 1, kind: input, shape index: {}]   ;;  %s4723_s2 = inlined_call_operand.vmem [shape: bf16[256,1024], index: 2, kind: input, shape index: {}]   ;;  %s4724_s3 = inlined_call_operand.hbm [shape: f32[8,8,256], index: 3, kind: output, shape index: {0}]   ;;  %s4725_s4 = inlined_call_operand.hbm [shape: f32[8,8,256], index: 4, kind: output, shape index: {1}]  }
   0x1   :  { %12 = vsyncpa [#allocation10 + $0x1], 0 }
   0x2   :  { %13 = vsyncpa [#allocation12], 0 }
   0x3   :  { %15 = vsyncpa [#allocation12 + $0x1], 0  ;;  %s3777_s15 = smov 0   ;;  %s3779_s16 = smov 0  }
   0x4   :  { %s3781_s17 = smov 0   ;;  %s3783_s18 = smov 0  }
   0x5 LB: > { %s3798_s19 = sadd.s32 4294967295, %s3747_s18   ;;  %s2950_s20 = sadd.s32 4294967294, %s3747_s18   ;;  %s3747_s18 = sphi %s3783_s18, %s4731_s18   ;;  %s3743_s17 = sphi %s3781_s17, %s4730_s17   ;;  %s3739_s16 = sphi %s3779_s16, %s4729_s16   ;;  %s3735_s15 = sphi %s3777_s15, %s4728_s15  }
   0x6   : > { %s3802_s21 = sadd.s32 1, %s3747_s18   ;;  %s54_s22 = sadd.s32 1, %s3743_s17 }
   0x7   : > { %s51_s23 = ssub.s32 %s3747_s18, %s3802_s21  ;;  %p64_p0 = scmp.ne.s32.totalorder %s3743_s17, %s3739_s16 }
   0x8   : > { %p52_p1 = scmp.eq.s32.totalorder %s51_s23, 0  ;;  %p65_p2 = scmp.eq.s32.totalorder %s3798_s19, 7 }
   0x9   : > { %p70_p3 = scmp.ne.s32.totalorder %s3739_s16, %s3735_s15  ;;  %p71_p4 = scmp.eq.s32.totalorder %s2950_s20, 7 }
   0xa   : > { %s3813_s24 = scalar_select %p52_p1, %s3743_s17, %s54_s22  }
   0xb   : > { %p3815_p5 = por %p65_p2, %p64_p0  ;;  %p3819_p6 = por %p71_p4, %p70_p3 }
   0xc   : > { %p2953_p7 = scmp.ge.s32.totalorder %s3747_s18, 1  ;;  %p123_p8 = scmp.lt.s32.totalorder %s3747_s18, 9 }
   0xe   : > { %p124_p9 = pnand %p2953_p7, %p123_p8 }
   0xf   : > { %s3826_s27 = sand.u32 (!%p124_p9), 1, %s3739_s16   ;;  %p150_p10 = scmp.lt.s32.totalorder (!%p124_p9), %s3798_s19, 7 }
  0x10   : > { %127 = sbr.rel (%p124_p9) target bundleno = 669 (0x29d), region = 24  ;;  %s2954_s28 = sshll.u32 (!%p124_p9), %s3826_s27, 4 }
  0x11   : > { %s3836_s8 = scalar_lea.vmem (!%p124_p9), [#allocation9], %s2954_s28  ;;  %s3838_s9 = scalar_lea.vmem (!%p124_p9), [#allocation11], %s2954_s28 }
  0x12   : > { %p2958_p11 = scmp.ne.s32.totalorder (!%p124_p9), %s3798_s19, 0 }
  0x15   : > { %s151_s29 = scalar_select %p150_p10, %s3798_s19, 7 }
  0x16   : > { %158 = sbr.rel (%p2958_p11) target bundleno = 166 (0xa6), region = 28 }
  0x17   : > { %s3239_s30 = sshll.u32 %s151_s29, 7 }
  0x18   : > { %s3834_s7 = scalar_lea.vmem %s4721_s0, %s3239_s30 }
  0x1b   : > { %v192_v0 = vld [vmem:[%s4722_s1] sm:$0xff]  ;;  %v194_v1 = vld [vmem:[%s4722_s1 + $0x8] sm:$0xff]  ;;  %v196_v2 = vld [vmem:[%s4722_s1 + $0x10] sm:$0xff] }
  0x1c   : > { %193 = vst [vmem:[#allocation6 + $0x30] sm:$0xff] %v192_v0  ;;  %195 = vst [vmem:[#allocation6 + $0x3f0] sm:$0xff] %v194_v1  ;;  %v198_v3 = vld [vmem:[%s4722_s1 + $0x18] sm:$0xff]  ;;  %v200_v4 = vld [vmem:[%s4722_s1 + $0x20] sm:$0xff] }
  0x1d   : > { %197 = vst [vmem:[#allocation6 + $0x350] sm:$0xff] %v196_v2  ;;  %v202_v5 = vld [vmem:[%s4722_s1 + $0x28] sm:$0xff]  ;;  %199 = vst [vmem:[#allocation6 + $0x318] sm:$0xff] %v198_v3  ;;  %v204_v6 = vld [vmem:[%s4722_s1 + $0x30] sm:$0xff] }
  0x1e   : > { %201 = vst [vmem:[#allocation6] sm:$0xff] %v200_v4  ;;  %203 = vst [vmem:[#allocation6 + $0x368] sm:$0xff] %v202_v5  ;;  %v206_v7 = vld [vmem:[%s4722_s1 + $0x38] sm:$0xff]  ;;  %v208_v8 = vld [vmem:[%s4722_s1 + $0x40] sm:$0xff] }
  0x1f   : > { %205 = vst [vmem:[#allocation6 + $0xf8] sm:$0xff] %v204_v6  ;;  %207 = vst [vmem:[#allocation6 + $0x100] sm:$0xff] %v206_v7  ;;  %v210_v9 = vld [vmem:[%s4722_s1 + $0x48] sm:$0xff]  ;;  %v212_v10 = vld [vmem:[%s4722_s1 + $0x50] sm:$0xff] }
  0x20   : > { %209 = vst [vmem:[#allocation6 + $0x80] sm:$0xff] %v208_v8  ;;  %v214_v11 = vld [vmem:[%s4722_s1 + $0x58] sm:$0xff]  ;;  %211 = vst [vmem:[#allocation6 + $0x308] sm:$0xff] %v210_v9  ;;  %v216_v12 = vld [vmem:[%s4722_s1 + $0x60] sm:$0xff] }
  0x21   : > { %213 = vst [vmem:[#allocation6 + $0x138] sm:$0xff] %v212_v10  ;;  %215 = vst [vmem:[#allocation6 + $0xf0] sm:$0xff] %v214_v11  ;;  %v218_v13 = vld [vmem:[%s4722_s1 + $0x68] sm:$0xff]  ;;  %v220_v14 = vld [vmem:[%s4722_s1 + $0x70] sm:$0xff] }
  0x22   : > { %217 = vst [vmem:[#allocation6 + $0x48] sm:$0xff] %v216_v12  ;;  %219 = vst [vmem:[#allocation6 + $0x2c8] sm:$0xff] %v218_v13  ;;  %v222_v15 = vld [vmem:[%s4722_s1 + $0x78] sm:$0xff]  ;;  %v224_v16 = vld [vmem:[%s4722_s1 + $0x80] sm:$0xff] }
  0x23   : > { %221 = vst [vmem:[#allocation6 + $0x370] sm:$0xff] %v220_v14  ;;  %v226_v17 = vld [vmem:[%s4722_s1 + $0x88] sm:$0xff]  ;;  %223 = vst [vmem:[#allocation6 + $0x320] sm:$0xff] %v222_v15  ;;  %v228_v18 = vld [vmem:[%s4722_s1 + $0x90] sm:$0xff] }
  0x24   : > { %225 = vst [vmem:[#allocation6 + $0x328] sm:$0xff] %v224_v16  ;;  %227 = vst [vmem:[#allocation6 + $0x68] sm:$0xff] %v226_v17  ;;  %v230_v19 = vld [vmem:[%s4722_s1 + $0x98] sm:$0xff]  ;;  %v232_v20 = vld [vmem:[%s4722_s1 + $0xa0] sm:$0xff] }
  0x25   : > { %229 = vst [vmem:[#allocation6 + $0x190] sm:$0xff] %v228_v18  ;;  %231 = vst [vmem:[#allocation6 + $0x1a0] sm:$0xff] %v230_v19  ;;  %v234_v21 = vld [vmem:[%s4722_s1 + $0xa8] sm:$0xff]  ;;  %v236_v22 = vld [vmem:[%s4722_s1 + $0xb0] sm:$0xff] }
  0x26   : > { %233 = vst [vmem:[#allocation6 + $0x150] sm:$0xff] %v232_v20  ;;  %v238_v23 = vld [vmem:[%s4722_s1 + $0xb8] sm:$0xff]  ;;  %235 = vst [vmem:[#allocation6 + $0x3d0] sm:$0xff] %v234_v21  ;;  %v240_v24 = vld [vmem:[%s4722_s1 + $0xc0] sm:$0xff] }
  0x27   : > { %237 = vst [vmem:[#allocation6 + $0x2e0] sm:$0xff] %v236_v22  ;;  %239 = vst [vmem:[#allocation6 + $0x278] sm:$0xff] %v238_v23  ;;  %v242_v25 = vld [vmem:[%s4722_s1 + $0xc8] sm:$0xff]  ;;  %v244_v26 = vld [vmem:[%s4722_s1 + $0xd0] sm:$0xff] }
  0x28   : > { %241 = vst [vmem:[#allocation6 + $0x10] sm:$0xff] %v240_v24  ;;  %243 = vst [vmem:[#allocation6 + $0x120] sm:$0xff] %v242_v25  ;;  %v246_v27 = vld [vmem:[%s4722_s1 + $0xd8] sm:$0xff]  ;;  %v248_v28 = vld [vmem:[%s4722_s1 + $0xe0] sm:$0xff] }
  0x29   : > { %245 = vst [vmem:[#allocation6 + $0xa8] sm:$0xff] %v244_v26  ;;  %v250_v29 = vld [vmem:[%s4722_s1 + $0xe8] sm:$0xff]  ;;  %247 = vst [vmem:[#allocation6 + $0x1a8] sm:$0xff] %v246_v27  ;;  %v252_v30 = vld [vmem:[%s4722_s1 + $0xf0] sm:$0xff] }
  0x2a   : > { %249 = vst [vmem:[#allocation6 + $0x268] sm:$0xff] %v248_v28  ;;  %251 = vst [vmem:[#allocation6 + $0xe8] sm:$0xff] %v250_v29  ;;  %v254_v31 = vld [vmem:[%s4722_s1 + $0xf8] sm:$0xff]  ;;  %v256_v32 = vld [vmem:[%s4722_s1 + $0x100] sm:$0xff] }
  0x2b   : > { %253 = vst [vmem:[#allocation6 + $0x3a8] sm:$0xff] %v252_v30  ;;  %255 = vst [vmem:[#allocation6 + $0x140] sm:$0xff] %v254_v31  ;;  %v258_v33 = vld [vmem:[%s4722_s1 + $0x108] sm:$0xff]  ;;  %v260_v34 = vld [vmem:[%s4722_s1 + $0x110] sm:$0xff] }
  0x2c   : > { %257 = vst [vmem:[#allocation6 + $0x3c8] sm:$0xff] %v256_v32  ;;  %v262_v35 = vld [vmem:[%s4722_s1 + $0x118] sm:$0xff]  ;;  %259 = vst [vmem:[#allocation6 + $0x200] sm:$0xff] %v258_v33  ;;  %v264_v36 = vld [vmem:[%s4722_s1 + $0x120] sm:$0xff] }
  0x2d   : > { %261 = vst [vmem:[#allocation6 + $0x3e0] sm:$0xff] %v260_v34  ;;  %263 = vst [vmem:[#allocation6 + $0x398] sm:$0xff] %v262_v35  ;;  %v266_v37 = vld [vmem:[%s4722_s1 + $0x128] sm:$0xff]  ;;  %v268_v38 = vld [vmem:[%s4722_s1 + $0x130] sm:$0xff] }
  0x2e   : > { %265 = vst [vmem:[#allocation6 + $0x110] sm:$0xff] %v264_v36  ;;  %267 = vst [vmem:[#allocation6 + $0x288] sm:$0xff] %v266_v37  ;;  %v270_v39 = vld [vmem:[%s4722_s1 + $0x138] sm:$0xff]  ;;  %v272_v40 = vld [vmem:[%s4722_s1 + $0x140] sm:$0xff] }
  0x2f   : > { %269 = vst [vmem:[#allocation6 + $0x3d8] sm:$0xff] %v268_v38  ;;  %v274_v41 = vld [vmem:[%s4722_s1 + $0x148] sm:$0xff]  ;;  %271 = vst [vmem:[#allocation6 + $0x88] sm:$0xff] %v270_v39  ;;  %v276_v42 = vld [vmem:[%s4722_s1 + $0x150] sm:$0xff] }
  0x30   : > { %273 = vst [vmem:[#allocation6 + $0x2a8] sm:$0xff] %v272_v40  ;;  %275 = vst [vmem:[#allocation6 + $0x98] sm:$0xff] %v274_v41  ;;  %v278_v43 = vld [vmem:[%s4722_s1 + $0x158] sm:$0xff]  ;;  %v280_v44 = vld [vmem:[%s4722_s1 + $0x160] sm:$0xff] }
  0x31   : > { %277 = vst [vmem:[#allocation6 + $0x1c8] sm:$0xff] %v276_v42  ;;  %279 = vst [vmem:[#allocation6 + $0x1d8] sm:$0xff] %v278_v43  ;;  %v282_v45 = vld [vmem:[%s4722_s1 + $0x168] sm:$0xff]  ;;  %v284_v46 = vld [vmem:[%s4722_s1 + $0x170] sm:$0xff] }
  0x32   : > { %281 = vst [vmem:[#allocation6 + $0xc0] sm:$0xff] %v280_v44  ;;  %v286_v47 = vld [vmem:[%s4722_s1 + $0x178] sm:$0xff]  ;;  %283 = vst [vmem:[#allocation6 + $0x218] sm:$0xff] %v282_v45  ;;  %v288_v48 = vld [vmem:[%s4722_s1 + $0x180] sm:$0xff] }
  0x33   : > { %285 = vst [vmem:[#allocation6 + $0x228] sm:$0xff] %v284_v46  ;;  %287 = vst [vmem:[#allocation6 + $0x78] sm:$0xff] %v286_v47  ;;  %v290_v49 = vld [vmem:[%s4722_s1 + $0x188] sm:$0xff]  ;;  %v292_v50 = vld [vmem:[%s4722_s1 + $0x190] sm:$0xff] }
  0x34   : > { %289 = vst [vmem:[#allocation6 + $0x3f8] sm:$0xff] %v288_v48  ;;  %291 = vst [vmem:[#allocation6 + $0x390] sm:$0xff] %v290_v49  ;;  %v294_v51 = vld [vmem:[%s4722_s1 + $0x198] sm:$0xff]  ;;  %v296_v52 = vld [vmem:[%s4722_s1 + $0x1a0] sm:$0xff] }
  0x35   : > { %293 = vst [vmem:[#allocation6 + $0x1f8] sm:$0xff] %v292_v50  ;;  %v298_v53 = vld [vmem:[%s4722_s1 + $0x1a8] sm:$0xff]  ;;  %295 = vst [vmem:[#allocation6 + $0x280] sm:$0xff] %v294_v51  ;;  %v300_v54 = vld [vmem:[%s4722_s1 + $0x1b0] sm:$0xff] }
  0x36   : > { %297 = vst [vmem:[#allocation6 + $0x378] sm:$0xff] %v296_v52  ;;  %299 = vst [vmem:[#allocation6 + $0xb0] sm:$0xff] %v298_v53  ;;  %v302_v55 = vld [vmem:[%s4722_s1 + $0x1b8] sm:$0xff]  ;;  %v304_v56 = vld [vmem:[%s4722_s1 + $0x1c0] sm:$0xff] }
  0x37   : > { %301 = vst [vmem:[#allocation6 + $0x348] sm:$0xff] %v300_v54  ;;  %303 = vst [vmem:[#allocation6 + $0x258] sm:$0xff] %v302_v55  ;;  %v306_v57 = vld [vmem:[%s4722_s1 + $0x1c8] sm:$0xff]  ;;  %v308_v58 = vld [vmem:[%s4722_s1 + $0x1d0] sm:$0xff] }
  0x38   : > { %305 = vst [vmem:[#allocation6 + $0x340] sm:$0xff] %v304_v56  ;;  %v310_v59 = vld [vmem:[%s4722_s1 + $0x1d8] sm:$0xff]  ;;  %307 = vst [vmem:[#allocation6 + $0x230] sm:$0xff] %v306_v57  ;;  %v312_v60 = vld [vmem:[%s4722_s1 + $0x1e0] sm:$0xff] }
  0x39   : > { %309 = vst [vmem:[#allocation6 + $0xa0] sm:$0xff] %v308_v58  ;;  %311 = vst [vmem:[#allocation6 + $0x178] sm:$0xff] %v310_v59  ;;  %v314_v61 = vld [vmem:[%s4722_s1 + $0x1e8] sm:$0xff]  ;;  %v316_v62 = vld [vmem:[%s4722_s1 + $0x1f0] sm:$0xff] }
  0x3a   : > { %313 = vst [vmem:[#allocation6 + $0x290] sm:$0xff] %v312_v60  ;;  %315 = vst [vmem:[#allocation6 + $0x298] sm:$0xff] %v314_v61  ;;  %v318_v63 = vld [vmem:[%s4722_s1 + $0x1f8] sm:$0xff]  ;;  %v320_v0 = vld [vmem:[%s4722_s1 + $0x200] sm:$0xff] }
  0x3b   : > { %317 = vst [vmem:[#allocation6 + $0x2f8] sm:$0xff] %v316_v62  ;;  %v322_v1 = vld [vmem:[%s4722_s1 + $0x208] sm:$0xff]  ;;  %319 = vst [vmem:[#allocation6 + $0x2d0] sm:$0xff] %v318_v63  ;;  %v324_v2 = vld [vmem:[%s4722_s1 + $0x210] sm:$0xff] }
  0x3c   : > { %321 = vst [vmem:[#allocation6 + $0x38] sm:$0xff] %v320_v0  ;;  %323 = vst [vmem:[#allocation6 + $0x338] sm:$0xff] %v322_v1  ;;  %v326_v3 = vld [vmem:[%s4722_s1 + $0x218] sm:$0xff]  ;;  %v328_v4 = vld [vmem:[%s4722_s1 + $0x220] sm:$0xff] }
  0x3d   : > { %325 = vst [vmem:[#allocation6 + $0x1f0] sm:$0xff] %v324_v2  ;;  %327 = vst [vmem:[#allocation6 + $0x1d0] sm:$0xff] %v326_v3  ;;  %v330_v5 = vld [vmem:[%s4722_s1 + $0x228] sm:$0xff]  ;;  %v332_v6 = vld [vmem:[%s4722_s1 + $0x230] sm:$0xff] }
  0x3e   : > { %329 = vst [vmem:[#allocation6 + $0x388] sm:$0xff] %v328_v4  ;;  %v334_v7 = vld [vmem:[%s4722_s1 + $0x238] sm:$0xff]  ;;  %331 = vst [vmem:[#allocation6 + $0x128] sm:$0xff] %v330_v5  ;;  %v336_v8 = vld [vmem:[%s4722_s1 + $0x240] sm:$0xff] }
  0x3f   : > { %333 = vst [vmem:[#allocation6 + $0x168] sm:$0xff] %v332_v6  ;;  %335 = vst [vmem:[#allocation6 + $0x160] sm:$0xff] %v334_v7  ;;  %v338_v9 = vld [vmem:[%s4722_s1 + $0x248] sm:$0xff]  ;;  %v340_v10 = vld [vmem:[%s4722_s1 + $0x250] sm:$0xff] }
  0x40   : > { %337 = vst [vmem:[#allocation6 + $0x130] sm:$0xff] %v336_v8  ;;  %339 = vst [vmem:[#allocation6 + $0x3b8] sm:$0xff] %v338_v9  ;;  %v342_v11 = vld [vmem:[%s4722_s1 + $0x258] sm:$0xff]  ;;  %v344_v12 = vld [vmem:[%s4722_s1 + $0x260] sm:$0xff] }
  0x41   : > { %341 = vst [vmem:[#allocation6 + $0x3c0] sm:$0xff] %v340_v10  ;;  %v346_v13 = vld [vmem:[%s4722_s1 + $0x268] sm:$0xff]  ;;  %343 = vst [vmem:[#allocation6 + $0x260] sm:$0xff] %v342_v11  ;;  %v348_v14 = vld [vmem:[%s4722_s1 + $0x270] sm:$0xff] }
  0x42   : > { %345 = vst [vmem:[#allocation6 + $0x380] sm:$0xff] %v344_v12  ;;  %347 = vst [vmem:[#allocation6 + $0x3a0] sm:$0xff] %v346_v13  ;;  %v350_v15 = vld [vmem:[%s4722_s1 + $0x278] sm:$0xff]  ;;  %v352_v16 = vld [vmem:[%s4722_s1 + $0x280] sm:$0xff] }
  0x43   : > { %349 = vst [vmem:[#allocation6 + $0x240] sm:$0xff] %v348_v14  ;;  %351 = vst [vmem:[#allocation6 + $0x90] sm:$0xff] %v350_v15  ;;  %v354_v17 = vld [vmem:[%s4722_s1 + $0x288] sm:$0xff]  ;;  %v356_v18 = vld [vmem:[%s4722_s1 + $0x290] sm:$0xff] }
  0x44   : > { %353 = vst [vmem:[#allocation6 + $0x20] sm:$0xff] %v352_v16  ;;  %v358_v19 = vld [vmem:[%s4722_s1 + $0x298] sm:$0xff]  ;;  %355 = vst [vmem:[#allocation6 + $0x210] sm:$0xff] %v354_v17  ;;  %v360_v20 = vld [vmem:[%s4722_s1 + $0x2a0] sm:$0xff] }
  0x45   : > { %357 = vst [vmem:[#allocation6 + $0x248] sm:$0xff] %v356_v18  ;;  %359 = vst [vmem:[#allocation6 + $0x3e8] sm:$0xff] %v358_v19  ;;  %v362_v21 = vld [vmem:[%s4722_s1 + $0x2a8] sm:$0xff]  ;;  %v364_v22 = vld [vmem:[%s4722_s1 + $0x2b0] sm:$0xff] }
  0x46   : > { %361 = vst [vmem:[#allocation6 + $0x18] sm:$0xff] %v360_v20  ;;  %363 = vst [vmem:[#allocation6 + $0x70] sm:$0xff] %v362_v21  ;;  %v366_v23 = vld [vmem:[%s4722_s1 + $0x2b8] sm:$0xff]  ;;  %v368_v24 = vld [vmem:[%s4722_s1 + $0x2c0] sm:$0xff] }
  0x47   : > { %365 = vst [vmem:[#allocation6 + $0x28] sm:$0xff] %v364_v22  ;;  %v370_v25 = vld [vmem:[%s4722_s1 + $0x2c8] sm:$0xff]  ;;  %367 = vst [vmem:[#allocation6 + $0x2b8] sm:$0xff] %v366_v23  ;;  %v372_v26 = vld [vmem:[%s4722_s1 + $0x2d0] sm:$0xff] }
  0x48   : > { %369 = vst [vmem:[#allocation6 + $0x208] sm:$0xff] %v368_v24  ;;  %371 = vst [vmem:[#allocation6 + $0x40] sm:$0xff] %v370_v25  ;;  %v374_v27 = vld [vmem:[%s4722_s1 + $0x2d8] sm:$0xff]  ;;  %v376_v28 = vld [vmem:[%s4722_s1 + $0x2e0] sm:$0xff] }
  0x49   : > { %373 = vst [vmem:[#allocation6 + $0x58] sm:$0xff] %v372_v26  ;;  %375 = vst [vmem:[#allocation6 + $0x220] sm:$0xff] %v374_v27  ;;  %v378_v29 = vld [vmem:[%s4722_s1 + $0x2e8] sm:$0xff]  ;;  %v380_v30 = vld [vmem:[%s4722_s1 + $0x2f0] sm:$0xff] }
  0x4a   : > { %377 = vst [vmem:[#allocation6 + $0xb8] sm:$0xff] %v376_v28  ;;  %v382_v31 = vld [vmem:[%s4722_s1 + $0x2f8] sm:$0xff]  ;;  %379 = vst [vmem:[#allocation6 + $0x198] sm:$0xff] %v378_v29  ;;  %v384_v32 = vld [vmem:[%s4722_s1 + $0x300] sm:$0xff] }
  0x4b   : > { %381 = vst [vmem:[#allocation6 + $0x2b0] sm:$0xff] %v380_v30  ;;  %383 = vst [vmem:[#allocation6 + $0xc8] sm:$0xff] %v382_v31  ;;  %v386_v33 = vld [vmem:[%s4722_s1 + $0x308] sm:$0xff]  ;;  %v388_v34 = vld [vmem:[%s4722_s1 + $0x310] sm:$0xff] }
  0x4c   : > { %385 = vst [vmem:[#allocation6 + $0x188] sm:$0xff] %v384_v32  ;;  %387 = vst [vmem:[#allocation6 + $0xd8] sm:$0xff] %v386_v33  ;;  %v390_v35 = vld [vmem:[%s4722_s1 + $0x318] sm:$0xff]  ;;  %v392_v36 = vld [vmem:[%s4722_s1 + $0x320] sm:$0xff] }
  0x4d   : > { %389 = vst [vmem:[#allocation6 + $0x310] sm:$0xff] %v388_v34  ;;  %v394_v37 = vld [vmem:[%s4722_s1 + $0x328] sm:$0xff]  ;;  %391 = vst [vmem:[#allocation6 + $0x330] sm:$0xff] %v390_v35  ;;  %v396_v38 = vld [vmem:[%s4722_s1 + $0x330] sm:$0xff] }
  0x4e   : > { %393 = vst [vmem:[#allocation6 + $0x2c0] sm:$0xff] %v392_v36  ;;  %395 = vst [vmem:[#allocation6 + $0x270] sm:$0xff] %v394_v37  ;;  %v398_v39 = vld [vmem:[%s4722_s1 + $0x338] sm:$0xff]  ;;  %v400_v40 = vld [vmem:[%s4722_s1 + $0x340] sm:$0xff] }
  0x4f   : > { %397 = vst [vmem:[#allocation6 + $0x1e8] sm:$0xff] %v396_v38  ;;  %399 = vst [vmem:[#allocation6 + $0x2f0] sm:$0xff] %v398_v39  ;;  %v402_v41 = vld [vmem:[%s4722_s1 + $0x348] sm:$0xff]  ;;  %v404_v42 = vld [vmem:[%s4722_s1 + $0x350] sm:$0xff] }
  0x50   : > { %401 = vst [vmem:[#allocation6 + $0x1e0] sm:$0xff] %v400_v40  ;;  %v406_v43 = vld [vmem:[%s4722_s1 + $0x358] sm:$0xff]  ;;  %403 = vst [vmem:[#allocation6 + $0xe0] sm:$0xff] %v402_v41  ;;  %v408_v44 = vld [vmem:[%s4722_s1 + $0x360] sm:$0xff] }
  0x51   : > { %405 = vst [vmem:[#allocation6 + $0x360] sm:$0xff] %v404_v42  ;;  %407 = vst [vmem:[#allocation6 + $0x3b0] sm:$0xff] %v406_v43  ;;  %v410_v45 = vld [vmem:[%s4722_s1 + $0x368] sm:$0xff]  ;;  %v412_v46 = vld [vmem:[%s4722_s1 + $0x370] sm:$0xff] }
  0x52   : > { %409 = vst [vmem:[#allocation6 + $0x8] sm:$0xff] %v408_v44  ;;  %411 = vst [vmem:[#allocation6 + $0x148] sm:$0xff] %v410_v45  ;;  %v414_v47 = vld [vmem:[%s4722_s1 + $0x378] sm:$0xff]  ;;  %v416_v48 = vld [vmem:[%s4722_s1 + $0x380] sm:$0xff] }
  0x53   : > { %413 = vst [vmem:[#allocation6 + $0x2e8] sm:$0xff] %v412_v46  ;;  %v418_v49 = vld [vmem:[%s4722_s1 + $0x388] sm:$0xff]  ;;  %415 = vst [vmem:[#allocation6 + $0x358] sm:$0xff] %v414_v47  ;;  %v420_v50 = vld [vmem:[%s4722_s1 + $0x390] sm:$0xff] }
  0x54   : > { %417 = vst [vmem:[#allocation6 + $0x60] sm:$0xff] %v416_v48  ;;  %419 = vst [vmem:[#allocation6 + $0xd0] sm:$0xff] %v418_v49  ;;  %v422_v51 = vld [vmem:[%s4722_s1 + $0x398] sm:$0xff]  ;;  %v424_v52 = vld [vmem:[%s4722_s1 + $0x3a0] sm:$0xff] }
  0x55   : > { %421 = vst [vmem:[#allocation6 + $0x1b0] sm:$0xff] %v420_v50  ;;  %423 = vst [vmem:[#allocation6 + $0x2a0] sm:$0xff] %v422_v51  ;;  %v426_v53 = vld [vmem:[%s4722_s1 + $0x3a8] sm:$0xff]  ;;  %v428_v54 = vld [vmem:[%s4722_s1 + $0x3b0] sm:$0xff] }
  0x56   : > { %425 = vst [vmem:[#allocation6 + $0x1c0] sm:$0xff] %v424_v52  ;;  %v430_v55 = vld [vmem:[%s4722_s1 + $0x3b8] sm:$0xff]  ;;  %427 = vst [vmem:[#allocation6 + $0x118] sm:$0xff] %v426_v53  ;;  %v432_v56 = vld [vmem:[%s4722_s1 + $0x3c0] sm:$0xff] }
  0x57   : > { %429 = vst [vmem:[#allocation6 + $0x170] sm:$0xff] %v428_v54  ;;  %431 = vst [vmem:[#allocation6 + $0x1b8] sm:$0xff] %v430_v55  ;;  %v434_v57 = vld [vmem:[%s4722_s1 + $0x3c8] sm:$0xff]  ;;  %v436_v58 = vld [vmem:[%s4722_s1 + $0x3d0] sm:$0xff] }
  0x58   : > { %433 = vst [vmem:[#allocation6 + $0x238] sm:$0xff] %v432_v56  ;;  %435 = vst [vmem:[#allocation6 + $0x180] sm:$0xff] %v434_v57  ;;  %v438_v59 = vld [vmem:[%s4722_s1 + $0x3d8] sm:$0xff]  ;;  %v440_v60 = vld [vmem:[%s4722_s1 + $0x3e0] sm:$0xff] }
  0x59   : > { %437 = vst [vmem:[#allocation6 + $0x2d8] sm:$0xff] %v436_v58  ;;  %v442_v61 = vld [vmem:[%s4722_s1 + $0x3e8] sm:$0xff]  ;;  %439 = vst [vmem:[#allocation6 + $0x50] sm:$0xff] %v438_v59  ;;  %v444_v62 = vld [vmem:[%s4722_s1 + $0x3f0] sm:$0xff] }
  0x5a   : > { %441 = vst [vmem:[#allocation6 + $0x300] sm:$0xff] %v440_v60  ;;  %443 = vst [vmem:[#allocation6 + $0x158] sm:$0xff] %v442_v61  ;;  %v446_v63 = vld [vmem:[%s4722_s1 + $0x3f8] sm:$0xff] }
  0x5b   : > { %445 = vst [vmem:[#allocation6 + $0x250] sm:$0xff] %v444_v62  ;;  %447 = vst [vmem:[#allocation6 + $0x108] sm:$0xff] %v446_v63 }
  0x5c   : > { %455 = vsyncadd [#allocation8], 16384  ;;  %v490_v0 = vld [vmem:[%s4723_s2] sm:$0xff]  ;;  %v492_v1 = vld [vmem:[%s4723_s2 + $0x8] sm:$0xff] }
  0x5d   : > { %491 = vst [vmem:[#allocation7 + $0x2f8] sm:$0xff] %v490_v0  ;;  %493 = vst [vmem:[#allocation7 + $0x330] sm:$0xff] %v492_v1  ;;  %v494_v2 = vld [vmem:[%s4723_s2 + $0x10] sm:$0xff]  ;;  %v496_v3 = vld [vmem:[%s4723_s2 + $0x18] sm:$0xff] }
  0x5e   : > { %v498_v4 = vld [vmem:[%s4723_s2 + $0x20] sm:$0xff]  ;;  %495 = vst [vmem:[#allocation7 + $0x228] sm:$0xff] %v494_v2  ;;  %497 = vst [vmem:[#allocation7 + $0xf8] sm:$0xff] %v496_v3  ;;  %v500_v5 = vld [vmem:[%s4723_s2 + $0x28] sm:$0xff] }
  0x5f   : > { %499 = vst [vmem:[#allocation7 + $0x8] sm:$0xff] %v498_v4  ;;  %v502_v6 = vld [vmem:[%s4723_s2 + $0x30] sm:$0xff]  ;;  %v504_v7 = vld [vmem:[%s4723_s2 + $0x38] sm:$0xff]  ;;  %501 = vst [vmem:[#allocation7 + $0x78] sm:$0xff] %v500_v5 }
  0x60   : > { %503 = vst [vmem:[#allocation7 + $0x10] sm:$0xff] %v502_v6  ;;  %505 = vst [vmem:[#allocation7 + $0x98] sm:$0xff] %v504_v7  ;;  %v506_v8 = vld [vmem:[%s4723_s2 + $0x40] sm:$0xff]  ;;  %v508_v9 = vld [vmem:[%s4723_s2 + $0x48] sm:$0xff] }
  0x61   : > { %v510_v10 = vld [vmem:[%s4723_s2 + $0x50] sm:$0xff]  ;;  %507 = vst [vmem:[#allocation7 + $0x208] sm:$0xff] %v506_v8  ;;  %509 = vst [vmem:[#allocation7 + $0x140] sm:$0xff] %v508_v9  ;;  %v512_v11 = vld [vmem:[%s4723_s2 + $0x58] sm:$0xff] }
  0x62   : > { %511 = vst [vmem:[#allocation7 + $0x308] sm:$0xff] %v510_v10  ;;  %v514_v12 = vld [vmem:[%s4723_s2 + $0x60] sm:$0xff]  ;;  %v516_v13 = vld [vmem:[%s4723_s2 + $0x68] sm:$0xff]  ;;  %513 = vst [vmem:[#allocation7 + $0x3e0] sm:$0xff] %v512_v11 }
  0x63   : > { %515 = vst [vmem:[#allocation7 + $0x338] sm:$0xff] %v514_v12  ;;  %517 = vst [vmem:[#allocation7 + $0x280] sm:$0xff] %v516_v13  ;;  %v518_v14 = vld [vmem:[%s4723_s2 + $0x70] sm:$0xff]  ;;  %v520_v15 = vld [vmem:[%s4723_s2 + $0x78] sm:$0xff] }
  0x64   : > { %v522_v16 = vld [vmem:[%s4723_s2 + $0x80] sm:$0xff]  ;;  %519 = vst [vmem:[#allocation7 + $0x3f8] sm:$0xff] %v518_v14  ;;  %521 = vst [vmem:[#allocation7 + $0x50] sm:$0xff] %v520_v15  ;;  %v524_v17 = vld [vmem:[%s4723_s2 + $0x88] sm:$0xff] }
  0x65   : > { %523 = vst [vmem:[#allocation7 + $0x388] sm:$0xff] %v522_v16  ;;  %v526_v18 = vld [vmem:[%s4723_s2 + $0x90] sm:$0xff]  ;;  %v528_v19 = vld [vmem:[%s4723_s2 + $0x98] sm:$0xff]  ;;  %525 = vst [vmem:[#allocation7 + $0x348] sm:$0xff] %v524_v17 }
  0x66   : > { %527 = vst [vmem:[#allocation7 + $0x310] sm:$0xff] %v526_v18  ;;  %529 = vst [vmem:[#allocation7 + $0x238] sm:$0xff] %v528_v19  ;;  %v530_v20 = vld [vmem:[%s4723_s2 + $0xa0] sm:$0xff]  ;;  %v532_v21 = vld [vmem:[%s4723_s2 + $0xa8] sm:$0xff] }
  0x67   : > { %v534_v22 = vld [vmem:[%s4723_s2 + $0xb0] sm:$0xff]  ;;  %531 = vst [vmem:[#allocation7 + $0x148] sm:$0xff] %v530_v20  ;;  %533 = vst [vmem:[#allocation7 + $0x268] sm:$0xff] %v532_v21  ;;  %v536_v23 = vld [vmem:[%s4723_s2 + $0xb8] sm:$0xff] }
  0x68   : > { %535 = vst [vmem:[#allocation7 + $0xd8] sm:$0xff] %v534_v22  ;;  %v538_v24 = vld [vmem:[%s4723_s2 + $0xc0] sm:$0xff]  ;;  %v540_v25 = vld [vmem:[%s4723_s2 + $0xc8] sm:$0xff]  ;;  %537 = vst [vmem:[#allocation7 + $0x1f0] sm:$0xff] %v536_v23 }
  0x69   : > { %539 = vst [vmem:[#allocation7 + $0x358] sm:$0xff] %v538_v24  ;;  %541 = vst [vmem:[#allocation7 + $0x120] sm:$0xff] %v540_v25  ;;  %v542_v26 = vld [vmem:[%s4723_s2 + $0xd0] sm:$0xff]  ;;  %v544_v27 = vld [vmem:[%s4723_s2 + $0xd8] sm:$0xff] }
  0x6a   : > { %v546_v28 = vld [vmem:[%s4723_s2 + $0xe0] sm:$0xff]  ;;  %543 = vst [vmem:[#allocation7 + $0x60] sm:$0xff] %v542_v26  ;;  %545 = vst [vmem:[#allocation7 + $0x158] sm:$0xff] %v544_v27  ;;  %v548_v29 = vld [vmem:[%s4723_s2 + $0xe8] sm:$0xff] }
  0x6b   : > { %547 = vst [vmem:[#allocation7 + $0xb0] sm:$0xff] %v546_v28  ;;  %v550_v30 = vld [vmem:[%s4723_s2 + $0xf0] sm:$0xff]  ;;  %v552_v31 = vld [vmem:[%s4723_s2 + $0xf8] sm:$0xff]  ;;  %549 = vst [vmem:[#allocation7 + $0x368] sm:$0xff] %v548_v29 }
  0x6c   : > { %551 = vst [vmem:[#allocation7 + $0x320] sm:$0xff] %v550_v30  ;;  %553 = vst [vmem:[#allocation7 + $0x3c8] sm:$0xff] %v552_v31  ;;  %v554_v32 = vld [vmem:[%s4723_s2 + $0x100] sm:$0xff]  ;;  %v556_v33 = vld [vmem:[%s4723_s2 + $0x108] sm:$0xff] }
  0x6d   : > { %v558_v34 = vld [vmem:[%s4723_s2 + $0x110] sm:$0xff]  ;;  %555 = vst [vmem:[#allocation7 + $0x2f0] sm:$0xff] %v554_v32  ;;  %557 = vst [vmem:[#allocation7 + $0xf0] sm:$0xff] %v556_v33  ;;  %v560_v35 = vld [vmem:[%s4723_s2 + $0x118] sm:$0xff] }
  0x6e   : > { %559 = vst [vmem:[#allocation7 + $0x2b8] sm:$0xff] %v558_v34  ;;  %v562_v36 = vld [vmem:[%s4723_s2 + $0x120] sm:$0xff]  ;;  %v564_v37 = vld [vmem:[%s4723_s2 + $0x128] sm:$0xff]  ;;  %561 = vst [vmem:[#allocation7 + $0x18] sm:$0xff] %v560_v35 }
  0x6f   : > { %563 = vst [vmem:[#allocation7 + $0x188] sm:$0xff] %v562_v36  ;;  %565 = vst [vmem:[#allocation7 + $0x1c0] sm:$0xff] %v564_v37  ;;  %v566_v38 = vld [vmem:[%s4723_s2 + $0x130] sm:$0xff]  ;;  %v568_v39 = vld [vmem:[%s4723_s2 + $0x138] sm:$0xff] }
  0x70   : > { %v570_v40 = vld [vmem:[%s4723_s2 + $0x140] sm:$0xff]  ;;  %567 = vst [vmem:[#allocation7 + $0x290] sm:$0xff] %v566_v38  ;;  %569 = vst [vmem:[#allocation7 + $0x168] sm:$0xff] %v568_v39  ;;  %v572_v41 = vld [vmem:[%s4723_s2 + $0x148] sm:$0xff] }
  0x71   : > { %571 = vst [vmem:[#allocation7 + $0x190] sm:$0xff] %v570_v40  ;;  %v574_v42 = vld [vmem:[%s4723_s2 + $0x150] sm:$0xff]  ;;  %v576_v43 = vld [vmem:[%s4723_s2 + $0x158] sm:$0xff]  ;;  %573 = vst [vmem:[#allocation7 + $0x3b8] sm:$0xff] %v572_v41 }
  0x72   : > { %575 = vst [vmem:[#allocation7 + $0x270] sm:$0xff] %v574_v42  ;;  %577 = vst [vmem:[#allocation7 + $0x170] sm:$0xff] %v576_v43  ;;  %v578_v44 = vld [vmem:[%s4723_s2 + $0x160] sm:$0xff]  ;;  %v580_v45 = vld [vmem:[%s4723_s2 + $0x168] sm:$0xff] }
  0x73   : > { %v582_v46 = vld [vmem:[%s4723_s2 + $0x170] sm:$0xff]  ;;  %579 = vst [vmem:[#allocation7 + $0x1b8] sm:$0xff] %v578_v44  ;;  %581 = vst [vmem:[#allocation7 + $0x218] sm:$0xff] %v580_v45  ;;  %v584_v47 = vld [vmem:[%s4723_s2 + $0x178] sm:$0xff] }
  0x74   : > { %583 = vst [vmem:[#allocation7 + $0x2e8] sm:$0xff] %v582_v46  ;;  %v586_v48 = vld [vmem:[%s4723_s2 + $0x180] sm:$0xff]  ;;  %v588_v49 = vld [vmem:[%s4723_s2 + $0x188] sm:$0xff]  ;;  %585 = vst [vmem:[#allocation7 + $0x288] sm:$0xff] %v584_v47 }
  0x75   : > { %587 = vst [vmem:[#allocation7 + $0x80] sm:$0xff] %v586_v48  ;;  %589 = vst [vmem:[#allocation7 + $0x68] sm:$0xff] %v588_v49  ;;  %v590_v50 = vld [vmem:[%s4723_s2 + $0x190] sm:$0xff]  ;;  %v592_v51 = vld [vmem:[%s4723_s2 + $0x198] sm:$0xff] }
  0x76   : > { %v594_v52 = vld [vmem:[%s4723_s2 + $0x1a0] sm:$0xff]  ;;  %591 = vst [vmem:[#allocation7 + $0x30] sm:$0xff] %v590_v50  ;;  %593 = vst [vmem:[#allocation7 + $0x58] sm:$0xff] %v592_v51  ;;  %v596_v53 = vld [vmem:[%s4723_s2 + $0x1a8] sm:$0xff] }
  0x77   : > { %595 = vst [vmem:[#allocation7 + $0x318] sm:$0xff] %v594_v52  ;;  %v598_v54 = vld [vmem:[%s4723_s2 + $0x1b0] sm:$0xff]  ;;  %v600_v55 = vld [vmem:[%s4723_s2 + $0x1b8] sm:$0xff]  ;;  %597 = vst [vmem:[#allocation7 + $0x1e8] sm:$0xff] %v596_v53 }
  0x78   : > { %599 = vst [vmem:[#allocation7 + $0x210] sm:$0xff] %v598_v54  ;;  %601 = vst [vmem:[#allocation7 + $0x160] sm:$0xff] %v600_v55  ;;  %v602_v56 = vld [vmem:[%s4723_s2 + $0x1c0] sm:$0xff]  ;;  %v604_v57 = vld [vmem:[%s4723_s2 + $0x1c8] sm:$0xff] }
  0x79   : > { %v606_v58 = vld [vmem:[%s4723_s2 + $0x1d0] sm:$0xff]  ;;  %603 = vst [vmem:[#allocation7 + $0x2d8] sm:$0xff] %v602_v56  ;;  %605 = vst [vmem:[#allocation7 + $0x130] sm:$0xff] %v604_v57  ;;  %v608_v59 = vld [vmem:[%s4723_s2 + $0x1d8] sm:$0xff] }
  0x7a   : > { %607 = vst [vmem:[#allocation7 + $0x2e0] sm:$0xff] %v606_v58  ;;  %v610_v60 = vld [vmem:[%s4723_s2 + $0x1e0] sm:$0xff]  ;;  %v612_v61 = vld [vmem:[%s4723_s2 + $0x1e8] sm:$0xff]  ;;  %609 = vst [vmem:[#allocation7 + $0x3d8] sm:$0xff] %v608_v59 }
  0x7b   : > { %611 = vst [vmem:[#allocation7 + $0x3d0] sm:$0xff] %v610_v60  ;;  %613 = vst [vmem:[#allocation7 + $0x220] sm:$0xff] %v612_v61  ;;  %v614_v62 = vld [vmem:[%s4723_s2 + $0x1f0] sm:$0xff]  ;;  %v616_v63 = vld [vmem:[%s4723_s2 + $0x1f8] sm:$0xff] }
  0x7c   : > { %v618_v0 = vld [vmem:[%s4723_s2 + $0x200] sm:$0xff]  ;;  %615 = vst [vmem:[#allocation7 + $0x3e8] sm:$0xff] %v614_v62  ;;  %617 = vst [vmem:[#allocation7 + $0x198] sm:$0xff] %v616_v63  ;;  %v620_v1 = vld [vmem:[%s4723_s2 + $0x208] sm:$0xff] }
  0x7d   : > { %619 = vst [vmem:[#allocation7 + $0x2a0] sm:$0xff] %v618_v0  ;;  %v622_v2 = vld [vmem:[%s4723_s2 + $0x210] sm:$0xff]  ;;  %v624_v3 = vld [vmem:[%s4723_s2 + $0x218] sm:$0xff]  ;;  %621 = vst [vmem:[#allocation7 + $0x378] sm:$0xff] %v620_v1 }
  0x7e   : > { %623 = vst [vmem:[#allocation7 + $0x260] sm:$0xff] %v622_v2  ;;  %625 = vst [vmem:[#allocation7 + $0x3f0] sm:$0xff] %v624_v3  ;;  %v626_v4 = vld [vmem:[%s4723_s2 + $0x220] sm:$0xff]  ;;  %v628_v5 = vld [vmem:[%s4723_s2 + $0x228] sm:$0xff] }
  0x7f   : > { %v630_v6 = vld [vmem:[%s4723_s2 + $0x230] sm:$0xff]  ;;  %627 = vst [vmem:[#allocation7 + $0x2b0] sm:$0xff] %v626_v4  ;;  %629 = vst [vmem:[#allocation7 + $0xe0] sm:$0xff] %v628_v5  ;;  %v632_v7 = vld [vmem:[%s4723_s2 + $0x238] sm:$0xff] }
  0x80   : > { %631 = vst [vmem:[#allocation7 + $0x88] sm:$0xff] %v630_v6  ;;  %v634_v8 = vld [vmem:[%s4723_s2 + $0x240] sm:$0xff]  ;;  %v636_v9 = vld [vmem:[%s4723_s2 + $0x248] sm:$0xff]  ;;  %633 = vst [vmem:[#allocation7 + $0xd0] sm:$0xff] %v632_v7 }
  0x81   : > { %635 = vst [vmem:[#allocation7 + $0x2d0] sm:$0xff] %v634_v8  ;;  %637 = vst [vmem:[#allocation7 + $0x1d8] sm:$0xff] %v636_v9  ;;  %v638_v10 = vld [vmem:[%s4723_s2 + $0x250] sm:$0xff]  ;;  %v640_v11 = vld [vmem:[%s4723_s2 + $0x258] sm:$0xff] }
  0x82   : > { %v642_v12 = vld [vmem:[%s4723_s2 + $0x260] sm:$0xff]  ;;  %639 = vst [vmem:[#allocation7 + $0x250] sm:$0xff] %v638_v10  ;;  %641 = vst [vmem:[#allocation7 + $0x300] sm:$0xff] %v640_v11  ;;  %v644_v13 = vld [vmem:[%s4723_s2 + $0x268] sm:$0xff] }
  0x83   : > { %643 = vst [vmem:[#allocation7 + $0x90] sm:$0xff] %v642_v12  ;;  %v646_v14 = vld [vmem:[%s4723_s2 + $0x270] sm:$0xff]  ;;  %v648_v15 = vld [vmem:[%s4723_s2 + $0x278] sm:$0xff]  ;;  %645 = vst [vmem:[#allocation7 + $0x3a0] sm:$0xff] %v644_v13 }
  0x84   : > { %647 = vst [vmem:[#allocation7 + $0x328] sm:$0xff] %v646_v14  ;;  %649 = vst [vmem:[#allocation7 + $0x128] sm:$0xff] %v648_v15  ;;  %v650_v16 = vld [vmem:[%s4723_s2 + $0x280] sm:$0xff]  ;;  %v652_v17 = vld [vmem:[%s4723_s2 + $0x288] sm:$0xff] }
  0x85   : > { %v654_v18 = vld [vmem:[%s4723_s2 + $0x290] sm:$0xff]  ;;  %651 = vst [vmem:[#allocation7 + $0x108] sm:$0xff] %v650_v16  ;;  %653 = vst [vmem:[#allocation7 + $0x380] sm:$0xff] %v652_v17  ;;  %v656_v19 = vld [vmem:[%s4723_s2 + $0x298] sm:$0xff] }
  0x86   : > { %655 = vst [vmem:[#allocation7 + $0x138] sm:$0xff] %v654_v18  ;;  %v658_v20 = vld [vmem:[%s4723_s2 + $0x2a0] sm:$0xff]  ;;  %v660_v21 = vld [vmem:[%s4723_s2 + $0x2a8] sm:$0xff]  ;;  %657 = vst [vmem:[#allocation7 + $0x1f8] sm:$0xff] %v656_v19 }
  0x87   : > { %659 = vst [vmem:[#allocation7 + $0x278] sm:$0xff] %v658_v20  ;;  %661 = vst [vmem:[#allocation7 + $0x200] sm:$0xff] %v660_v21  ;;  %v662_v22 = vld [vmem:[%s4723_s2 + $0x2b0] sm:$0xff]  ;;  %v664_v23 = vld [vmem:[%s4723_s2 + $0x2b8] sm:$0xff] }
  0x88   : > { %v666_v24 = vld [vmem:[%s4723_s2 + $0x2c0] sm:$0xff]  ;;  %663 = vst [vmem:[#allocation7 + $0x150] sm:$0xff] %v662_v22  ;;  %665 = vst [vmem:[#allocation7 + $0x1c8] sm:$0xff] %v664_v23  ;;  %v668_v25 = vld [vmem:[%s4723_s2 + $0x2c8] sm:$0xff] }
  0x89   : > { %667 = vst [vmem:[#allocation7 + $0x38] sm:$0xff] %v666_v24  ;;  %v670_v26 = vld [vmem:[%s4723_s2 + $0x2d0] sm:$0xff]  ;;  %v672_v27 = vld [vmem:[%s4723_s2 + $0x2d8] sm:$0xff]  ;;  %669 = vst [vmem:[#allocation7 + $0x350] sm:$0xff] %v668_v25 }
  0x8a   : > { %671 = vst [vmem:[#allocation7 + $0x20] sm:$0xff] %v670_v26  ;;  %673 = vst [vmem:[#allocation7 + $0xa8] sm:$0xff] %v672_v27  ;;  %v674_v28 = vld [vmem:[%s4723_s2 + $0x2e0] sm:$0xff]  ;;  %v676_v29 = vld [vmem:[%s4723_s2 + $0x2e8] sm:$0xff] }
  0x8b   : > { %v678_v30 = vld [vmem:[%s4723_s2 + $0x2f0] sm:$0xff]  ;;  %675 = vst [vmem:[#allocation7 + $0x398] sm:$0xff] %v674_v28  ;;  %677 = vst [vmem:[#allocation7 + $0xc0] sm:$0xff] %v676_v29  ;;  %v680_v31 = vld [vmem:[%s4723_s2 + $0x2f8] sm:$0xff] }
  0x8c   : > { %679 = vst [vmem:[#allocation7 + $0x48] sm:$0xff] %v678_v30  ;;  %v682_v32 = vld [vmem:[%s4723_s2 + $0x300] sm:$0xff]  ;;  %v684_v33 = vld [vmem:[%s4723_s2 + $0x308] sm:$0xff]  ;;  %681 = vst [vmem:[#allocation7 + $0x360] sm:$0xff] %v680_v31 }
  0x8d   : > { %683 = vst [vmem:[#allocation7 + $0x118] sm:$0xff] %v682_v32  ;;  %685 = vst [vmem:[#allocation7 + $0x240] sm:$0xff] %v684_v33  ;;  %v686_v34 = vld [vmem:[%s4723_s2 + $0x310] sm:$0xff]  ;;  %v688_v35 = vld [vmem:[%s4723_s2 + $0x318] sm:$0xff] }
  0x8e   : > { %v690_v36 = vld [vmem:[%s4723_s2 + $0x320] sm:$0xff]  ;;  %687 = vst [vmem:[#allocation7 + $0x1d0] sm:$0xff] %v686_v34  ;;  %689 = vst [vmem:[#allocation7 + $0x248] sm:$0xff] %v688_v35  ;;  %v692_v37 = vld [vmem:[%s4723_s2 + $0x328] sm:$0xff] }
  0x8f   : > { %691 = vst [vmem:[#allocation7 + $0x370] sm:$0xff] %v690_v36  ;;  %v694_v38 = vld [vmem:[%s4723_s2 + $0x330] sm:$0xff]  ;;  %v696_v39 = vld [vmem:[%s4723_s2 + $0x338] sm:$0xff]  ;;  %693 = vst [vmem:[#allocation7 + $0x28] sm:$0xff] %v692_v37 }
  0x90   : > { %695 = vst [vmem:[#allocation7 + $0x3c0] sm:$0xff] %v694_v38  ;;  %697 = vst [vmem:[#allocation7 + $0x3b0] sm:$0xff] %v696_v39  ;;  %v698_v40 = vld [vmem:[%s4723_s2 + $0x340] sm:$0xff]  ;;  %v700_v41 = vld [vmem:[%s4723_s2 + $0x348] sm:$0xff] }
  0x91   : > { %v702_v42 = vld [vmem:[%s4723_s2 + $0x350] sm:$0xff]  ;;  %699 = vst [vmem:[#allocation7 + $0x390] sm:$0xff] %v698_v40  ;;  %701 = vst [vmem:[#allocation7 + $0x70] sm:$0xff] %v700_v41  ;;  %v704_v43 = vld [vmem:[%s4723_s2 + $0x358] sm:$0xff] }
  0x92   : > { %703 = vst [vmem:[#allocation7 + $0x178] sm:$0xff] %v702_v42  ;;  %v706_v44 = vld [vmem:[%s4723_s2 + $0x360] sm:$0xff]  ;;  %v708_v45 = vld [vmem:[%s4723_s2 + $0x368] sm:$0xff]  ;;  %705 = vst [vmem:[#allocation7 + $0x2c8] sm:$0xff] %v704_v43 }
  0x93   : > { %707 = vst [vmem:[#allocation7 + $0x40] sm:$0xff] %v706_v44  ;;  %709 = vst [vmem:[#allocation7 + $0x230] sm:$0xff] %v708_v45  ;;  %v710_v46 = vld [vmem:[%s4723_s2 + $0x370] sm:$0xff]  ;;  %v712_v47 = vld [vmem:[%s4723_s2 + $0x378] sm:$0xff] }
  0x94   : > { %v714_v48 = vld [vmem:[%s4723_s2 + $0x380] sm:$0xff]  ;;  %711 = vst [vmem:[#allocation7 + $0x340] sm:$0xff] %v710_v46  ;;  %713 = vst [vmem:[#allocation7 + $0x180] sm:$0xff] %v712_v47  ;;  %v716_v49 = vld [vmem:[%s4723_s2 + $0x388] sm:$0xff] }
  0x95   : > { %715 = vst [vmem:[#allocation7 + $0x2a8] sm:$0xff] %v714_v48  ;;  %v718_v50 = vld [vmem:[%s4723_s2 + $0x390] sm:$0xff]  ;;  %v720_v51 = vld [vmem:[%s4723_s2 + $0x398] sm:$0xff]  ;;  %717 = vst [vmem:[#allocation7 + $0x1a0] sm:$0xff] %v716_v49 }
  0x96   : > { %719 = vst [vmem:[#allocation7 + $0x3a8] sm:$0xff] %v718_v50  ;;  %721 = vst [vmem:[#allocation7 + $0xe8] sm:$0xff] %v720_v51  ;;  %v722_v52 = vld [vmem:[%s4723_s2 + $0x3a0] sm:$0xff]  ;;  %v724_v53 = vld [vmem:[%s4723_s2 + $0x3a8] sm:$0xff] }
  0x97   : > { %v726_v54 = vld [vmem:[%s4723_s2 + $0x3b0] sm:$0xff]  ;;  %723 = vst [vmem:[#allocation7 + $0xb8] sm:$0xff] %v722_v52  ;;  %725 = vst [vmem:[#allocation7 + $0x1b0] sm:$0xff] %v724_v53  ;;  %v728_v55 = vld [vmem:[%s4723_s2 + $0x3b8] sm:$0xff] }
  0x98   : > { %727 = vst [vmem:[#allocation7] sm:$0xff] %v726_v54  ;;  %v730_v56 = vld [vmem:[%s4723_s2 + $0x3c0] sm:$0xff]  ;;  %v732_v57 = vld [vmem:[%s4723_s2 + $0x3c8] sm:$0xff]  ;;  %729 = vst [vmem:[#allocation7 + $0x1e0] sm:$0xff] %v728_v55 }
  0x99   : > { %731 = vst [vmem:[#allocation7 + $0x100] sm:$0xff] %v730_v56  ;;  %733 = vst [vmem:[#allocation7 + $0xa0] sm:$0xff] %v732_v57  ;;  %v734_v58 = vld [vmem:[%s4723_s2 + $0x3d0] sm:$0xff]  ;;  %v736_v59 = vld [vmem:[%s4723_s2 + $0x3d8] sm:$0xff] }
  0x9a   : > { %v738_v60 = vld [vmem:[%s4723_s2 + $0x3e0] sm:$0xff]  ;;  %735 = vst [vmem:[#allocation7 + $0x258] sm:$0xff] %v734_v58  ;;  %737 = vst [vmem:[#allocation7 + $0x1a8] sm:$0xff] %v736_v59  ;;  %v740_v61 = vld [vmem:[%s4723_s2 + $0x3e8] sm:$0xff] }
  0x9b   : > { %739 = vst [vmem:[#allocation7 + $0x110] sm:$0xff] %v738_v60  ;;  %v742_v62 = vld [vmem:[%s4723_s2 + $0x3f0] sm:$0xff]  ;;  %v744_v63 = vld [vmem:[%s4723_s2 + $0x3f8] sm:$0xff]  ;;  %741 = vst [vmem:[#allocation7 + $0x2c0] sm:$0xff] %v740_v61 }
  0x9c   : > { %743 = vst [vmem:[#allocation7 + $0x298] sm:$0xff] %v742_v62  ;;  %745 = vst [vmem:[#allocation7 + $0xc8] sm:$0xff] %v744_v63 }
  0x9d   : > { %753 = vsyncadd [#allocation8 + $0x1], 16384 }
  0x9e   : > { %3721 = dma.done.wait [#allocation8], 16384 }
  0x9f   : > { %3722 = vsyncadd [#allocation8], 4294950912 }
  0xa0   : > { %3723 = dma.done.wait [#allocation8 + $0x1], 16384 }
  0xa1   : > { %3724 = vsyncadd [#allocation8 + $0x1], 4294950912  ;;  %v3749_v0 = vmov 0.0  }
  0xa2   : > { %760 = vst [vmem:[#allocation2] sm:$0xff] %v3749_v0  ;;  %761 = vst [vmem:[#allocation2 + $0x8] sm:$0xff] %v3749_v0 }
  0xa3   : > { %762 = vst [vmem:[#allocation3 + $0x8] sm:$0xff] %v3749_v0  ;;  %763 = vst [vmem:[#allocation3] sm:$0xff] %v3749_v0 }
  0xa4   : > { %764 = vst [vmem:[#allocation4 + $0x8] sm:$0xff] %v3749_v0  ;;  %765 = vst [vmem:[#allocation4] sm:$0xff] %v3749_v0 }
  0xa5   : > { %766 = vst [vmem:[#allocation5] sm:$0xff] %v3749_v0  ;;  %767 = vst [vmem:[#allocation5 + $0x8] sm:$0xff] %v3749_v0 }
  0xa6 PF: > { %v3287_v1 = vld [vmem:[#allocation6 + $0x344] ss:$-176 sps:$4 sm:$0xff]   ;;  %v3291_v3 = vld [vmem:[#allocation6 + $0x340] ss:$-176 sps:$4 sm:$0xff]   ;;  %v836_v5 = vld [vmem:[#allocation6 + $0x3f8] sm:$0xff]  ;;  %s3240_s20 = sshll.u32 %s3798_s19, 8 }
  0xa7   : > { %v3289_v2 = vld [vmem:[#allocation6 + $0x234] ss:$104 sps:$4 sm:$0xff]   ;;  %1556 = vmatprep.subr.bf16.mxu0 %v3287_v1  ;;  %v3292_v4 = vld [vmem:[#allocation6 + $0x230] ss:$104 sps:$4 sm:$0xff]   ;;  %v3293_v13 = vld [vmem:[#allocation6 + $0x2ac] ss:$-488 sps:$4 sm:$0xff]   ;;  %s4649_s29 = scalar_lea.hbm %s4724_s3, %s3240_s20 }
  0xa8   : > { %1597 = vmatprep.subr.bf16.mxu1 %v3289_v2  ;;  %v840_v6 = vld [vmem:[#allocation6 + $0x378] sm:$0xff]  ;;  %v837_v7 = vld [vmem:[#allocation6 + $0x390] sm:$0xff]  ;;  %1557 = vmatpush1.bf16.msra.mxu0 %v3291_v3  ;;  %v3295_v17 = vld [vmem:[#allocation6 + $0x2a8] ss:$-488 sps:$4 sm:$0xff]   ;;  %s2816_s22 = sshll.u32 %s3836_s8, 4  ;;  %s2797_s30 = scalar_lea.sflag [#allocation10], %s3826_s27  ;;  %s2817_s22 = int_to_ptr.vmem [resolvable:$true] %s2816_s22 }
  0xa9   : > { %v841_v8 = vld [vmem:[#allocation6 + $0xb0] sm:$0xff]  ;;  %1598 = vmatpush1.bf16.msra.mxu1 %v3292_v4  ;;  %v3008_v9 = vcombine.high %v836_v5, %v840_v6  ;;  %v3007_v11 = vcombine.low %v836_v5, %v840_v6  ;;  %v829_v14 = vld [vmem:[#allocation6 + $0x98] sm:$0xff]  ;;  %v3298_v20 = vld [vmem:[#allocation6 + $0x204] ss:$136 sps:$4 sm:$0xff]   ;;  %s3653_s5 = scalar_lea.vmem %s2817_s22, 256  ;;  %s3750_s6 = smov [#allocation9]  }
  0xaa   : > { %v3010_v10 = vcombine.high %v837_v7, %v841_v8  ;;  %v3009_v12 = vcombine.low %v837_v7, %v841_v8  ;;  %v833_v15 = vld [vmem:[#allocation6 + $0x218] sm:$0xff]  ;;  %v3296_v19 = vld [vmem:[#allocation6 + $0x3cc] ss:$-696 sps:$4 sm:$0xff]   ;;  %v3300_v21 = vld [vmem:[#allocation6 + $0x3c8] ss:$-696 sps:$4 sm:$0xff]   ;;  %p3654_p12 = scmp.ne.s32.totalorder %s2817_s22, %s3653_s5  ;;  %s3657_s10 = sshll.u32 %s3750_s6, 4  ;;  %s3658_s10 = int_to_ptr.vmem [resolvable:$false] %s3657_s10 }
  0xab   : > { %1558 = vmatprep.subr.bf16.mxu0 %v3008_v9  ;;  %v3002_v16 = vcombine.high %v829_v14, %v833_v15  ;;  %v3001_v18 = vcombine.low %v829_v14, %v833_v15  ;;  %v3301_v22 = vld [vmem:[#allocation6 + $0x200] ss:$136 sps:$4 sm:$0xff]   ;;  %v3302_v23 = vld [vmem:[#allocation6 + $0x14] ss:$600 sps:$4 sm:$0xff]   ;;  %v3323_v41 = vld [vmem:[#allocation6 + $0x23c] ss:$200 sps:$4 sm:$0xff]   ;;  %p3660_p1 = scmp.lt.s32.totalorder %s2817_s22, %s3658_s10 }
  0xac   : > { %1599 = vmatprep.subr.bf16.mxu1 %v3010_v10  ;;  %1559 = vmatpush1.bf16.msra.mxu0 %v3007_v11  ;;  %v3304_v24 = vld [vmem:[#allocation6 + $0x124] ss:$-56 sps:$4 sm:$0xff]   ;;  %v3306_v25 = vld [vmem:[#allocation6 + $0x10] ss:$600 sps:$4 sm:$0xff]   ;;  %v3327_v45 = vld [vmem:[#allocation6 + $0x238] ss:$200 sps:$4 sm:$0xff]   ;;  %p3655_p13 = pnand %p3654_p12, %p3815_p5 }
  0xad   : > { %1600 = vmatpush1.bf16.msra.mxu1 %v3009_v12  ;;  %1560 = vmatprep.subr.bf16.mxu0 %v3293_v13  ;;  %v3307_v26 = vld [vmem:[#allocation6 + $0x120] ss:$-56 sps:$4 sm:$0xff]   ;;  %v3308_v27 = vld [vmem:[#allocation6 + $0x32c] ss:$-472 sps:$4 sm:$0xff]   ;;  %v3325_v42 = vld [vmem:[#allocation6 + $0x184] ss:$-40 sps:$4 sm:$0xff]  }
  0xae   : > { %1601 = vmatprep.subr.bf16.mxu1 %v3002_v16  ;;  %v3310_v28 = vld [vmem:[#allocation6 + $0x6c] ss:$872 sps:$4 sm:$0xff]   ;;  %v3312_v31 = vld [vmem:[#allocation6 + $0x328] ss:$-472 sps:$4 sm:$0xff]   ;;  %v900_v43 = vld [vmem:[#allocation6 + $0x60] sm:$0xff]  ;;  %p3656_p0 = pneg %p3655_p13  ;;  %s3659_s11 = scalar_lea.vmem %s3658_s10, 512 }
  0xaf   : > { %v797_v29 = vld [vmem:[#allocation6 + $0x308] sm:$0xff]  ;;  %v3317_v37 = vld [vmem:[#allocation6 + $0x34] ss:$-48 sps:$4 sm:$0xff]   ;;  %v3321_v39 = vld [vmem:[#allocation6 + $0x30] ss:$-48 sps:$4 sm:$0xff]   ;;  %p3661_p2 = scmp.lt.s32.totalorder %s3659_s11, %s3653_s5 }
  0xb0   : > { %1561 = vmatpush1.bf16.msra.mxu0 %v3295_v17  ;;  %v801_v30 = vld [vmem:[#allocation6 + $0x2c8] sm:$0xff]  ;;  %v904_v44 = vld [vmem:[#allocation6 + $0x1c0] sm:$0xff]  ;;  %v3329_v48 = vld [vmem:[#allocation6 + $0xd4] ss:$72 sps:$4 sm:$0xff]  }
  0xb1   : > { %1602 = vmatpush1.bf16.msra.mxu1 %v3001_v18  ;;  %1562 = vmatprep.subr.bf16.mxu0 %v3296_v19  ;;  %v3313_v32 = vld [vmem:[#allocation6 + $0x68] ss:$872 sps:$4 sm:$0xff]   ;;  %v3314_v33 = vld [vmem:[#allocation6 + $0x84] ss:$-56 sps:$4 sm:$0xff]   ;;  %v2970_v34 = vcombine.high %v797_v29, %v801_v30  ;;  %v2969_v36 = vcombine.low %v797_v29, %v801_v30  ;;  %v3328_v46 = vld [vmem:[#allocation6 + $0x180] ss:$-40 sps:$4 sm:$0xff]   ;;  %v3072_v47 = vcombine.high %v900_v43, %v904_v44  ;;  %p3662_p3 = por %p3661_p2, %p3660_p1 }
  0xb2   : > { %1603 = vmatprep.subr.bf16.mxu1 %v3298_v20  ;;  %v3316_v35 = vld [vmem:[#allocation6 + $0x80] ss:$-56 sps:$4 sm:$0xff]   ;;  %v3319_v38 = vld [vmem:[#allocation6 + $0x3f4] ss:$-136 sps:$4 sm:$0xff]   ;;  %v3331_v49 = vld [vmem:[#allocation6 + $0xd0] ss:$72 sps:$4 sm:$0xff]   ;;  %v3071_v50 = vcombine.low %v900_v43, %v904_v44 }
  0xb3   : > { %v3322_v40 = vld [vmem:[#allocation6 + $0x3f0] ss:$-136 sps:$4 sm:$0xff]   ;;  %v3332_v51 = vld [vmem:[#allocation6 + $0x1e4] ss:$-472 sps:$4 sm:$0xff]   ;;  %v3340_v58 = vld [vmem:[#allocation6 + $0xdc] ss:$408 sps:$4 sm:$0xff]   ;;  %p3663_p4 = pnand %p3662_p3, %p3656_p0 }
  0xb4   : > { %1563 = vmatpush1.bf16.msra.mxu0 %v3300_v21  ;;  %v3334_v52 = vld [vmem:[#allocation6 + $0xe4] ss:$104 sps:$4 sm:$0xff]   ;;  %v3336_v55 = vld [vmem:[#allocation6 + $0x1e0] ss:$-472 sps:$4 sm:$0xff]   ;;  %v3343_v60 = vld [vmem:[#allocation6 + $0xd8] ss:$408 sps:$4 sm:$0xff]  }
  0xb5   : > { %1604 = vmatpush1.bf16.msra.mxu1 %v3301_v22  ;;  %1564 = vmatprep.subr.bf16.mxu0 %v3302_v23  ;;  %v785_v53 = vld [vmem:[#allocation2 + $0x8] sm:$0xff]  ;;  %v3346_v62 = vld [vmem:[#allocation6 + $0x44] ss:$344 sps:$4 sm:$0xff]   ;;  %v869_v63 = vld [vmem:[#allocation6 + $0x210] sm:$0xff] }
  0xb6   : > { %1605 = vmatprep.subr.bf16.mxu1 %v3304_v24  ;;  %v4609_v54 = vpack.c.bf16 %v785_v53, %v785_v53  ;;  %v3337_v56 = vld [vmem:[#allocation6 + $0xe0] ss:$104 sps:$4 sm:$0xff]   ;;  %v3338_v57 = vld [vmem:[#allocation6 + $0x18c] ss:$312 sps:$4 sm:$0xff]   ;;  %v873_v0 = vld [vmem:[#allocation6 + $0x70] sm:$0xff] }
  0xb7   : > { %v3342_v59 = vld [vmem:[#allocation6 + $0x188] ss:$312 sps:$4 sm:$0xff]   ;;  %v3344_v61 = vld [vmem:[#allocation6 + $0x20c] ss:$-336 sps:$4 sm:$0xff]   ;;  %v3042_v4 = vcombine.high %v869_v63, %v873_v0  ;;  %v3041_v6 = vcombine.low %v869_v63, %v873_v0  ;;  %v3353_v7 = vld [vmem:[#allocation6 + $0x134] ss:$592 sps:$4 sm:$0xff]  }
  0xb8   : > { %1565 = vmatpush1.bf16.msra.mxu0 %v3306_v25  ;;  %1588 = vmatprep.mubr.bf16.mxu0 %v4609_v54  ;;  %v3348_v1 = vld [vmem:[#allocation6 + $0x208] ss:$-336 sps:$4 sm:$0xff]   ;;  %v3350_v3 = vld [vmem:[#allocation6 + $0x24] ss:$-8 sps:$4 sm:$0xff]   ;;  %v3357_v9 = vld [vmem:[#allocation6 + $0x130] ss:$592 sps:$4 sm:$0xff]  }
  0xb9   : > { %1606 = vmatpush1.bf16.msra.mxu1 %v3307_v26  ;;  %1566 = vmatprep.subr.bf16.mxu0 %v3308_v27  ;;  %v3349_v2 = vld [vmem:[#allocation6 + $0x40] ss:$344 sps:$4 sm:$0xff]   ;;  %v3355_v8 = vld [vmem:[#allocation6 + $0x3bc] ss:$-24 sps:$4 sm:$0xff]   ;;  %v830_v23 = vld [vmem:[#allocation6 + $0x1c8] sm:$0xff] }
  0xba   : > { %1607 = vmatprep.subr.bf16.mxu1 %v3310_v28  ;;  %1629 = vmatprep.mubr.bf16.mxu1 %v4609_v54  ;;  %v3352_v5 = vld [vmem:[#allocation6 + $0x20] ss:$-8 sps:$4 sm:$0xff]   ;;  %v3359_v11 = vld [vmem:[#allocation6 + $0x3c] ss:$848 sps:$4 sm:$0xff]   ;;  %v3388_v43 = vld [vmem:[#allocation6 + $0x194] ss:$336 sps:$4 sm:$0xff]  }
  0xbb   : > { %v3358_v10 = vld [vmem:[#allocation6 + $0x3b8] ss:$-24 sps:$4 sm:$0xff]   ;;  %v3361_v12 = vld [vmem:[#allocation6 + $0x33c] ss:$-528 sps:$4 sm:$0xff]  }
  0xbc   : > { %1567 = vmatpush1.bf16.msra.mxu0 %v3312_v31  ;;  %v3363_v13 = vld [vmem:[#allocation6 + $0x38] ss:$848 sps:$4 sm:$0xff]   ;;  %v784_v15 = vld [vmem:[#allocation2] sm:$0xff]  ;;  %v3370_v17 = vld [vmem:[#allocation6 + $0x17c] ss:$344 sps:$4 sm:$0xff]  }
  0xbd   : > { %1608 = vmatpush1.bf16.msra.mxu1 %v3313_v32  ;;  %1568 = vmatprep.subr.bf16.mxu0 %v3314_v33  ;;  %v3364_v14 = vld [vmem:[#allocation6 + $0x338] ss:$-528 sps:$4 sm:$0xff]   ;;  %v3367_v16 = vld [vmem:[#allocation6 + $0xa4] ss:$600 sps:$4 sm:$0xff]   ;;  %v4613_v20 = vpack.c.bf16 %v784_v15, %v784_v15 }
  0xbe   : > { %1609 = vmatprep.subr.bf16.mxu1 %v2970_v34  ;;  %v3365_v18 = vld [vmem:[#allocation6 + $0xa0] ss:$600 sps:$4 sm:$0xff]   ;;  %v3373_v21 = vld [vmem:[#allocation6 + $0x1fc] ss:$336 sps:$4 sm:$0xff]  }
  0xbf   : > { %v3368_v19 = vld [vmem:[#allocation6 + $0x178] ss:$344 sps:$4 sm:$0xff]   ;;  %v3376_v22 = vld [vmem:[#allocation6 + $0x284] ss:$-40 sps:$4 sm:$0xff]   ;;  %v834_v24 = vld [vmem:[#allocation6 + $0x228] sm:$0xff] }
  0xc0   : > { %1569 = vmatpush1.bf16.msra.mxu0 %v3316_v35  ;;  %v831_v25 = vld [vmem:[#allocation6 + $0x1d8] sm:$0xff]  ;;  %v3004_v29 = vcombine.high %v830_v23, %v834_v24  ;;  %v3003_v31 = vcombine.low %v830_v23, %v834_v24  ;;  %v814_v35 = vld [vmem:[#allocation6 + $0xa8] sm:$0xff] }
  0xc1   : > { %1610 = vmatpush1.bf16.msra.mxu1 %v2969_v36  ;;  %1570 = vmatprep.subr.bf16.mxu0 %v3317_v37  ;;  %v835_v26 = vld [vmem:[#allocation6 + $0x78] sm:$0xff]  ;;  %v818_v36 = vld [vmem:[#allocation6 + $0x3a8] sm:$0xff] }
  0xc2   : > { %1611 = vmatprep.subr.bf16.mxu1 %v3319_v38  ;;  %v3371_v27 = vld [vmem:[#allocation6 + $0x1f8] ss:$336 sps:$4 sm:$0xff]   ;;  %v3006_v30 = vcombine.high %v831_v25, %v835_v26  ;;  %v3005_v32 = vcombine.low %v831_v25, %v835_v26  ;;  %v3379_v33 = vld [vmem:[#allocation6 + $0x3e4] ss:$-8 sps:$4 sm:$0xff]  }
  0xc3   : > { %v3374_v28 = vld [vmem:[#allocation6 + $0x280] ss:$-40 sps:$4 sm:$0xff]   ;;  %v3382_v34 = vld [vmem:[#allocation6 + $0x39c] ss:$-784 sps:$4 sm:$0xff]   ;;  %v3433_v25 = vld [vmem:[#allocation6 + $0x264] ss:$-464 sps:$4 sm:$0xff]  }
  0xc4   : > { %1571 = vmatpush1.bf16.msra.mxu0 %v3321_v39  ;;  %v3377_v37 = vld [vmem:[#allocation6 + $0x3e0] ss:$-8 sps:$4 sm:$0xff]   ;;  %v2988_v39 = vcombine.high %v814_v35, %v818_v36  ;;  %v3391_v44 = vld [vmem:[#allocation6 + $0x1a4] ss:$216 sps:$4 sm:$0xff]  }
  0xc5   : > { %1612 = vmatpush1.bf16.msra.mxu1 %v3322_v40  ;;  %1572 = vmatprep.subr.bf16.mxu0 %v3323_v41  ;;  %v3380_v38 = vld [vmem:[#allocation6 + $0x398] ss:$-784 sps:$4 sm:$0xff]   ;;  %v3385_v40 = vld [vmem:[#allocation6 + $0x1ac] ss:$-104 sps:$4 sm:$0xff]   ;;  %v2987_v41 = vcombine.low %v814_v35, %v818_v36 }
  0xc6   : > { %1613 = vmatprep.subr.bf16.mxu1 %v3325_v42  ;;  %v3383_v42 = vld [vmem:[#allocation6 + $0x1a8] ss:$-104 sps:$4 sm:$0xff]   ;;  %v3398_v53 = vld [vmem:[#allocation6 + $0x350] ss:$-600 sps:$4 sm:$0xff]  }
  0xc7   : > { %v3410_v0 = vld [vmem:[#allocation6 + $0x2a0] ss:$-232 sps:$4 sm:$0xff]   ;;  %v1785_v35 = vld [vmem:[#allocation7 + $0x1e8] sm:$0xff] }
  0xc8   : > { %1573 = vmatpush2.bf16.msra.mxu0 %v3327_v45  ;;  %v3386_v45 = vld [vmem:[#allocation6 + $0x190] ss:$336 sps:$4 sm:$0xff]   ;;  %v3428_v23 = vld [vmem:[#allocation6 + $0x3e8] ss:$-304 sps:$4 sm:$0xff]  }
  0xc9   : > { %1614 = vmatpush2.bf16.msra.mxu1 %v3328_v46  ;;  %1574 = vmatprep.subr.bf16.mxu0 %v3072_v47  ;;  %v3389_v46 = vld [vmem:[#allocation6 + $0x1a0] ss:$216 sps:$4 sm:$0xff]   ;;  %v3394_v47 = vld [vmem:[#allocation6 + $0x13c] ss:$568 sps:$4 sm:$0xff]  }
  0xca   : > { %1615 = vmatprep.subr.bf16.mxu1 %v3329_v48  ;;  %v3397_v48 = vld [vmem:[#allocation6 + $0xf4] ss:$560 sps:$4 sm:$0xff]   ;;  %v3422_v15 = vld [vmem:[#allocation6 + $0x58] ss:$600 sps:$4 sm:$0xff]  }
  0xcb   : > { %v3440_v36 = vld [vmem:[#allocation7 + $0x2d8] ss:$248 sps:$4 sm:$0xff]  }
  0xcc   : > { %1575 = vmatpush2.bf16.msra.mxu0 %v3071_v50  ;;  %v3395_v50 = vld [vmem:[#allocation6 + $0xf0] ss:$560 sps:$4 sm:$0xff]  }
  0xcd   : > { %1616 = vmatpush2.bf16.msra.mxu1 %v3331_v49  ;;  %1576 = vmatprep.subr.bf16.mxu0 %v3332_v51  ;;  %v3392_v49 = vld [vmem:[#allocation6 + $0x138] ss:$568 sps:$4 sm:$0xff]   ;;  %v3400_v51 = vld [vmem:[#allocation6 + $0x354] ss:$-600 sps:$4 sm:$0xff]  }
  0xce   : > { %1617 = vmatprep.subr.bf16.mxu1 %v3334_v52  ;;  %v3403_v52 = vld [vmem:[#allocation6 + $0x31c] ss:$-536 sps:$4 sm:$0xff]  }
  0xd0   : > { %1577 = vmatpush2.bf16.msra.mxu0 %v3336_v55  ;;  %v3406_v55 = vld [vmem:[#allocation6 + $0x2dc] ss:$-136 sps:$4 sm:$0xff]  }
  0xd1   : > { %1618 = vmatpush2.bf16.msra.mxu1 %v3337_v56  ;;  %1578 = vmatprep.subr.bf16.mxu0 %v3338_v57  ;;  %v3409_v56 = vld [vmem:[#allocation6 + $0x54] ss:$184 sps:$4 sm:$0xff]  }
  0xd2   : > { %1619 = vmatprep.subr.bf16.mxu1 %v3340_v58  ;;  %v902_v57 = vld [vmem:[#allocation6 + $0x1b0] sm:$0xff] }
  0xd3   : > { %v906_v58 = vld [vmem:[#allocation6 + $0x170] sm:$0xff] }
  0xd4   : > { %1579 = vmatpush2.bf16.msra.mxu0 %v3342_v59  ;;  %v3404_v59 = vld [vmem:[#allocation6 + $0x2d8] ss:$-136 sps:$4 sm:$0xff]   ;;  %v3075_v63 = vcombine.low %v902_v57, %v906_v58 }
  0xd5   : > { %1620 = vmatpush2.bf16.msra.mxu1 %v3343_v60  ;;  %1580 = vmatprep.subr.bf16.mxu0 %v3344_v61  ;;  %v3407_v60 = vld [vmem:[#allocation6 + $0x50] ss:$184 sps:$4 sm:$0xff]   ;;  %v3076_v61 = vcombine.high %v902_v57, %v906_v58 }
  0xd6   : > { %1621 = vmatprep.subr.bf16.mxu1 %v3346_v62  ;;  %v3412_v62 = vld [vmem:[#allocation6 + $0x2a4] ss:$-232 sps:$4 sm:$0xff]   ;;  %v1749_v57 = vld [vmem:[#allocation7 + $0x348] sm:$0xff] }
  0xd7   : > { %v1753_v58 = vld [vmem:[#allocation7 + $0x268] sm:$0xff] }
  0xd8   : > { %1581 = vmatpush2.bf16.msra.mxu0 %v3348_v1  ;;  %v3415_v1 = vld [vmem:[#allocation6 + $0x364] ss:$-120 sps:$4 sm:$0xff]  }
  0xd9   : > { %1622 = vmatpush2.bf16.msra.mxu1 %v3349_v2  ;;  %1582 = vmatprep.subr.bf16.mxu0 %v3350_v3  ;;  %v3418_v2 = vld [vmem:[#allocation6 + $0x3b4] ss:$-88 sps:$4 sm:$0xff]  }
  0xda   : > { %1623 = vmatprep.subr.bf16.mxu1 %v3042_v4  ;;  %v887_v3 = vld [vmem:[#allocation6 + $0x330] sm:$0xff] }
  0xdb   : > { %v891_v4 = vld [vmem:[#allocation6 + $0x2f0] sm:$0xff] }
  0xdc   : > { %1583 = vmatpush2.bf16.msra.mxu0 %v3352_v5  ;;  %v3413_v5 = vld [vmem:[#allocation6 + $0x360] ss:$-120 sps:$4 sm:$0xff]  }
  0xdd   : > { %1624 = vmatpush2.bf16.msra.mxu1 %v3041_v6  ;;  %1584 = vmatprep.subr.bf16.mxu0 %v3353_v7  ;;  %v3416_v6 = vld [vmem:[#allocation6 + $0x3b0] ss:$-88 sps:$4 sm:$0xff]   ;;  %v3421_v7 = vld [vmem:[#allocation6 + $0x314] ss:$-296 sps:$4 sm:$0xff]  }
  0xde   : > { %1625 = vmatprep.subr.bf16.mxu1 %v3355_v8  ;;  %v3062_v8 = vcombine.high %v887_v3, %v891_v4 }
  0xe0   : > { %1585 = vmatpush2.bf16.msra.mxu0 %v3357_v9  ;;  %v3419_v9 = vld [vmem:[#allocation6 + $0x310] ss:$-296 sps:$4 sm:$0xff]  }
  0xe1   : > { %1626 = vmatpush2.bf16.msra.mxu1 %v3358_v10  ;;  %1586 = vmatprep.subr.bf16.mxu0 %v3359_v11  ;;  %v3061_v10 = vcombine.low %v887_v3, %v891_v4  ;;  %v3424_v11 = vld [vmem:[#allocation6 + $0x5c] ss:$600 sps:$4 sm:$0xff]  }
  0xe2   : > { %1627 = vmatprep.subr.bf16.mxu1 %v3361_v12  ;;  %v3427_v12 = vld [vmem:[#allocation6 + $0x224] ss:$-344 sps:$4 sm:$0xff]  }
  0xe3   : > { %v3466_v3 = vld [vmem:[#allocation7 + $0x20c] ss:$304 sps:$4 sm:$0xff]  }
  0xe4   : > { %1587 = vmatpush2.bf16.msra.mxu0 %v3363_v13  ;;  %v870_v13 = vld [vmem:[#allocation6 + $0x248] sm:$0xff] }
  0xe5   : > { %1628 = vmatpush2.bf16.msra.mxu1 %v3364_v14  ;;  %1638 = vmatprep.subr.bf16.mxu0 %v3367_v16  ;;  %v874_v14 = vld [vmem:[#allocation6 + $0x28] sm:$0xff] }
  0xe6   : > { %1679 = vmatprep.subr.bf16.mxu1 %v3370_v17  ;;  %v3425_v16 = vld [vmem:[#allocation6 + $0x220] ss:$-344 sps:$4 sm:$0xff]   ;;  %v3044_v17 = vcombine.high %v870_v13, %v874_v14 }
  0xe7   : > { %1589 = vmatmul.mubr.bf16.vlgmr.msra.gmra.mxu0 %v4613_v20 }
  0xe8   : > { %1630 = vmatmul.mubr.bf16.vlgmr.msra.gmra.mxu1 %v4613_v20  ;;  %1639 = vmatpush1.bf16.msra.mxu0 %v3365_v18  ;;  %v3430_v18 = vld [vmem:[#allocation6 + $0x3ec] ss:$-304 sps:$4 sm:$0xff]  }
  0xe9   : > { %1680 = vmatpush1.bf16.msra.mxu1 %v3368_v19  ;;  %1640 = vmatprep.subr.bf16.mxu0 %v3373_v21  ;;  %v862_v19 = vld [vmem:[#allocation6 + $0x3c0] sm:$0xff] }
  0xea   : > { %1681 = vmatprep.subr.bf16.mxu1 %v3376_v22  ;;  %1670 = vmatprep.mubr.bf16.mxu0 %v4609_v54  ;;  %v866_v21 = vld [vmem:[#allocation6 + $0x240] sm:$0xff]  ;;  %v3043_v22 = vcombine.low %v870_v13, %v874_v14 }
  0xeb   : > { %1711 = vmatprep.mubr.bf16.mxu1 %v4609_v54  ;;  %v3401_v54 = vld [vmem:[#allocation6 + $0x318] ss:$-536 sps:$4 sm:$0xff]   ;;  %v3036_v24 = vcombine.high %v862_v19, %v866_v21  ;;  %v3035_v26 = vcombine.low %v862_v19, %v866_v21  ;;  %v3475_v13 = vld [vmem:[#allocation7 + $0x104] ss:$16 sps:$4 sm:$0xff]  }
  0xec   : > { %1641 = vmatpush1.bf16.msra.mxu0 %v3371_v27  ;;  %v3431_v27 = vld [vmem:[#allocation6 + $0x260] ss:$-464 sps:$4 sm:$0xff]  }
  0xed   : > { %1682 = vmatpush1.bf16.msra.mxu1 %v3374_v28  ;;  %1642 = vmatprep.subr.bf16.mxu0 %v3004_v29  ;;  %v3436_v28 = vld [vmem:[#allocation6 + $0x1f4] ss:$-136 sps:$4 sm:$0xff]  }
  0xee   : > { %1683 = vmatprep.subr.bf16.mxu1 %v3006_v30  ;;  %v3439_v29 = vld [vmem:[#allocation6 + $0x1d4] ss:$-112 sps:$4 sm:$0xff]   ;;  %v3434_v30 = vld [vmem:[#allocation6 + $0x1f0] ss:$-136 sps:$4 sm:$0xff]  }
  0xef   : > { %v1837_v19 = vld [vmem:[#allocation7 + $0x70] sm:$0xff] }
  0xf0   : > { %1643 = vmatpush1.bf16.msra.mxu0 %v3003_v31  ;;  %v3437_v31 = vld [vmem:[#allocation6 + $0x1d0] ss:$-112 sps:$4 sm:$0xff]  }
  0xf1   : > { %1684 = vmatpush1.bf16.msra.mxu1 %v3005_v32  ;;  %1644 = vmatprep.subr.bf16.mxu0 %v3379_v33  ;;  %v3442_v32 = vld [vmem:[#allocation7 + $0x2dc] ss:$248 sps:$4 sm:$0xff]  }
  0xf2   : > { %1685 = vmatprep.subr.bf16.mxu1 %v3382_v34  ;;  %v3445_v33 = vld [vmem:[#allocation7 + $0x134] ss:$240 sps:$4 sm:$0xff]   ;;  %v1781_v34 = vld [vmem:[#allocation7 + $0x68] sm:$0xff] }
  0xf3   : > { %v1841_v21 = vld [vmem:[#allocation7 + $0x230] sm:$0xff] }
  0xf4   : > { %1645 = vmatpush1.bf16.msra.mxu0 %v3377_v37  ;;  %v1729_v37 = vld [vmem:[#allocation4] sm:$0xff] }
  0xf5   : > { %1686 = vmatpush1.bf16.msra.mxu1 %v3380_v38  ;;  %1646 = vmatprep.subr.bf16.mxu0 %v2988_v39  ;;  %v3443_v38 = vld [vmem:[#allocation7 + $0x130] ss:$240 sps:$4 sm:$0xff]   ;;  %v3448_v39 = vld [vmem:[#allocation7 + $0x84] ss:$664 sps:$4 sm:$0xff]  }
  0xf6   : > { %1687 = vmatprep.subr.bf16.mxu1 %v3385_v40  ;;  %v3138_v40 = vcombine.high %v1781_v34, %v1785_v35 }
  0xf8   : > { %1647 = vmatpush1.bf16.msra.mxu0 %v2987_v41  ;;  %v1773_v41 = vld [vmem:[#allocation7 + $0x3b8] sm:$0xff] }
  0xf9   : > { %1688 = vmatpush1.bf16.msra.mxu1 %v3383_v42  ;;  %1648 = vmatprep.subr.bf16.mxu0 %v3388_v43  ;;  %v1777_v42 = vld [vmem:[#allocation7 + $0x218] sm:$0xff]  ;;  %v4619_v43 = vpack.c.bf16 %v1729_v37, %v1729_v37  ;;  %v1817_v37 = vld [vmem:[#allocation7 + $0x200] sm:$0xff] }
  0xfa   : > { %1689 = vmatprep.subr.bf16.mxu1 %v3391_v44  ;;  %v3446_v44 = vld [vmem:[#allocation7 + $0x80] ss:$664 sps:$4 sm:$0xff]  }
  0xfc   : > { %1649 = vmatpush1.bf16.msra.mxu0 %v3386_v45  ;;  %v3137_v45 = vcombine.low %v1781_v34, %v1785_v35  ;;  %v3493_v35 = vld [vmem:[#allocation7 + $0x354] ss:$-656 sps:$4 sm:$0xff]  }
  0xfd   : > { %1690 = vmatpush1.bf16.msra.mxu1 %v3389_v46  ;;  %1650 = vmatprep.subr.bf16.mxu0 %v3394_v47  ;;  %v3451_v46 = vld [vmem:[#allocation7 + $0x194] ss:$40 sps:$4 sm:$0xff]   ;;  %v3130_v47 = vcombine.high %v1773_v41, %v1777_v42 }
  0xfe   : > { %1691 = vmatprep.subr.bf16.mxu1 %v3397_v48  ;;  %v3449_v48 = vld [vmem:[#allocation7 + $0x190] ss:$40 sps:$4 sm:$0xff]  }
 0x100   : > { %1651 = vmatpush1.bf16.msra.mxu0 %v3392_v49  ;;  %v3129_v49 = vcombine.low %v1773_v41, %v1777_v42  ;;  %v1804_v42 = vld [vmem:[#allocation7 + $0x2d0] sm:$0xff] }
 0x101   : > { %1692 = vmatpush1.bf16.msra.mxu1 %v3395_v50  ;;  %1652 = vmatprep.subr.bf16.mxu0 %v3400_v51  ;;  %v3454_v50 = vld [vmem:[#allocation7 + $0x2f4] ss:$-360 sps:$4 sm:$0xff]   ;;  %v3452_v51 = vld [vmem:[#allocation7 + $0x2f0] ss:$-360 sps:$4 sm:$0xff]  }
 0x102   : > { %1693 = vmatprep.subr.bf16.mxu1 %v3403_v52  ;;  %v3455_v52 = vld [vmem:[#allocation7 + $0xf0] ss:$208 sps:$4 sm:$0xff]  }
 0x104   : > { %1653 = vmatpush1.bf16.msra.mxu0 %v3398_v53  ;;  %v3460_v53 = vld [vmem:[#allocation7 + $0x35c] ss:$-680 sps:$4 sm:$0xff]  }
 0x105   : > { %1694 = vmatpush1.bf16.msra.mxu1 %v3401_v54  ;;  %1654 = vmatprep.subr.bf16.mxu0 %v3406_v55  ;;  %v3463_v54 = vld [vmem:[#allocation7 + $0x124] ss:$584 sps:$4 sm:$0xff]  }
 0x106   : > { %1695 = vmatprep.subr.bf16.mxu1 %v3409_v56  ;;  %v1748_v55 = vld [vmem:[#allocation7 + $0x388] sm:$0xff] }
 0x107   : > { %v1752_v56 = vld [vmem:[#allocation7 + $0x148] sm:$0xff] }
 0x108   : > { %1655 = vmatpush2.bf16.msra.mxu0 %v3404_v59  ;;  %v3458_v59 = vld [vmem:[#allocation7 + $0x358] ss:$-680 sps:$4 sm:$0xff]  }
 0x109   : > { %1696 = vmatpush2.bf16.msra.mxu1 %v3407_v60  ;;  %1656 = vmatprep.subr.bf16.mxu0 %v3076_v61  ;;  %v3461_v60 = vld [vmem:[#allocation7 + $0x120] ss:$584 sps:$4 sm:$0xff]   ;;  %v3104_v61 = vcombine.high %v1748_v55, %v1752_v56 }
 0x10a   : > { %1697 = vmatprep.subr.bf16.mxu1 %v3412_v62  ;;  %v3106_v62 = vcombine.high %v1749_v57, %v1753_v58 }
 0x10c   : > { %1657 = vmatpush2.bf16.msra.mxu0 %v3075_v63  ;;  %v1741_v63 = vld [vmem:[#allocation7 + $0x140] sm:$0xff] }
 0x10d   : > { %1698 = vmatpush2.bf16.msra.mxu1 %v3410_v0  ;;  %1658 = vmatprep.subr.bf16.mxu0 %v3415_v1  ;;  %v1745_v0 = vld [vmem:[#allocation7 + $0x280] sm:$0xff]  ;;  %v3103_v1 = vcombine.low %v1748_v55, %v1752_v56  ;;  %v1728_v56 = vld [vmem:[#allocation4 + $0x8] sm:$0xff] }
 0x10e   : > { %1699 = vmatprep.subr.bf16.mxu1 %v3418_v2  ;;  %v3105_v2 = vcombine.low %v1749_v57, %v1753_v58  ;;  %v3098_v4 = vcombine.high %v1741_v63, %v1745_v0  ;;  %v3503_v55 = vld [vmem:[#allocation7 + $0x378] ss:$-664 sps:$4 sm:$0xff]   ;;  %v3508_v57 = vld [vmem:[#allocation7 + $0x2e4] ss:$264 sps:$4 sm:$0xff]  }
 0x110   : > { %1659 = vmatpush2.bf16.msra.mxu0 %v3413_v5  ;;  %v3464_v5 = vld [vmem:[#allocation7 + $0x208] ss:$304 sps:$4 sm:$0xff]  }
 0x111   : > { %1700 = vmatpush2.bf16.msra.mxu1 %v3416_v6  ;;  %1660 = vmatprep.subr.bf16.mxu0 %v3421_v7  ;;  %v3097_v6 = vcombine.low %v1741_v63, %v1745_v0  ;;  %v3469_v7 = vld [vmem:[#allocation7 + $0x2fc] ss:$-752 sps:$4 sm:$0xff]  }
 0x112   : > { %1701 = vmatprep.subr.bf16.mxu1 %v3062_v8  ;;  %v3472_v8 = vld [vmem:[#allocation7 + $0x334] ss:$-696 sps:$4 sm:$0xff]  }
 0x114   : > { %1661 = vmatpush2.bf16.msra.mxu0 %v3419_v9  ;;  %v1853_v9 = vld [vmem:[#allocation7 + $0xa0] sm:$0xff] }
 0x115   : > { %1702 = vmatpush2.bf16.msra.mxu1 %v3061_v10  ;;  %1662 = vmatprep.subr.bf16.mxu0 %v3424_v11  ;;  %v1857_v10 = vld [vmem:[#allocation7 + $0x2c0] sm:$0xff]  ;;  %v3467_v11 = vld [vmem:[#allocation7 + $0x2f8] ss:$-752 sps:$4 sm:$0xff]  }
 0x116   : > { %1703 = vmatprep.subr.bf16.mxu1 %v3427_v12  ;;  %v3470_v12 = vld [vmem:[#allocation7 + $0x330] ss:$-696 sps:$4 sm:$0xff]   ;;  %v3210_v14 = vcombine.high %v1853_v9, %v1857_v10 }
 0x118   : > { %1663 = vmatpush2.bf16.msra.mxu0 %v3422_v15  ;;  %v3473_v15 = vld [vmem:[#allocation7 + $0x100] ss:$16 sps:$4 sm:$0xff]  }
 0x119   : > { %1704 = vmatpush2.bf16.msra.mxu1 %v3425_v16  ;;  %1664 = vmatprep.subr.bf16.mxu0 %v3044_v17  ;;  %v3209_v16 = vcombine.low %v1853_v9, %v1857_v10  ;;  %v3478_v17 = vld [vmem:[#allocation7 + $0x2ac] ss:$-496 sps:$4 sm:$0xff]   ;;  %v1758_v10 = vld [vmem:[#allocation7 + $0x60] sm:$0xff] }
 0x11a   : > { %1705 = vmatprep.subr.bf16.mxu1 %v3430_v18  ;;  %v3481_v18 = vld [vmem:[#allocation7 + $0x1a4] ss:$16 sps:$4 sm:$0xff]   ;;  %v3523_v9 = vld [vmem:[#allocation7 + $0x1c] ss:$336 sps:$4 sm:$0xff]  }
 0x11c   : > { %1665 = vmatpush2.bf16.msra.mxu0 %v3043_v22  ;;  %v3476_v22 = vld [vmem:[#allocation7 + $0x2a8] ss:$-496 sps:$4 sm:$0xff]  }
 0x11d   : > { %1706 = vmatpush2.bf16.msra.mxu1 %v3428_v23  ;;  %1666 = vmatprep.subr.bf16.mxu0 %v3036_v24  ;;  %v3479_v23 = vld [vmem:[#allocation7 + $0x1a0] ss:$16 sps:$4 sm:$0xff]   ;;  %v3484_v24 = vld [vmem:[#allocation7 + $0x394] ss:$-848 sps:$4 sm:$0xff]  }
 0x11e   : > { %1707 = vmatprep.subr.bf16.mxu1 %v3433_v25  ;;  %v3194_v25 = vcombine.high %v1837_v19, %v1841_v21 }
 0x120   : > { %1667 = vmatpush2.bf16.msra.mxu0 %v3035_v26  ;;  %v3482_v26 = vld [vmem:[#allocation7 + $0x390] ss:$-848 sps:$4 sm:$0xff]  }
 0x121   : > { %1708 = vmatpush2.bf16.msra.mxu1 %v3431_v27  ;;  %1668 = vmatprep.subr.bf16.mxu0 %v3436_v28  ;;  %v3193_v27 = vcombine.low %v1837_v19, %v1841_v21  ;;  %v3487_v28 = vld [vmem:[#allocation7 + $0x11c] ss:$600 sps:$4 sm:$0xff]   ;;  %v3527_v19 = vld [vmem:[#allocation7 + $0x310] ss:$-568 sps:$4 sm:$0xff]  }
 0x122   : > { %1709 = vmatprep.subr.bf16.mxu1 %v3439_v29  ;;  %v3490_v29 = vld [vmem:[#allocation7 + $0x244] ss:$-536 sps:$4 sm:$0xff]   ;;  %v3530_v21 = vld [vmem:[#allocation7 + $0x238] ss:$-72 sps:$4 sm:$0xff]  }
 0x124   : > { %1669 = vmatpush2.bf16.msra.mxu0 %v3434_v30  ;;  %v1820_v30 = vld [vmem:[#allocation7 + $0x38] sm:$0xff] }
 0x125   : > { %1710 = vmatpush2.bf16.msra.mxu1 %v3437_v31  ;;  %2500 = vmatprep.subr.bf16.mxu0 %v3442_v32  ;;  %v1824_v31 = vld [vmem:[#allocation7 + $0x398] sm:$0xff] }
 0x126   : > { %2541 = vmatprep.subr.bf16.mxu1 %v3445_v33  ;;  %v3485_v32 = vld [vmem:[#allocation7 + $0x118] ss:$600 sps:$4 sm:$0xff]   ;;  %v3488_v33 = vld [vmem:[#allocation7 + $0x240] ss:$-536 sps:$4 sm:$0xff]   ;;  %v3176_v34 = vcombine.high %v1820_v30, %v1824_v31 }
 0x127   : > { %1671 = vmatmul.mubr.bf16.vlgmr.msra.gmra.mxu0 %v4613_v20 }
 0x128   : > { %1712 = vmatmul.mubr.bf16.vlgmr.msra.gmra.mxu1 %v4613_v20  ;;  %2501 = vmatpush1.bf16.msra.mxu0 %v3440_v36  ;;  %v3457_v20 = vld [vmem:[#allocation7 + $0xf4] ss:$208 sps:$4 sm:$0xff]  }
 0x129   : > { %2542 = vmatpush1.bf16.msra.mxu1 %v3443_v38  ;;  %2502 = vmatprep.subr.bf16.mxu0 %v3448_v39  ;;  %v1813_v36 = vld [vmem:[#allocation7 + $0x380] sm:$0xff]  ;;  %v3175_v38 = vcombine.low %v1820_v30, %v1824_v31  ;;  %v1854_v30 = vld [vmem:[#allocation7 + $0x258] sm:$0xff] }
 0x12a   : > { %2543 = vmatprep.subr.bf16.mxu1 %v3138_v40  ;;  %2532 = vmatprep.mubr.bf16.mxu0 %v4619_v43  ;;  %v3491_v39 = vld [vmem:[#allocation7 + $0x350] ss:$-656 sps:$4 sm:$0xff]   ;;  %v3496_v40 = vld [vmem:[#allocation7 + $0x10c] ss:$368 sps:$4 sm:$0xff]   ;;  %v3170_v41 = vcombine.high %v1813_v36, %v1817_v37 }
 0x12b   : > { %2573 = vmatprep.mubr.bf16.mxu1 %v4619_v43  ;;  %v1858_v31 = vld [vmem:[#allocation7 + $0x298] sm:$0xff] }
 0x12c   : > { %2503 = vmatpush1.bf16.msra.mxu0 %v3446_v44  ;;  %v1808_v44 = vld [vmem:[#allocation7 + $0x90] sm:$0xff] }
 0x12d   : > { %2544 = vmatpush1.bf16.msra.mxu1 %v3137_v45  ;;  %2504 = vmatprep.subr.bf16.mxu0 %v3451_v46  ;;  %v3494_v45 = vld [vmem:[#allocation7 + $0x108] ss:$368 sps:$4 sm:$0xff]   ;;  %v3169_v46 = vcombine.low %v1813_v36, %v1817_v37  ;;  %v3212_v36 = vcombine.high %v1854_v30, %v1858_v31 }
 0x12e   : > { %2545 = vmatprep.subr.bf16.mxu1 %v3130_v47  ;;  %v3160_v47 = vcombine.high %v1804_v42, %v1808_v44 }
 0x130   : > { %2505 = vmatpush1.bf16.msra.mxu0 %v3449_v48  ;;  %v3499_v48 = vld [vmem:[#allocation7 + $0x1dc] ss:$456 sps:$4 sm:$0xff]  }
 0x131   : > { %2546 = vmatpush1.bf16.msra.mxu1 %v3129_v49  ;;  %2506 = vmatprep.subr.bf16.mxu0 %v3454_v50  ;;  %v3159_v49 = vcombine.low %v1804_v42, %v1808_v44  ;;  %v3497_v50 = vld [vmem:[#allocation7 + $0x1d8] ss:$456 sps:$4 sm:$0xff]  }
 0x132   : > { %2547 = vmatprep.subr.bf16.mxu1 %v3457_v20  ;;  %v3502_v20 = vld [vmem:[#allocation7 + $0x2a4] ss:$16 sps:$4 sm:$0xff]   ;;  %v3542_v42 = vld [vmem:[#allocation7 + $0x3a8] ss:$-936 sps:$4 sm:$0xff]  }
 0x133   : > { %v3545_v44 = vld [vmem:[#allocation7 + $0xe8] ss:$248 sps:$4 sm:$0xff]  }
 0x134   : > { %2507 = vmatpush1.bf16.msra.mxu0 %v3452_v51  ;;  %v3505_v51 = vld [vmem:[#allocation7 + $0x37c] ss:$-664 sps:$4 sm:$0xff]  }
 0x135   : > { %2548 = vmatpush1.bf16.msra.mxu1 %v3455_v52  ;;  %2508 = vmatprep.subr.bf16.mxu0 %v3460_v53  ;;  %v1791_v52 = vld [vmem:[#allocation7 + $0x3d8] sm:$0xff] }
 0x136   : > { %2549 = vmatprep.subr.bf16.mxu1 %v3463_v54  ;;  %v1795_v53 = vld [vmem:[#allocation7 + $0x198] sm:$0xff]  ;;  %v3500_v54 = vld [vmem:[#allocation7 + $0x2a0] ss:$16 sps:$4 sm:$0xff]  }
 0x137   : > { %v3150_v58 = vcombine.high %v1791_v52, %v1795_v53  ;;  %v3149_v63 = vcombine.low %v1791_v52, %v1795_v53  ;;  %v3562_v52 = vld [vmem:[#allocation7 + $0x24] ss:$40 sps:$4 sm:$0xff]  }
 0x138   : > { %2509 = vmatpush1.bf16.msra.mxu0 %v3458_v59  ;;  %v1782_v59 = vld [vmem:[#allocation7 + $0x30] sm:$0xff]  ;;  %v3565_v53 = vld [vmem:[#allocation7 + $0xac] ss:$696 sps:$4 sm:$0xff]  }
 0x139   : > { %2550 = vmatpush1.bf16.msra.mxu1 %v3461_v60  ;;  %2510 = vmatprep.subr.bf16.mxu0 %v3104_v61  ;;  %v1786_v60 = vld [vmem:[#allocation7 + $0x210] sm:$0xff]  ;;  %v4625_v61 = vpack.c.bf16 %v1728_v56, %v1728_v56 }
 0x13a   : > { %2551 = vmatprep.subr.bf16.mxu1 %v3106_v62  ;;  %v3506_v62 = vld [vmem:[#allocation7 + $0x2e0] ss:$264 sps:$4 sm:$0xff]   ;;  %v3140_v0 = vcombine.high %v1782_v59, %v1786_v60  ;;  %v3568_v56 = vld [vmem:[#allocation7 + $0x13c] ss:$24 sps:$4 sm:$0xff]  }
 0x13c   : > { %2511 = vmatpush1.bf16.msra.mxu0 %v3103_v1  ;;  %v3511_v1 = vld [vmem:[#allocation7 + $0x5c] ss:$264 sps:$4 sm:$0xff]  }
 0x13d   : > { %2552 = vmatpush1.bf16.msra.mxu1 %v3105_v2  ;;  %2512 = vmatprep.subr.bf16.mxu0 %v3466_v3  ;;  %v3139_v2 = vcombine.low %v1782_v59, %v1786_v60  ;;  %v3509_v3 = vld [vmem:[#allocation7 + $0x58] ss:$264 sps:$4 sm:$0xff]   ;;  %v3574_v60 = vld [vmem:[#allocation7 + $0x254] ss:$216 sps:$4 sm:$0xff]  }
 0x13e   : > { %2553 = vmatprep.subr.bf16.mxu1 %v3098_v4  ;;  %v3514_v4 = vld [vmem:[#allocation7 + $0x274] ss:$120 sps:$4 sm:$0xff]   ;;  %v3569_v59 = vld [vmem:[#allocation7 + $0x1f8] ss:$-48 sps:$4 sm:$0xff]  }
 0x140   : > { %2513 = vmatpush1.bf16.msra.mxu0 %v3464_v5  ;;  %v3517_v5 = vld [vmem:[#allocation7 + $0x174] ss:$280 sps:$4 sm:$0xff]  }
 0x141   : > { %2554 = vmatpush1.bf16.msra.mxu1 %v3097_v6  ;;  %2514 = vmatprep.subr.bf16.mxu0 %v3469_v7  ;;  %v3512_v6 = vld [vmem:[#allocation7 + $0x270] ss:$120 sps:$4 sm:$0xff]  }
 0x142   : > { %2555 = vmatprep.subr.bf16.mxu1 %v3472_v8  ;;  %v3515_v7 = vld [vmem:[#allocation7 + $0x170] ss:$280 sps:$4 sm:$0xff]   ;;  %v3520_v8 = vld [vmem:[#allocation7 + $0x2bc] ss:$-40 sps:$4 sm:$0xff]  }
 0x144   : > { %2515 = vmatpush1.bf16.msra.mxu0 %v3467_v11  ;;  %v1762_v11 = vld [vmem:[#allocation7 + $0x320] sm:$0xff] }
 0x145   : > { %2556 = vmatpush1.bf16.msra.mxu1 %v3470_v12  ;;  %2516 = vmatprep.subr.bf16.mxu0 %v3475_v13  ;;  %v3518_v12 = vld [vmem:[#allocation7 + $0x2b8] ss:$-40 sps:$4 sm:$0xff]  }
 0x146   : > { %2557 = vmatprep.subr.bf16.mxu1 %v3210_v14  ;;  %v3521_v13 = vld [vmem:[#allocation7 + $0x18] ss:$336 sps:$4 sm:$0xff]   ;;  %v3116_v14 = vcombine.high %v1758_v10, %v1762_v11 }
 0x148   : > { %2517 = vmatpush2.bf16.msra.mxu0 %v3473_v15  ;;  %v3526_v15 = vld [vmem:[#allocation7 + $0x15c] ss:$624 sps:$4 sm:$0xff]  }
 0x149   : > { %2558 = vmatpush2.bf16.msra.mxu1 %v3209_v16  ;;  %2518 = vmatprep.subr.bf16.mxu0 %v3478_v17  ;;  %v3524_v16 = vld [vmem:[#allocation7 + $0x158] ss:$624 sps:$4 sm:$0xff]   ;;  %v3529_v17 = vld [vmem:[#allocation7 + $0x314] ss:$-568 sps:$4 sm:$0xff]  }
 0x14a   : > { %2559 = vmatprep.subr.bf16.mxu1 %v3481_v18  ;;  %v3532_v18 = vld [vmem:[#allocation7 + $0x23c] ss:$-72 sps:$4 sm:$0xff]  }
 0x14c   : > { %2519 = vmatpush2.bf16.msra.mxu0 %v3476_v22  ;;  %v3535_v22 = vld [vmem:[#allocation7 + $0x30c] ss:$240 sps:$4 sm:$0xff]  }
 0x14d   : > { %2560 = vmatpush2.bf16.msra.mxu1 %v3479_v23  ;;  %2520 = vmatprep.subr.bf16.mxu0 %v3484_v24  ;;  %v3538_v23 = vld [vmem:[#allocation7 + $0x3e4] ss:$-912 sps:$4 sm:$0xff]   ;;  %v1735_v24 = vld [vmem:[#allocation7 + $0xf8] sm:$0xff] }
 0x14e   : > { %2561 = vmatprep.subr.bf16.mxu1 %v3194_v25  ;;  %v1739_v25 = vld [vmem:[#allocation7 + $0x98] sm:$0xff] }
 0x150   : > { %2521 = vmatpush2.bf16.msra.mxu0 %v3482_v26  ;;  %v3533_v26 = vld [vmem:[#allocation7 + $0x308] ss:$240 sps:$4 sm:$0xff]  }
 0x151   : > { %2562 = vmatpush2.bf16.msra.mxu1 %v3193_v27  ;;  %2522 = vmatprep.subr.bf16.mxu0 %v3487_v28  ;;  %v3536_v27 = vld [vmem:[#allocation7 + $0x3e0] ss:$-912 sps:$4 sm:$0xff]   ;;  %v3541_v28 = vld [vmem:[#allocation7 + $0x22c] ss:$-536 sps:$4 sm:$0xff]  }
 0x152   : > { %2563 = vmatprep.subr.bf16.mxu1 %v3490_v29  ;;  %v3094_v29 = vcombine.high %v1735_v24, %v1739_v25 }
 0x154   : > { %2523 = vmatpush2.bf16.msra.mxu0 %v3485_v32  ;;  %v1855_v32 = vld [vmem:[#allocation7 + $0x1a8] sm:$0xff] }
 0x155   : > { %2564 = vmatpush2.bf16.msra.mxu1 %v3488_v33  ;;  %2524 = vmatprep.subr.bf16.mxu0 %v3176_v34  ;;  %v1859_v33 = vld [vmem:[#allocation7 + $0xc8] sm:$0xff] }
 0x156   : > { %2565 = vmatprep.subr.bf16.mxu1 %v3493_v35  ;;  %v3539_v34 = vld [vmem:[#allocation7 + $0x228] ss:$-536 sps:$4 sm:$0xff]   ;;  %v3093_v35 = vcombine.low %v1735_v24, %v1739_v25  ;;  %v3214_v37 = vcombine.high %v1855_v32, %v1859_v33 }
 0x158   : > { %2525 = vmatpush2.bf16.msra.mxu0 %v3175_v38  ;;  %v3211_v38 = vcombine.low %v1854_v30, %v1858_v31 }
 0x159   : > { %2566 = vmatpush2.bf16.msra.mxu1 %v3491_v39  ;;  %2526 = vmatprep.subr.bf16.mxu0 %v3496_v40  ;;  %v3213_v39 = vcombine.low %v1855_v32, %v1859_v33  ;;  %v3544_v40 = vld [vmem:[#allocation7 + $0x3ac] ss:$-936 sps:$4 sm:$0xff]  }
 0x15a   : > { %2567 = vmatprep.subr.bf16.mxu1 %v3170_v41  ;;  %v3547_v41 = vld [vmem:[#allocation7 + $0xec] ss:$248 sps:$4 sm:$0xff]  }
 0x15b   : > { %v772_v33 = vld [vmem:[%s3834_s7 + $0x20] sm:$0xff] }
 0x15c   : > { %2527 = vmatpush2.bf16.msra.mxu0 %v3494_v45  ;;  %v3550_v45 = vld [vmem:[#allocation7 + $0x17c] ss:$456 sps:$4 sm:$0xff]  }
 0x15d   : > { %2568 = vmatpush2.bf16.msra.mxu1 %v3169_v46  ;;  %2528 = vmatprep.subr.bf16.mxu0 %v3160_v47  ;;  %v3553_v46 = vld [vmem:[#allocation7 + $0x2cc] ss:$-328 sps:$4 sm:$0xff]   ;;  %v3548_v47 = vld [vmem:[#allocation7 + $0x178] ss:$456 sps:$4 sm:$0xff]  }
 0x15e   : > { %2569 = vmatprep.subr.bf16.mxu1 %v3499_v48  ;;  %v3551_v48 = vld [vmem:[#allocation7 + $0x2c8] ss:$-328 sps:$4 sm:$0xff]  }
 0x160   : > { %2529 = vmatpush2.bf16.msra.mxu0 %v3159_v49  ;;  %v3556_v49 = vld [vmem:[#allocation7 + $0x1d4] ss:$496 sps:$4 sm:$0xff]  }
 0x161   : > { %2570 = vmatpush2.bf16.msra.mxu1 %v3497_v50  ;;  %2530 = vmatprep.subr.bf16.mxu0 %v3502_v20  ;;  %v3559_v50 = vld [vmem:[#allocation7 + $0x24c] ss:$360 sps:$4 sm:$0xff]   ;;  %v3554_v20 = vld [vmem:[#allocation7 + $0x1d0] ss:$496 sps:$4 sm:$0xff]  }
 0x162   : > { %2571 = vmatprep.subr.bf16.mxu1 %v3505_v51  ;;  %v3557_v51 = vld [vmem:[#allocation7 + $0x248] ss:$360 sps:$4 sm:$0xff]  }
 0x164   : > { %2531 = vmatpush2.bf16.msra.mxu0 %v3500_v54  ;;  %v3560_v54 = vld [vmem:[#allocation7 + $0x20] ss:$40 sps:$4 sm:$0xff]  }
 0x165   : > { %2572 = vmatpush2.bf16.msra.mxu1 %v3503_v55  ;;  %2582 = vmatprep.subr.bf16.mxu0 %v3508_v57  ;;  %v3563_v55 = vld [vmem:[#allocation7 + $0xa8] ss:$696 sps:$4 sm:$0xff]   ;;  %v3571_v57 = vld [vmem:[#allocation7 + $0x1fc] ss:$-48 sps:$4 sm:$0xff]  }
 0x166   : > { %2623 = vmatprep.subr.bf16.mxu1 %v3150_v58  ;;  %v3566_v58 = vld [vmem:[#allocation7 + $0x138] ss:$24 sps:$4 sm:$0xff]  }
 0x167   : > { %2533 = vmatmul.mubr.bf16.vlgmr.msra.gmra.mxu0 %v4625_v61 }
 0x168   : > { %2574 = vmatmul.mubr.bf16.vlgmr.msra.gmra.mxu1 %v4625_v61  ;;  %2583 = vmatpush1.bf16.msra.mxu0 %v3506_v62  ;;  %v3577_v62 = vld [vmem:[#allocation7 + $0x304] ss:$-472 sps:$4 sm:$0xff]  }
 0x169   : > { %2624 = vmatpush1.bf16.msra.mxu1 %v3149_v63  ;;  %2584 = vmatprep.subr.bf16.mxu0 %v3140_v0  ;;  %v1799_v63 = vld [vmem:[#allocation7 + $0x3f0] sm:$0xff] }
 0x16a   : > { %2625 = vmatprep.subr.bf16.mxu1 %v3511_v1  ;;  %2614 = vmatprep.mubr.bf16.mxu0 %v4619_v43  ;;  %v1803_v0 = vld [vmem:[#allocation7 + $0xd0] sm:$0xff] }
 0x16b   : > { %2655 = vmatprep.mubr.bf16.mxu1 %v4619_v43  ;;  %v3115_v43 = vcombine.low %v1758_v10, %v1762_v11  ;;  %v3572_v1 = vld [vmem:[#allocation7 + $0x250] ss:$216 sps:$4 sm:$0xff]  }
 0x16c   : > { %2585 = vmatpush1.bf16.msra.mxu0 %v3139_v2  ;;  %v3575_v2 = vld [vmem:[#allocation7 + $0x300] ss:$-472 sps:$4 sm:$0xff]  }
 0x16d   : > { %2626 = vmatpush1.bf16.msra.mxu1 %v3509_v3  ;;  %2586 = vmatprep.subr.bf16.mxu0 %v3514_v4  ;;  %v3580_v3 = vld [vmem:[#allocation7 + $0x264] ss:$-472 sps:$4 sm:$0xff]   ;;  %v3158_v4 = vcombine.high %v1799_v63, %v1803_v0 }
 0x16e   : > { %2627 = vmatprep.subr.bf16.mxu1 %v3517_v5  ;;  %v3578_v5 = vld [vmem:[#allocation7 + $0x260] ss:$-472 sps:$4 sm:$0xff]  }
 0x170   : > { %2587 = vmatpush1.bf16.msra.mxu0 %v3512_v6  ;;  %v3157_v6 = vcombine.low %v1799_v63, %v1803_v0 }
 0x171   : > { %2628 = vmatpush1.bf16.msra.mxu1 %v3515_v7  ;;  %2588 = vmatprep.subr.bf16.mxu0 %v3520_v8 }
 0x172   : > { %2629 = vmatprep.subr.bf16.mxu1 %v3523_v9 }
 0x174   : > { %2589 = vmatpush1.bf16.msra.mxu0 %v3518_v12 }
 0x175   : > { %2630 = vmatpush1.bf16.msra.mxu1 %v3521_v13  ;;  %2590 = vmatprep.subr.bf16.mxu0 %v3116_v14 }
 0x176   : > { %2631 = vmatprep.subr.bf16.mxu1 %v3526_v15  ;;  %v768_v15 = vld [vmem:[%s3834_s7] sm:$0xff] }
 0x178   : > { %2591 = vmatpush1.bf16.msra.mxu0 %v3115_v43  ;;  %v770_v43 = vld [vmem:[%s3834_s7 + $0x10] sm:$0xff] }
 0x179   : > { %2632 = vmatpush1.bf16.msra.mxu1 %v3524_v16  ;;  %2592 = vmatprep.subr.bf16.mxu0 %v3529_v17  ;;  %v769_v16 = vld [vmem:[%s3834_s7 + $0x8] sm:$0xff] }
 0x17a   : > { %2633 = vmatprep.subr.bf16.mxu1 %v3532_v18 }
 0x17c   : > { %2593 = vmatpush1.bf16.msra.mxu0 %v3527_v19  ;;  %v771_v19 = vld [vmem:[%s3834_s7 + $0x18] sm:$0xff] }
 0x17d   : > { %2634 = vmatpush1.bf16.msra.mxu1 %v3530_v21  ;;  %2594 = vmatprep.subr.bf16.mxu0 %v3535_v22 }
 0x17e   : > { %2635 = vmatprep.subr.bf16.mxu1 %v3538_v23 }
 0x180   : > { %2595 = vmatpush1.bf16.msra.mxu0 %v3533_v26 }
 0x181   : > { %2636 = vmatpush1.bf16.msra.mxu1 %v3536_v27  ;;  %2596 = vmatprep.subr.bf16.mxu0 %v3541_v28 }
 0x182   : > { %2637 = vmatprep.subr.bf16.mxu1 %v3094_v29 }
 0x184   : > { %2597 = vmatpush1.bf16.msra.mxu0 %v3539_v34  ;;  %v774_v34 = vld [vmem:[%s3834_s7 + $0x30] sm:$0xff] }
 0x185   : > { %2638 = vmatpush1.bf16.msra.mxu1 %v3093_v35  ;;  %2598 = vmatprep.subr.bf16.mxu0 %v3212_v36 }
 0x186   : > { %2639 = vmatprep.subr.bf16.mxu1 %v3214_v37 }
 0x188   : > { %2599 = vmatpush2.bf16.msra.mxu0 %v3211_v38  ;;  %v773_v38 = vld [vmem:[%s3834_s7 + $0x28] sm:$0xff] }
 0x189   : > { %2640 = vmatpush2.bf16.msra.mxu1 %v3213_v39  ;;  %2600 = vmatprep.subr.bf16.mxu0 %v3544_v40  ;;  %v775_v39 = vld [vmem:[%s3834_s7 + $0x38] sm:$0xff] }
 0x18a   : > { %2641 = vmatprep.subr.bf16.mxu1 %v3547_v41 }
 0x18c   : > { %2601 = vmatpush2.bf16.msra.mxu0 %v3542_v42 }
 0x18d   : > { %2642 = vmatpush2.bf16.msra.mxu1 %v3545_v44  ;;  %2602 = vmatprep.subr.bf16.mxu0 %v3550_v45 }
 0x18e   : > { %2643 = vmatprep.subr.bf16.mxu1 %v3553_v46 }
 0x190   : > { %2603 = vmatpush2.bf16.msra.mxu0 %v3548_v47 }
 0x191   : > { %2644 = vmatpush2.bf16.msra.mxu1 %v3551_v48  ;;  %2604 = vmatprep.subr.bf16.mxu0 %v3556_v49 }
 0x192   : > { %2645 = vmatprep.subr.bf16.mxu1 %v3559_v50 }
 0x194   : > { %2605 = vmatpush2.bf16.msra.mxu0 %v3554_v20 }
 0x195   : > { %2646 = vmatpush2.bf16.msra.mxu1 %v3557_v51  ;;  %2606 = vmatprep.subr.bf16.mxu0 %v3562_v52 }
 0x196   : > { %2647 = vmatprep.subr.bf16.mxu1 %v3565_v53 }
 0x198   : > { %2607 = vmatpush2.bf16.msra.mxu0 %v3560_v54  ;;  %v2672_v54 = vld [vmem:[#allocation3 + $0x8] sm:$0xff] }
 0x199   : > { %2648 = vmatpush2.bf16.msra.mxu1 %v3563_v55  ;;  %2608 = vmatprep.subr.bf16.mxu0 %v3568_v56 }
 0x19a   : > { %2649 = vmatprep.subr.bf16.mxu1 %v3571_v57 }
 0x19c   : > { %2609 = vmatpush2.bf16.msra.mxu0 %v3566_v58 }
 0x19d   : > { %2650 = vmatpush2.bf16.msra.mxu1 %v3569_v59  ;;  %2610 = vmatprep.subr.bf16.mxu0 %v3574_v60  ;;  %v2673_v60 = vld [vmem:[#allocation3] sm:$0xff] }
 0x19e   : > { %2651 = vmatprep.subr.bf16.mxu1 %v3577_v62 }
 0x1a0   : > { %2611 = vmatpush2.bf16.msra.mxu0 %v3572_v1 }
 0x1a1   : > { %2652 = vmatpush2.bf16.msra.mxu1 %v3575_v2  ;;  %2612 = vmatprep.subr.bf16.mxu0 %v3580_v3 }
 0x1a2   : > { %2653 = vmatprep.subr.bf16.mxu1 %v3158_v4 }
 0x1a4   : > { %2613 = vmatpush2.bf16.msra.mxu0 %v3578_v5 }
 0x1a5   : > { %2654 = vmatpush2.bf16.msra.mxu1 %v3157_v6 }
 0x1a7   : > { %v1590_v7 = vpop.f32.mrf.mxu0  ;;  %2615 = vmatmul.mubr.bf16.vlgmr.msra.gmra.mxu0 %v4625_v61 }
 0x1a8   : > { %v1631_v8 = vpop.f32.mrf.mxu1  ;;  %2656 = vmatmul.mubr.bf16.vlgmr.msra.gmra.mxu1 %v4625_v61  ;;  %v1720_v17 = vadd.f32 %v1590_v7, %v768_v15 }
 0x1a9   : > { %v1592_v9 = vpop.f32.mrf.mxu0  ;;  %v1722_v18 = vadd.f32 %v1631_v8, %v770_v43 }
 0x1aa   : > { %v1633_v10 = vpop.f32.mrf.mxu1  ;;  %v1721_v21 = vadd.f32 %v1592_v9, %v769_v16  ;;  %v3215_v22 = vmul.f32 -1.442695, %v1720_v17 }
 0x1ab   : > { %v1594_v11 = vpop.f32.mrf.mxu0  ;;  %v1723_v23 = vadd.f32 %v1633_v10, %v771_v19  ;;  %v3217_v24 = vmul.f32 -1.442695, %v1722_v18 }
 0x1ac   : > { %v1635_v12 = vpop.f32.mrf.mxu1  ;;  %v3216_v25 = vmul.f32 -1.442695, %v1721_v21  ;;  %3581 = vpow2.f32 %v3215_v22 }
 0x1ad   : > { %v1595_v13 = vpop.f32.mrf.mxu0  ;;  %v3218_v61 = vmul.f32 -1.442695, %v1723_v23  ;;  %3583 = vpow2.f32 %v3217_v24 }
 0x1ae   : > { %v1636_v14 = vpop.f32.mrf.mxu1  ;;  %3585 = vpow2.f32 %v3216_v25 }
 0x1af   : > { %3587 = vpow2.f32 %v3218_v61 }
 0x1b9   : > { %v3582_v26 = vpop.eup %3581 }
 0x1ba   : > { %v3584_v27 = vpop.eup %3583  ;;  %v2680_v29 = vadd.f32 1.0, %v3582_v26 }
 0x1bb   : > { %v3586_v28 = vpop.eup %3585  ;;  %v2692_v31 = vadd.f32 1.0, %v3584_v27 }
 0x1bc   : > { %v3588_v30 = vpop.eup %3587  ;;  %v2681_v32 = vadd.f32 1.0, %v3586_v28  ;;  %3589 = vrcp.f32 %v2680_v29 }
 0x1bd   : > { %v2693_v35 = vadd.f32 1.0, %v3588_v30  ;;  %3591 = vrcp.f32 %v2692_v31 }
 0x1be   : > { %3593 = vrcp.f32 %v2681_v32 }
 0x1c9   : > { %v3590_v52 = vpop.eup %3589 }
 0x1ca   : > { %v3592_v53 = vpop.eup %3591 }
 0x1cb   : > { %v3594_v55 = vpop.eup %3593  ;;  %v2712_v58 = vmul.f32 %v3592_v53, %v2672_v54 }
 0x1e7   : > { %v1672_v36 = vpop.f32.mrf.mxu0 }
 0x1e8   : > { %v1713_v37 = vpop.f32.mrf.mxu1  ;;  %v1724_v40 = vadd.f32 %v1672_v36, %v772_v33 }
 0x1e9   : > { %v1726_v41 = vadd.f32 %v1713_v37, %v774_v34  ;;  %v1674_v42 = vpop.f32.mrf.mxu0 }
 0x1ea   : > { %v1715_v44 = vpop.f32.mrf.mxu1  ;;  %3595 = vtanh.f32 %v1724_v40  ;;  %v1725_v46 = vadd.f32 %v1674_v42, %v773_v38 }
 0x1eb   : > { %v3219_v45 = vmul.f32 -1.442695, %v1726_v41  ;;  %v1727_v47 = vadd.f32 %v1715_v44, %v775_v39  ;;  %3597 = vrcp.f32 %v2693_v35  ;;  %v1676_v48 = vpop.f32.mrf.mxu0 }
 0x1ec   : > { %v1717_v49 = vpop.f32.mrf.mxu1 }
 0x1ed   : > { %3599 = vpow2.f32 %v3219_v45  ;;  %v3220_v50 = vmul.f32 -1.442695, %v1727_v47  ;;  %v1677_v20 = vpop.f32.mrf.mxu0 }
 0x1ee   : > { %3601 = vtanh.f32 %v1725_v46  ;;  %v1718_v51 = vpop.f32.mrf.mxu1 }
 0x1ef   : > { %3603 = vpow2.f32 %v3220_v50 }
 0x1f7   : > { %v3596_v56 = vpop.eup %3595 }
 0x1f8   : > { %v3598_v57 = vpop.eup %3597  ;;  %v2714_v59 = vmul.f32 %v3596_v56, %v3590_v52 }
 0x1f9   : > { %v2713_v3 = vmul.f32 %v3598_v57, %v2673_v60 }
 0x1fa   : > { %v3600_v62 = vpop.eup %3599  ;;  %v2716_v0 = vadd.f32 %v2714_v59, %v2712_v58 }
 0x1fb   : > { %v3602_v63 = vpop.eup %3601  ;;  %v2706_v1 = vadd.f32 1.0, %v3600_v62 }
 0x1fc   : > { %v3604_v2 = vpop.eup %3603  ;;  %v2715_v4 = vmul.f32 %v3602_v63, %v3594_v55  ;;  %3605 = vtanh.f32 %v2716_v0  ;;  %2774 = vst [vmem:[#allocation3 + $0x8] sm:$0xff] %v2716_v0 }
 0x1fd   : > { %v2707_v5 = vadd.f32 1.0, %v3604_v2  ;;  %3607 = vrcp.f32 %v2706_v1 }
 0x1fe   : > { %v2717_v6 = vadd.f32 %v2715_v4, %v2713_v3 }
 0x1ff   : > { %3609 = vrcp.f32 %v2707_v5 }
 0x200   : > { %3611 = vtanh.f32 %v2717_v6  ;;  %2775 = vst [vmem:[#allocation3] sm:$0xff] %v2717_v6 }
 0x209   : > { %v3606_v7 = vpop.eup %3605 }
 0x20a   : > { %v3608_v8 = vpop.eup %3607 }
 0x20b   : > { %v2720_v10 = vmul.f32 %v3608_v8, %v3606_v7 }
 0x20c   : > { %v3610_v9 = vpop.eup %3609 }
 0x20d   : > { %v3612_v11 = vpop.eup %3611  ;;  %2772 = vst [vmem:[#allocation2] sm:$0xff] %v2720_v10  ;;  %v3227_v13 = vmul.f32 -1.442695, %v2720_v10 }
 0x20e   : > { %v2721_v12 = vmul.f32 %v3612_v11, %v3610_v9 }
 0x20f   : > { %3613 = vpow2.f32 %v3227_v13 }
 0x210   : > { %2773 = vst [vmem:[#allocation2 + $0x8] sm:$0xff] %v2721_v12  ;;  %v3228_v14 = vmul.f32 -1.442695, %v2721_v12 }
 0x212   : > { %3615 = vpow2.f32 %v3228_v14 }
 0x21c   : > { %v3614_v15 = vpop.eup %3613 }
 0x21d   : > { %v2786_v43 = vadd.f32 1.0, %v3614_v15 }
 0x21f   : > { %v3616_v16 = vpop.eup %3615  ;;  %3617 = vrcp.f32 %v2786_v43 }
 0x220   : > { %v2787_v17 = vadd.f32 1.0, %v3616_v16 }
 0x222   : > { %3619 = vrcp.f32 %v2787_v17 }
 0x227   : > { %v2534_v18 = vpop.f32.mrf.mxu0 }
 0x228   : > { %v2575_v19 = vpop.f32.mrf.mxu1 }
 0x229   : > { %v2536_v21 = vpop.f32.mrf.mxu0 }
 0x22a   : > { %v2577_v22 = vpop.f32.mrf.mxu1 }
 0x22b   : > { %v2538_v23 = vpop.f32.mrf.mxu0 }
 0x22c   : > { %v2579_v24 = vpop.f32.mrf.mxu1  ;;  %v3618_v25 = vpop.eup %3617 }
 0x22d   : > { %v2539_v61 = vpop.f32.mrf.mxu0  ;;  %2792 = vst [vmem:[%s3836_s8] sm:$0xff] %v3618_v25 }
 0x22e   : > { %v2580_v26 = vpop.f32.mrf.mxu1 }
 0x22f   : > { %v3620_v27 = vpop.eup %3619 }
 0x230   : > { %2793 = vst [vmem:[%s3836_s8 + $0x8] sm:$0xff] %v3620_v27 }
 0x231   : > { %3666 = shalt.err (!%p3663_p4)
}
 0x232   : > { %s3667_s8 = scalar_lea.hbm %s4649_s29, 256  ;;  %s3671_s14 = scalar_lea.hbm %s4724_s3, 2048 }
 0x233   : > { %p3668_p7 = scmp.ne.s32.totalorder %s4649_s29, %s3667_s8  ;;  %p3672_p10 = scmp.lt.s32.totalorder %s4649_s29, %s4724_s3 }
 0x234   : > { %p3673_p11 = scmp.lt.s32.totalorder %s3671_s14, %s3667_s8 }
 0x235   : > { %p3669_p8 = pnand %p3668_p7, %p3815_p5 }
 0x236   : > { %p3674_p12 = por %p3673_p11, %p3672_p10 }
 0x237   : > { %p3670_p9 = pneg %p3669_p8 }
 0x239   : > { %p3675_p13 = pnand %p3674_p12, %p3670_p9 }
 0x23b   : > { %3678 = shalt.err (!%p3675_p13)
}
 0x23c   : > { %3242 = dma.vmem_to_hbm [thread:$0]  (%p3815_p5), %s2817_s22, 256, %s4649_s29, %s2797_s30   ;;  %v776_v28 = vld [vmem:[%s3834_s7 + $0x40] sm:$0xff]  ;;  %v778_v29 = vld [vmem:[%s3834_s7 + $0x50] sm:$0xff]  ;;  %v777_v30 = vld [vmem:[%s3834_s7 + $0x48] sm:$0xff] }
 0x23d   : > { %v2664_v31 = vadd.f32 %v2534_v18, %v776_v28  ;;  %v2666_v32 = vadd.f32 %v2575_v19, %v778_v29  ;;  %v779_v33 = vld [vmem:[%s3834_s7 + $0x58] sm:$0xff]  ;;  %v2665_v34 = vadd.f32 %v2536_v21, %v777_v30  ;;  %v780_v48 = vld [vmem:[%s3834_s7 + $0x60] sm:$0xff]  ;;  %v782_v49 = vld [vmem:[%s3834_s7 + $0x70] sm:$0xff]  ;;  %s4684_s30 = scalar_lea.hbm %s4725_s4, %s3240_s20  ;;  %s2802_s5 = scalar_lea.sflag [#allocation12], %s3826_s27 }
 0x23e   : > { %v2667_v36 = vadd.f32 %v2577_v22, %v779_v33  ;;  %v781_v52 = vld [vmem:[%s3834_s7 + $0x68] sm:$0xff]  ;;  %v783_v53 = vld [vmem:[%s3834_s7 + $0x78] sm:$0xff]  ;;  %v2722_v5 = vld [vmem:[#allocation5] sm:$0xff]  ;;  %s2830_s7 = sshll.u32 %s3838_s9, 4  ;;  %s3751_s10 = smov [#allocation11]   ;;  %s2831_s7 = int_to_ptr.vmem [resolvable:$true] %s2830_s7 }
 0x23f   : > { %v3221_v35 = vmul.f32 -1.442695, %v2664_v31  ;;  %v3223_v37 = vmul.f32 -1.442695, %v2666_v32  ;;  %v3222_v38 = vmul.f32 -1.442695, %v2665_v34 }
 0x240   : > { %v3224_v39 = vmul.f32 -1.442695, %v2667_v36  ;;  %v2723_v11 = vld [vmem:[#allocation5 + $0x8] sm:$0xff]  ;;  %s3679_s6 = scalar_lea.vmem %s2831_s7, 256  ;;  %s3683_s11 = sshll.u32 %s3751_s10, 4  ;;  %s3684_s11 = int_to_ptr.vmem [resolvable:$false] %s3683_s11 }
 0x241   : > { %3621 = vpow2.f32 %v3221_v35  ;;  %p3680_p0 = scmp.ne.s32.totalorder %s2831_s7, %s3679_s6  ;;  %s3685_s8 = scalar_lea.vmem %s3684_s11, 512 }
 0x242   : > { %3623 = vpow2.f32 %v3223_v37  ;;  %p3686_p3 = scmp.lt.s32.totalorder %s2831_s7, %s3684_s11  ;;  %p3687_p4 = scmp.lt.s32.totalorder %s3685_s8, %s3679_s6 }
 0x243   : > { %3625 = vpow2.f32 %v3222_v38  ;;  %p3681_p1 = pnand %p3680_p0, %p3815_p5 }
 0x244   : > { %3627 = vpow2.f32 %v3224_v39  ;;  %p3688_p7 = por %p3687_p4, %p3686_p3 }
 0x245   : > { %p3682_p2 = pneg %p3681_p1 }
 0x247   : > { %p3689_p8 = pnand %p3688_p7, %p3682_p2 }
 0x24e   : > { %v3622_v40 = vpop.eup %3621 }
 0x24f   : > { %v3624_v41 = vpop.eup %3623  ;;  %v2730_v44 = vadd.f32 1.0, %v3622_v40 }
 0x250   : > { %v3626_v42 = vpop.eup %3625  ;;  %v2742_v46 = vadd.f32 1.0, %v3624_v41 }
 0x251   : > { %v3628_v45 = vpop.eup %3627  ;;  %v2731_v47 = vadd.f32 1.0, %v3626_v42  ;;  %3629 = vrcp.f32 %v2730_v44 }
 0x252   : > { %v2743_v50 = vadd.f32 1.0, %v3628_v45  ;;  %3631 = vrcp.f32 %v2742_v46 }
 0x253   : > { %3633 = vrcp.f32 %v2731_v47 }
 0x25e   : > { %v3630_v3 = vpop.eup %3629 }
 0x25f   : > { %v3632_v4 = vpop.eup %3631 }
 0x260   : > { %v3634_v6 = vpop.eup %3633  ;;  %v2762_v9 = vmul.f32 %v3632_v4, %v2722_v5 }
 0x267   : > { %v2616_v20 = vpop.f32.mrf.mxu0 }
 0x268   : > { %v2657_v51 = vpop.f32.mrf.mxu1  ;;  %v2668_v54 = vadd.f32 %v2616_v20, %v780_v48 }
 0x269   : > { %v2670_v55 = vadd.f32 %v2657_v51, %v782_v49  ;;  %v2618_v56 = vpop.f32.mrf.mxu0 }
 0x26a   : > { %v2659_v57 = vpop.f32.mrf.mxu1  ;;  %3635 = vtanh.f32 %v2668_v54  ;;  %v2669_v59 = vadd.f32 %v2618_v56, %v781_v52 }
 0x26b   : > { %v3225_v58 = vmul.f32 -1.442695, %v2670_v55  ;;  %v2671_v60 = vadd.f32 %v2659_v57, %v783_v53  ;;  %3637 = vrcp.f32 %v2743_v50  ;;  %v2620_v62 = vpop.f32.mrf.mxu0 }
 0x26c   : > { %v2661_v63 = vpop.f32.mrf.mxu1 }
 0x26d   : > { %3639 = vpow2.f32 %v3225_v58  ;;  %v3226_v0 = vmul.f32 -1.442695, %v2671_v60  ;;  %v2621_v1 = vpop.f32.mrf.mxu0 }
 0x26e   : > { %3641 = vtanh.f32 %v2669_v59  ;;  %v2662_v2 = vpop.f32.mrf.mxu1 }
 0x26f   : > { %3643 = vpow2.f32 %v3226_v0 }
 0x277   : > { %v3636_v7 = vpop.eup %3635 }
 0x278   : > { %v3638_v8 = vpop.eup %3637  ;;  %v2764_v10 = vmul.f32 %v3636_v7, %v3630_v3 }
 0x279   : > { %v2763_v16 = vmul.f32 %v3638_v8, %v2723_v11 }
 0x27a   : > { %v3640_v12 = vpop.eup %3639  ;;  %v2766_v14 = vadd.f32 %v2764_v10, %v2762_v9 }
 0x27b   : > { %v3642_v13 = vpop.eup %3641  ;;  %v2756_v15 = vadd.f32 1.0, %v3640_v12 }
 0x27c   : > { %v3644_v43 = vpop.eup %3643  ;;  %v2765_v17 = vmul.f32 %v3642_v13, %v3634_v6  ;;  %3645 = vtanh.f32 %v2766_v14  ;;  %2778 = vst [vmem:[#allocation5] sm:$0xff] %v2766_v14 }
 0x27d   : > { %v2757_v18 = vadd.f32 1.0, %v3644_v43  ;;  %3647 = vrcp.f32 %v2756_v15 }
 0x27e   : > { %v2767_v19 = vadd.f32 %v2765_v17, %v2763_v16 }
 0x27f   : > { %3649 = vrcp.f32 %v2757_v18 }
 0x280   : > { %3651 = vtanh.f32 %v2767_v19  ;;  %2779 = vst [vmem:[#allocation5 + $0x8] sm:$0xff] %v2767_v19 }
 0x289   : > { %v3646_v21 = vpop.eup %3645 }
 0x28a   : > { %v3648_v22 = vpop.eup %3647 }
 0x28b   : > { %v2770_v24 = vmul.f32 %v3648_v22, %v3646_v21 }
 0x28c   : > { %v3650_v23 = vpop.eup %3649 }
 0x28d   : > { %v3652_v25 = vpop.eup %3651  ;;  %2776 = vst [vmem:[#allocation4 + $0x8] sm:$0xff] %v2770_v24  ;;  %2794 = vst [vmem:[%s3838_s9] sm:$0xff] %v2770_v24 }
 0x28e   : > { %v2771_v61 = vmul.f32 %v3652_v25, %v3650_v23 }
 0x290   : > { %2777 = vst [vmem:[#allocation4] sm:$0xff] %v2771_v61  ;;  %2795 = vst [vmem:[%s3838_s9 + $0x8] sm:$0xff] %v2771_v61 }
 0x291   : > { %3692 = shalt.err (!%p3689_p8)
}
 0x292   : > { %s3693_s19 = scalar_lea.hbm %s4684_s30, 256  ;;  %s3697_s20 = scalar_lea.hbm %s4725_s4, 2048 }
 0x293   : > { %p3694_p9 = scmp.ne.s32.totalorder %s4684_s30, %s3693_s19  ;;  %p3698_p12 = scmp.lt.s32.totalorder %s4684_s30, %s4725_s4 }
 0x294   : > { %p3699_p13 = scmp.lt.s32.totalorder %s3697_s20, %s3693_s19 }
 0x295   : > { %p3695_p10 = pnand %p3694_p9, %p3815_p5 }
 0x296   : > { %p3700_p0 = por %p3699_p13, %p3698_p12 }
 0x297   : > { %p3696_p11 = pneg %p3695_p10 }
 0x299   : > { %p3701_p1 = pnand %p3700_p0, %p3696_p11 }
 0x29b   : > { %3704 = shalt.err (!%p3701_p1)
}
 0x29c   : > { %3243 = dma.vmem_to_hbm [thread:$0]  (%p3815_p5), %s2831_s7, 256, %s4684_s30, %s2802_s5  }
 0x29d PF: > { %p3253_p2 = scmp.ge.s32.totalorder %s3747_s18, 2  ;;  %s2842_s14 = sand.u32 1, %s3735_s15  }
 0x29e   : > { %s2843_s23 = scalar_lea.sflag [#allocation10], %s2842_s14 }
 0x29f   : > { %p3247_p3 = pnand %p3253_p2, %p3819_p6 }
 0x2a1   : > { %p3248_p4 = pneg %p3247_p3 }
 0x2a3   : > { %3726 = dma.done.wait (%p3248_p4), %s2843_s23, 256  }
 0x2a4   : > { %3728 = vsyncadd (%p3248_p4), %s2843_s23, 4294967040  ;;  %s2852_s28 = scalar_lea.sflag [#allocation12], %s2842_s14 }
 0x2a5   : > { %3730 = dma.done.wait (%p3248_p4), %s2852_s28, 256  }
 0x2a6   : > { %3732 = vsyncadd (%p3248_p4), %s2852_s28, 4294967040  ;;  %p18_p5 = scmp.ge.s32.totalorder %s3802_s21, 10   ;;  %s4728_s15 = smov %s3739_s16 }
 0x2a7   : > { %s4729_s16 = smov %s3743_s17  ;;  %s4730_s17 = smov %s3813_s24 }
 0x2a8   : > { %s4731_s18 = smov %s3802_s21  ;;  %20 = sbr.rel (!%p18_p5) target bundleno = 5 (0x5), region = 166 }
 0x2ad   :  { %2857 = vsyncpa [#allocation10], 1 }
 0x2ae   :  { %2859 = vsyncpa [#allocation10 + $0x1], 1 }
 0x2af   :  { %2860 = vsyncpa [#allocation12], 1 }
 0x2b0   :  { %2862 = vsyncpa [#allocation12 + $0x1], 1 }
 0x2b1   :  { %2863 = vsyncmov [#allocation8] }
 0x2b4   :  { %s2864_s18 = vpop.sfrf %2863 }
 0x2b5   :  { %p3237_p6 = scmp.ne.s32.totalorder %s2864_s18, 0 }
 0x2b7   :  { %2868 = shalt.err (%p3237_p6)  }
 0x2b8   :  { %2870 = vsyncmov [#allocation8 + $0x1] }
 0x2bb   :  { %s2871_s25 = vpop.sfrf %2870 }
 0x2bc   :  { %p3238_p7 = scmp.ne.s32.totalorder %s2871_s25, 0 }
 0x2be   :  { %2875 = shalt.err (%p3238_p7)  }

</bundles_post_ra>
